<compile_context>
chip_gen: v6e
topology: v6e:2x2x1
jax: 0.10.0
libtpu: 0.0.40
codegen_flags: <defaults>
</compile_context>

<pallas_src>
import jax
import jax.numpy as jnp
from jax import lax
from jax.experimental import pallas as pl
from jax.experimental.pallas import tpu as pltpu

EPS = 1e-5
LANES = 128


def _round_up(x, m):
    return (x + m - 1) // m * m


# --------------------------------- kernel ------------------------------------
def bottleneck_kernel(x_ref, w1_ref, b1_ref, w2_ref, b2_ref, w3_ref, b3_ref,
                      out_ref, pad_ref):
    bt, H, W, Cin = x_ref.shape          # channel dims already 128-padded
    C3 = pad_ref.shape[-1]               # 3 * C_p  (dx-stacked channel blocks)
    C = C3 // 3
    Cout = w3_ref.shape[1]
    P = bt * H * W
    cdt = pad_ref.dtype                  # MXU operand dtype (bf16)
    f32 = jnp.float32

    # ---- conv1 (1x1, no bias) + bn1 (scale folded into w1) + relu ----
    x2d = x_ref[...].reshape(P, Cin).astype(cdt)
    h1 = jnp.dot(x2d, w1_ref[...], preferred_element_type=f32)
    h1 = jnp.maximum(h1 + b1_ref[...], 0.0)                       # (P, C) f32

    # ---- build dx-pre-shifted, channel-stacked halo scratch ----
    # S[b, r, x, dx*C:(dx+1)*C] = h1_pad[b, r-1, x+dx-1]  (zero outside image).
    # dx shifts are done once here on VALUES (no unaligned tap reads later);
    # only the two full-width halo rows are zeroed.
    h1_4d = h1.astype(cdt).reshape(bt, H, W, C)
    zcol = jnp.zeros((bt, H, 1, C), cdt)
    left = jnp.concatenate([zcol, h1_4d[:, :, :W - 1, :]], axis=2)   # h1_pad[., x-1]
    right = jnp.concatenate([h1_4d[:, :, 1:, :], zcol], axis=2)      # h1_pad[., x+1]
    # TODO(synk): the W-shifts above could use pltpu.roll (XLU) + a boundary
    # mask instead of value concatenation if the relayout ever shows up hot.

    zrow = jnp.zeros((bt, 1, W, C3), cdt)
    pad_ref[:, 0:1, :, :] = zrow
    pad_ref[:, H + 1:H + 2, :, :] = zrow
    pad_ref[:, 1:H + 1, :, 0 * C:1 * C] = left
    pad_ref[:, 1:H + 1, :, 1 * C:2 * C] = h1_4d
    pad_ref[:, 1:H + 1, :, 2 * C:3 * C] = right

    # ---- conv2 (3x3, stride 1, pad 1) + bn2 + relu ----
    # 3 accumulating dots (one per dy), each K = 3*C, reads are H-offset slices
    # of the scratch (aligned: H is not a tiled dim).  No im2col materialized.
    acc = None
    for dy in range(3):
        band = pad_ref[:, dy:dy + H, :, :].reshape(P, C3)
        part = jnp.dot(band, w2_ref[dy], preferred_element_type=f32)
        acc = part if acc is None else acc + part
    h2 = jnp.maximum(acc + b2_ref[...], 0.0)                        # (P, C) f32

    # ---- conv3 (1x1, conv bias + bn3 folded into b3) ----
    h3 = jnp.dot(h2.astype(cdt), w3_ref[...], preferred_element_type=f32)
    h3 = h3 + b3_ref[...]                                           # (P, Cout)

    # ---- residual add (downsample=None => Cin == Cout) + relu ----
    y = jnp.maximum(h3.reshape(bt, H, W, Cout) + x_ref[...].astype(f32), 0.0)
    out_ref[...] = y.astype(out_ref.dtype)


# ----------------------------- parameter folding -----------------------------
def fold_bn(gamma, beta, mean, var):
    s = gamma / jnp.sqrt(var + EPS)
    return s, beta - s * mean


def fold_params(w1_oihw, bn1, w2_oihw, bn2, w3_oihw, conv3_bias, bn3,
                compute_dtype=jnp.bfloat16):
    """PyTorch-layout weights + BN stats -> kernel layout.

    BN scales are folded into the weight output-channel columns, biases stay
    f32; channel dims are zero-padded to a multiple of 128 (lane-dense)."""
    C, Cin = w1_oihw.shape[:2]
    Cout = w3_oihw.shape[0]
    Cin_p, C_p, Cout_p = (_round_up(c, LANES) for c in (Cin, C, Cout))

    s1, b1 = fold_bn(*bn1)
    s2, b2 = fold_bn(*bn2)
    s3, b3 = fold_bn(*bn3)
    b3 = b3 + s3 * conv3_bias                       # fold conv3 bias into bn3

    # scale folded into the output-channel columns of each conv weight
    w1_k = jnp.transpose(w1_oihw[:, :, 0, 0], (1, 0)) * s1[None, :]        # (Cin, C)
    w2_k = jnp.transpose(w2_oihw, (2, 3, 1, 0)) * s2[None, None, None, :]  # (kh,kw,ci,co)
    w3_k = jnp.transpose(w3_oihw[:, :, 0, 0], (1, 0)) * s3[None, :]        # (C, Cout)

    f32 = jnp.float32
    w1_p = jnp.zeros((Cin_p, C_p), f32).at[:Cin, :C].set(w1_k)
    # (dy, dx, ci, co) -> (dy, dx*C_p + ci, co): row order matches the
    # dx-stacked scratch channel layout [dx=0 | dx=1 | dx=2].
    w2_p = (jnp.zeros((3, 3, C_p, C_p), f32).at[:, :, :C, :C].set(w2_k)
            .reshape(3, 3 * C_p, C_p))
    w3_p = jnp.zeros((C_p, Cout_p), f32).at[:C, :Cout].set(w3_k)

    def vec(v, n):
        return jnp.zeros((1, n), f32).at[0, :v.shape[0]].set(v)

    return (w1_p.astype(compute_dtype), vec(b1, C_p),
            w2_p.astype(compute_dtype), vec(b2, C_p),
            w3_p.astype(compute_dtype), vec(b3, Cout_p))


# --------------------------- generation-aware sizing --------------------------
def _vmem_limit_bytes():
    # Big limit on v5e/v6e (128 MiB physical), tighter on v7x (64 MiB).
    # ~25% headroom is left for compiler-internal scratch.
    try:
        cap = int(pltpu.get_tpu_info().vmem_capacity_bytes)
    except Exception:
        cap = 64 * 1024 * 1024
    return min(cap * 3 // 4, 100 * 1024 * 1024)


def _pick_block_batch(N, H, W, Cin_p, C_p, Cout_p, in_dtype, compute_dtype,
                      budget):
    in_b = jnp.dtype(in_dtype).itemsize
    cd_b = jnp.dtype(compute_dtype).itemsize

    def per_step_bytes(bt):
        px = bt * H * W
        tiles = 2 * px * Cin_p * in_b + 2 * px * Cout_p * in_b   # dbl-buffered in/out
        scratch = bt * (H + 2) * W * 3 * C_p * cd_b
        interm = px * (C_p + 3 * C_p + Cout_p) * 4               # f32 h1/h2/h3 values
        return tiles + scratch + interm

    cands = []
    for bt in range(1, N + 1):
        if N % bt or per_step_bytes(bt) > budget:
            continue
        # keep >=2 grid steps so the "parallel" batch axis feeds both v7x cores
        if N // bt >= 2 or N == 1:
            cands.append(bt)
    if not cands:
        cands = [1]
    # prefer an MXU-friendly M (= bt*H*W multiple of 256)
    pref = [bt for bt in cands if (bt * H * W) % 256 == 0]
    return max(pref) if pref else max(cands)


# --------------------------------- wrapper -----------------------------------
def bottleneck_forward(x_nchw, kparams, *, block_batch=None):
    """x_nchw: (N, Cin, H, W). kparams: output of fold_params."""
    w1, b1, w2, b2, w3, b3 = kparams
    N, Cin, H, W = x_nchw.shape
    Cin_p, C_p = w1.shape
    Cout_p = w3.shape[1]
    assert Cin_p == Cout_p, "downsample=None requires in_channel == out_channel*expansion"
    cdt = w1.dtype

    # TODO(synk): in a full NHWC ResNet pipeline these transposes (and the
    # channel pad/slice) disappear by keeping activations NHWC, 128-padded.
    x_nhwc = jnp.transpose(x_nchw, (0, 2, 3, 1))
    if Cin_p != Cin:
        x_nhwc = jnp.pad(x_nhwc, ((0, 0), (0, 0), (0, 0), (0, Cin_p - Cin)))

    vmem_limit = _vmem_limit_bytes()
    if block_batch is None:
        block_batch = _pick_block_batch(N, H, W, Cin_p, C_p, Cout_p,
                                        x_nhwc.dtype, cdt, vmem_limit)
    bt = block_batch
    assert N % bt == 0

    def resident(arr):
        # Constant block index -> stays VMEM-resident across grid steps.
        # TODO(synk): pipeline_mode=pl.Buffered(1) would drop the second buffer
        # for these constant-index blocks (small VMEM win on v7x).
        return pl.BlockSpec(arr.shape, lambda n, _nd=arr.ndim: (0,) * _nd)

    out_nhwc = pl.pallas_call(
        bottleneck_kernel,
        out_shape=jax.ShapeDtypeStruct((N, H, W, Cout_p), x_nchw.dtype),
        grid=(N // bt,),
        in_specs=[
            pl.BlockSpec((bt, H, W, Cin_p), lambda n: (n, 0, 0, 0)),
            resident(w1), resident(b1),
            resident(w2), resident(b2),
            resident(w3), resident(b3),
        ],
        out_specs=pl.BlockSpec((bt, H, W, Cout_p), lambda n: (n, 0, 0, 0)),
        scratch_shapes=[pltpu.VMEM((bt, H + 2, W, 3 * C_p), cdt)],
        compiler_params=pltpu.CompilerParams(
            dimension_semantics=("parallel",),       # v7x: shard batch over 2 TCs
            vmem_limit_bytes=vmem_limit),
    )(x_nhwc, w1, b1, w2, b2, w3, b3)

    out = out_nhwc[..., :Cin]                        # Cout == Cin; drop channel pad
    return jnp.transpose(out, (0, 3, 1, 2))


# ------------------------- references (pure JAX) ------------------------------
def ref_forward(x, w1_oihw, bn1, w2_oihw, bn2, w3_oihw, conv3_bias, bn3):
    """Exact f32 semantics of the PyTorch module (inference-mode BN)."""
    def bn(h, g, b, m, v):
        g, b, m, v = (t[None, :, None, None] for t in (g, b, m, v))
        return g * (h - m) / jnp.sqrt(v + EPS) + b

    dn = ('NCHW', 'OIHW', 'NCHW')
    hp = lax.Precision.HIGHEST
    h = lax.conv_general_dilated(x, w1_oihw, (1, 1), 'VALID',
                                 dimension_numbers=dn, precision=hp)
    h = jax.nn.relu(bn(h, *bn1))
    h = lax.conv_general_dilated(h, w2_oihw, (1, 1), ((1, 1), (1, 1)),
                                 dimension_numbers=dn, precision=hp)
    h = jax.nn.relu(bn(h, *bn2))
    h = lax.conv_general_dilated(h, w3_oihw, (1, 1), 'VALID',
                                 dimension_numbers=dn, precision=hp)
    h = h + conv3_bias[None, :, None, None]
    h = bn(h, *bn3)
    return jax.nn.relu(h + x)


def emu_forward(x_nchw, kparams):
    """Plain-JAX emulation of the kernel's exact folded / padded / bf16 math
    (used as a tight structural check; only MXU reduction order differs)."""
    w1, b1, w2, b2, w3, b3 = kparams
    cd = w1.dtype
    Cin_p, C_p = w1.shape
    N, Cin, H, W = x_nchw.shape
    f32 = jnp.float32

    x = jnp.transpose(x_nchw, (0, 2, 3, 1))
    x = jnp.pad(x, ((0, 0), (0, 0), (0, 0), (0, Cin_p - Cin)))

    h1 = jnp.einsum('nhwi,io->nhwo', x.astype(cd), w1,
                    preferred_element_type=f32) + b1[0]
    h1 = jnp.maximum(h1, 0.0).astype(cd)

    w2_4d = w2.reshape(3, 3, C_p, C_p)
    h1p = jnp.pad(h1, ((0, 0), (1, 1), (1, 1), (0, 0)))
    h2 = sum(jnp.einsum('nhwi,io->nhwo', h1p[:, dy:dy + H, dx:dx + W, :],
                        w2_4d[dy, dx], preferred_element_type=f32)
             for dy in range(3) for dx in range(3)) + b2[0]
    h2 = jnp.maximum(h2, 0.0).astype(cd)

    h3 = jnp.einsum('nhwi,io->nhwo', h2, w3, preferred_element_type=f32) + b3[0]
    y = jnp.maximum(h3 + x.astype(f32), 0.0)
    return jnp.transpose(y[..., :Cin], (0, 3, 1, 2))


if __name__ == "__main__":
    # BottleNeck(in_channel=16, out_channel=4), expansion=4, stride=1, downsample=None
    N, H, W = 2, 16, 16
    Cin, C = 16, 4
    Cout = C * 4  # == Cin so the residual add is valid without a downsample

    key = jax.random.PRNGKey(0)
    ks = jax.random.split(key, 16)

    x = jax.random.normal(ks[0], (N, Cin, H, W), jnp.float32)

    # PyTorch-layout parameters (OIHW conv weights), deterministic init
    w1_oihw = jax.random.normal(ks[1], (C, Cin, 1, 1), jnp.float32) * 0.2
    w2_oihw = jax.random.normal(ks[2], (C, C, 3, 3), jnp.float32) * 0.2
    w3_oihw = jax.random.normal(ks[3], (Cout, C, 1, 1), jnp.float32) * 0.2
    cb3 = jax.random.normal(ks[4], (Cout,), jnp.float32) * 0.1

    def bn_params(k, ch):
        k1, k2, k3, k4 = jax.random.split(k, 4)
        gamma = jax.random.uniform(k1, (ch,), jnp.float32, 0.5, 1.5)
        beta = jax.random.normal(k2, (ch,), jnp.float32) * 0.1
        mean = jax.random.normal(k3, (ch,), jnp.float32) * 0.1
        var = jax.random.uniform(k4, (ch,), jnp.float32, 0.5, 1.5)
        return gamma, beta, mean, var

    bn1 = bn_params(ks[5], C)
    bn2 = bn_params(ks[6], C)
    bn3 = bn_params(ks[7], Cout)

    kparams = fold_params(w1_oihw, bn1, w2_oihw, bn2, w3_oihw, cb3, bn3,
                          compute_dtype=jnp.bfloat16)

    out = bottleneck_forward(x, kparams)
    out = jax.block_until_ready(out)
    assert out.shape == (N, Cin, H, W)

    # Tight structural check against a bf16-matched emulation of the folded math.
    emu = jax.block_until_ready(emu_forward(x, kparams))
    err_emu = float(jnp.max(jnp.abs(out - emu)))
    assert err_emu < 1e-3, f"kernel vs bf16-matched emulation mismatch: {err_emu}"

    # Semantic check against the exact f32 PyTorch-module reference
    # (bf16 MXU operands trade ~1e-2-level absolute error for throughput).
    ref = jax.block_until_ready(
        ref_forward(x, w1_oihw, bn1, w2_oihw, bn2, w3_oihw, cb3, bn3))
    err_ref = float(jnp.max(jnp.abs(out - ref)))
    assert err_ref < 1e-1, f"kernel vs f32 module reference mismatch: {err_ref}"

    print("KERNEL_OK")
</pallas_src>

<mosaic_0001>
module attributes {stable_mosaic.version = 11 : i64} {
  func.func @bottleneck_kernel(%arg0: i32, %arg1: memref<1x16x16x128xf32, #tpu.memory_space<vmem>>, %arg2: memref<128x128xbf16, #tpu.memory_space<vmem>>, %arg3: memref<1x128xf32, #tpu.memory_space<vmem>>, %arg4: memref<3x384x128xbf16, #tpu.memory_space<vmem>>, %arg5: memref<1x128xf32, #tpu.memory_space<vmem>>, %arg6: memref<128x128xbf16, #tpu.memory_space<vmem>>, %arg7: memref<1x128xf32, #tpu.memory_space<vmem>>, %arg8: memref<1x16x16x128xf32, #tpu.memory_space<vmem>>, %arg9: memref<1x18x16x384xbf16, #tpu.memory_space<vmem>>) attributes {dimension_semantics = [#tpu.dimension_semantics<parallel>], iteration_bounds = array<i64: 2>, scalar_prefetch = 0 : i64, scratch_operands = 1 : i64, tpu.core_type = #tpu.core_type<tc>, window_params = [{transform_indices = @transform_0, window_bounds = array<i64: 1, 16, 16, 128>}, {pipeline_mode = #tpu.pipeline_mode<synchronous>, transform_indices = @transform_1, window_bounds = array<i64: 128, 128>}, {pipeline_mode = #tpu.pipeline_mode<synchronous>, transform_indices = @transform_2, window_bounds = array<i64: 1, 128>}, {pipeline_mode = #tpu.pipeline_mode<synchronous>, transform_indices = @transform_3, window_bounds = array<i64: 3, 384, 128>}, {pipeline_mode = #tpu.pipeline_mode<synchronous>, transform_indices = @transform_4, window_bounds = array<i64: 1, 128>}, {pipeline_mode = #tpu.pipeline_mode<synchronous>, transform_indices = @transform_5, window_bounds = array<i64: 128, 128>}, {pipeline_mode = #tpu.pipeline_mode<synchronous>, transform_indices = @transform_6, window_bounds = array<i64: 1, 128>}, {transform_indices = @transform_7, window_bounds = array<i64: 1, 16, 16, 128>}]} {
    %c0 = arith.constant 0 : index
    %c0_0 = arith.constant 0 : index
    %c0_1 = arith.constant 0 : index
    %c0_2 = arith.constant 0 : index
    %0 = vector.load %arg1[%c0, %c0_0, %c0_1, %c0_2] : memref<1x16x16x128xf32, #tpu.memory_space<vmem>>, vector<1x16x16x128xf32>
    %1 = vector.shape_cast %0 : vector<1x16x16x128xf32> to vector<256x128xf32>
    %2 = arith.truncf %1 : vector<256x128xf32> to vector<256x128xbf16>
    %c0_3 = arith.constant 0 : index
    %c0_4 = arith.constant 0 : index
    %3 = vector.load %arg2[%c0_3, %c0_4] : memref<128x128xbf16, #tpu.memory_space<vmem>>, vector<128x128xbf16>
    %cst = arith.constant dense<0.000000e+00> : vector<256x128xf32>
    %4 = tpu.matmul %2, %3, %cst {dimension_numbers = #tpu.dot_dimension_numbers<[1], [0], [0], [1], [0, 0, 1, 1], [], []>} : vector<256x128xbf16>, vector<128x128xbf16>, vector<256x128xf32> -> vector<256x128xf32>
    %c0_5 = arith.constant 0 : index
    %c0_6 = arith.constant 0 : index
    %5 = vector.load %arg3[%c0_5, %c0_6] : memref<1x128xf32, #tpu.memory_space<vmem>>, vector<1x128xf32>
    %6 = vector.broadcast %5 : vector<1x128xf32> to vector<256x128xf32>
    %7 = arith.addf %4, %6 : vector<256x128xf32>
    %cst_7 = arith.constant 0.000000e+00 : f32
    %8 = vector.broadcast %cst_7 : f32 to vector<256x128xf32>
    %9 = arith.maximumf %7, %8 : vector<256x128xf32>
    %10 = arith.truncf %9 : vector<256x128xf32> to vector<256x128xbf16>
    %11 = vector.shape_cast %10 : vector<256x128xbf16> to vector<1x16x16x128xbf16>
    %cst_8 = arith.constant 0.000000e+00 : bf16
    %12 = vector.broadcast %cst_8 : bf16 to vector<1x16x1x128xbf16>
    %13 = vector.extract_strided_slice %11 {offsets = [0, 0, 0, 0], sizes = [1, 16, 15, 128], strides = [1, 1, 1, 1]} : vector<1x16x16x128xbf16> to vector<1x16x15x128xbf16>
    %14 = tpu.concatenate %12, %13 in 2 : vector<1x16x1x128xbf16>, vector<1x16x15x128xbf16> -> vector<1x16x16x128xbf16>
    %15 = vector.extract_strided_slice %11 {offsets = [0, 0, 1, 0], sizes = [1, 16, 15, 128], strides = [1, 1, 1, 1]} : vector<1x16x16x128xbf16> to vector<1x16x15x128xbf16>
    %16 = tpu.concatenate %15, %12 in 2 : vector<1x16x15x128xbf16>, vector<1x16x1x128xbf16> -> vector<1x16x16x128xbf16>
    %cst_9 = arith.constant 0.000000e+00 : bf16
    %17 = vector.broadcast %cst_9 : bf16 to vector<1x1x16x384xbf16>
    %c0_10 = arith.constant 0 : index
    %c0_11 = arith.constant 0 : index
    %c0_12 = arith.constant 0 : index
    %c0_13 = arith.constant 0 : index
    %18 = vector.load %arg9[%c0_10, %c0_11, %c0_12, %c0_13] : memref<1x18x16x384xbf16, #tpu.memory_space<vmem>>, vector<1x1x16x384xbf16>
    tpu.vector_store %arg9[%c0_10, %c0_11, %c0_12, %c0_13], %17 {strides = array<i32>} : memref<1x18x16x384xbf16, #tpu.memory_space<vmem>>, vector<1x1x16x384xbf16>,
    %c0_14 = arith.constant 0 : index
    %c17 = arith.constant 17 : index
    %c0_15 = arith.constant 0 : index
    %c0_16 = arith.constant 0 : index
    %19 = vector.load %arg9[%c0_14, %c17, %c0_15, %c0_16] : memref<1x18x16x384xbf16, #tpu.memory_space<vmem>>, vector<1x1x16x384xbf16>
    tpu.vector_store %arg9[%c0_14, %c17, %c0_15, %c0_16], %17 {strides = array<i32>} : memref<1x18x16x384xbf16, #tpu.memory_space<vmem>>, vector<1x1x16x384xbf16>,
    %c0_17 = arith.constant 0 : index
    %c1 = arith.constant 1 : index
    %c0_18 = arith.constant 0 : index
    %c0_19 = arith.constant 0 : index
    %20 = vector.load %arg9[%c0_17, %c1, %c0_18, %c0_19] : memref<1x18x16x384xbf16, #tpu.memory_space<vmem>>, vector<1x16x16x128xbf16>
    tpu.vector_store %arg9[%c0_17, %c1, %c0_18, %c0_19], %14 {strides = array<i32>} : memref<1x18x16x384xbf16, #tpu.memory_space<vmem>>, vector<1x16x16x128xbf16>,
    %c0_20 = arith.constant 0 : index
    %c1_21 = arith.constant 1 : index
    %c0_22 = arith.constant 0 : index
    %c128 = arith.constant 128 : index
    %21 = vector.load %arg9[%c0_20, %c1_21, %c0_22, %c128] : memref<1x18x16x384xbf16, #tpu.memory_space<vmem>>, vector<1x16x16x128xbf16>
    tpu.vector_store %arg9[%c0_20, %c1_21, %c0_22, %c128], %11 {strides = array<i32>} : memref<1x18x16x384xbf16, #tpu.memory_space<vmem>>, vector<1x16x16x128xbf16>,
    %c0_23 = arith.constant 0 : index
    %c1_24 = arith.constant 1 : index
    %c0_25 = arith.constant 0 : index
    %c256 = arith.constant 256 : index
    %22 = vector.load %arg9[%c0_23, %c1_24, %c0_25, %c256] : memref<1x18x16x384xbf16, #tpu.memory_space<vmem>>, vector<1x16x16x128xbf16>
    tpu.vector_store %arg9[%c0_23, %c1_24, %c0_25, %c256], %16 {strides = array<i32>} : memref<1x18x16x384xbf16, #tpu.memory_space<vmem>>, vector<1x16x16x128xbf16>,
    %c0_26 = arith.constant 0 : index
    %c0_27 = arith.constant 0 : index
    %c0_28 = arith.constant 0 : index
    %c0_29 = arith.constant 0 : index
    %23 = vector.load %arg9[%c0_26, %c0_27, %c0_28, %c0_29] : memref<1x18x16x384xbf16, #tpu.memory_space<vmem>>, vector<1x16x16x384xbf16>
    %24 = vector.shape_cast %23 : vector<1x16x16x384xbf16> to vector<256x384xbf16>
    %c0_30 = arith.constant 0 : index
    %c0_31 = arith.constant 0 : index
    %c0_32 = arith.constant 0 : index
    %25 = vector.load %arg4[%c0_30, %c0_31, %c0_32] : memref<3x384x128xbf16, #tpu.memory_space<vmem>>, vector<1x384x128xbf16>
    %26 = vector.shape_cast %25 : vector<1x384x128xbf16> to vector<384x128xbf16>
    %cst_33 = arith.constant dense<0.000000e+00> : vector<256x128xf32>
    %27 = tpu.matmul %24, %26, %cst_33 {dimension_numbers = #tpu.dot_dimension_numbers<[1], [0], [0], [1], [0, 0, 1, 1], [], []>} : vector<256x384xbf16>, vector<384x128xbf16>, vector<256x128xf32> -> vector<256x128xf32>
    %c0_34 = arith.constant 0 : index
    %c1_35 = arith.constant 1 : index
    %c0_36 = arith.constant 0 : index
    %c0_37 = arith.constant 0 : index
    %28 = vector.load %arg9[%c0_34, %c1_35, %c0_36, %c0_37] : memref<1x18x16x384xbf16, #tpu.memory_space<vmem>>, vector<1x16x16x384xbf16>
    %29 = vector.shape_cast %28 : vector<1x16x16x384xbf16> to vector<256x384xbf16>
    %c1_38 = arith.constant 1 : index
    %c0_39 = arith.constant 0 : index
    %c0_40 = arith.constant 0 : index
    %30 = vector.load %arg4[%c1_38, %c0_39, %c0_40] : memref<3x384x128xbf16, #tpu.memory_space<vmem>>, vector<1x384x128xbf16>
    %31 = vector.shape_cast %30 : vector<1x384x128xbf16> to vector<384x128xbf16>
    %cst_41 = arith.constant dense<0.000000e+00> : vector<256x128xf32>
    %32 = tpu.matmul %29, %31, %cst_41 {dimension_numbers = #tpu.dot_dimension_numbers<[1], [0], [0], [1], [0, 0, 1, 1], [], []>} : vector<256x384xbf16>, vector<384x128xbf16>, vector<256x128xf32> -> vector<256x128xf32>
    %33 = arith.addf %27, %32 : vector<256x128xf32>
    %c0_42 = arith.constant 0 : index
    %c2 = arith.constant 2 : index
    %c0_43 = arith.constant 0 : index
    %c0_44 = arith.constant 0 : index
    %34 = vector.load %arg9[%c0_42, %c2, %c0_43, %c0_44] : memref<1x18x16x384xbf16, #tpu.memory_space<vmem>>, vector<1x16x16x384xbf16>
    %35 = vector.shape_cast %34 : vector<1x16x16x384xbf16> to vector<256x384xbf16>
    %c2_45 = arith.constant 2 : index
    %c0_46 = arith.constant 0 : index
    %c0_47 = arith.constant 0 : index
    %36 = vector.load %arg4[%c2_45, %c0_46, %c0_47] : memref<3x384x128xbf16, #tpu.memory_space<vmem>>, vector<1x384x128xbf16>
    %37 = vector.shape_cast %36 : vector<1x384x128xbf16> to vector<384x128xbf16>
    %cst_48 = arith.constant dense<0.000000e+00> : vector<256x128xf32>
    %38 = tpu.matmul %35, %37, %cst_48 {dimension_numbers = #tpu.dot_dimension_numbers<[1], [0], [0], [1], [0, 0, 1, 1], [], []>} : vector<256x384xbf16>, vector<384x128xbf16>, vector<256x128xf32> -> vector<256x128xf32>
    %39 = arith.addf %33, %38 : vector<256x128xf32>
    %c0_49 = arith.constant 0 : index
    %c0_50 = arith.constant 0 : index
    %40 = vector.load %arg5[%c0_49, %c0_50] : memref<1x128xf32, #tpu.memory_space<vmem>>, vector<1x128xf32>
    %41 = vector.broadcast %40 : vector<1x128xf32> to vector<256x128xf32>
    %42 = arith.addf %39, %41 : vector<256x128xf32>
    %cst_51 = arith.constant 0.000000e+00 : f32
    %43 = vector.broadcast %cst_51 : f32 to vector<256x128xf32>
    %44 = arith.maximumf %42, %43 : vector<256x128xf32>
    %45 = arith.truncf %44 : vector<256x128xf32> to vector<256x128xbf16>
    %c0_52 = arith.constant 0 : index
    %c0_53 = arith.constant 0 : index
    %46 = vector.load %arg6[%c0_52, %c0_53] : memref<128x128xbf16, #tpu.memory_space<vmem>>, vector<128x128xbf16>
    %cst_54 = arith.constant dense<0.000000e+00> : vector<256x128xf32>
    %47 = tpu.matmul %45, %46, %cst_54 {dimension_numbers = #tpu.dot_dimension_numbers<[1], [0], [0], [1], [0, 0, 1, 1], [], []>} : vector<256x128xbf16>, vector<128x128xbf16>, vector<256x128xf32> -> vector<256x128xf32>
    %c0_55 = arith.constant 0 : index
    %c0_56 = arith.constant 0 : index
    %48 = vector.load %arg7[%c0_55, %c0_56] : memref<1x128xf32, #tpu.memory_space<vmem>>, vector<1x128xf32>
    %49 = vector.broadcast %48 : vector<1x128xf32> to vector<256x128xf32>
    %50 = arith.addf %47, %49 : vector<256x128xf32>
    %51 = vector.shape_cast %50 : vector<256x128xf32> to vector<1x16x16x128xf32>
    %c0_57 = arith.constant 0 : index
    %c0_58 = arith.constant 0 : index
    %c0_59 = arith.constant 0 : index
    %c0_60 = arith.constant 0 : index
    %52 = vector.load %arg1[%c0_57, %c0_58, %c0_59, %c0_60] : memref<1x16x16x128xf32, #tpu.memory_space<vmem>>, vector<1x16x16x128xf32>
    %53 = arith.addf %51, %52 : vector<1x16x16x128xf32>
    %cst_61 = arith.constant 0.000000e+00 : f32
    %54 = vector.broadcast %cst_61 : f32 to vector<1x16x16x128xf32>
    %55 = arith.maximumf %53, %54 : vector<1x16x16x128xf32>
    %c0_62 = arith.constant 0 : index
    %c0_63 = arith.constant 0 : index
    %c0_64 = arith.constant 0 : index
    %c0_65 = arith.constant 0 : index
    %56 = vector.load %arg8[%c0_62, %c0_63, %c0_64, %c0_65] : memref<1x16x16x128xf32, #tpu.memory_space<vmem>>, vector<1x16x16x128xf32>
    tpu.vector_store %arg8[%c0_62, %c0_63, %c0_64, %c0_65], %55 {strides = array<i32>} : memref<1x16x16x128xf32, #tpu.memory_space<vmem>>, vector<1x16x16x128xf32>,
    return
  }
  func.func @transform_0(%arg0: i32) -> (i32, i32, i32, i32) {
    %c0_i32 = arith.constant 0 : i32
    %c0_i32_0 = arith.constant 0 : i32
    %c0_i32_1 = arith.constant 0 : i32
    %c0_i32_2 = arith.constant 0 : i32
    return %arg0, %c0_i32, %c0_i32_0, %c0_i32_1 : i32, i32, i32, i32
  }
  func.func @transform_1(%arg0: i32) -> (i32, i32) {
    %c0_i32 = arith.constant 0 : i32
    %c0_i32_0 = arith.constant 0 : i32
    %c0_i32_1 = arith.constant 0 : i32
    return %c0_i32, %c0_i32_0 : i32, i32
  }
  func.func @transform_2(%arg0: i32) -> (i32, i32) {
    %c0_i32 = arith.constant 0 : i32
    %c0_i32_0 = arith.constant 0 : i32
    %c0_i32_1 = arith.constant 0 : i32
    return %c0_i32, %c0_i32_0 : i32, i32
  }
  func.func @transform_3(%arg0: i32) -> (i32, i32, i32) {
    %c0_i32 = arith.constant 0 : i32
    %c0_i32_0 = arith.constant 0 : i32
    %c0_i32_1 = arith.constant 0 : i32
    %c0_i32_2 = arith.constant 0 : i32
    return %c0_i32, %c0_i32_0, %c0_i32_1 : i32, i32, i32
  }
  func.func @transform_4(%arg0: i32) -> (i32, i32) {
    %c0_i32 = arith.constant 0 : i32
    %c0_i32_0 = arith.constant 0 : i32
    %c0_i32_1 = arith.constant 0 : i32
    return %c0_i32, %c0_i32_0 : i32, i32
  }
  func.func @transform_5(%arg0: i32) -> (i32, i32) {
    %c0_i32 = arith.constant 0 : i32
    %c0_i32_0 = arith.constant 0 : i32
    %c0_i32_1 = arith.constant 0 : i32
    return %c0_i32, %c0_i32_0 : i32, i32
  }
  func.func @transform_6(%arg0: i32) -> (i32, i32) {
    %c0_i32 = arith.constant 0 : i32
    %c0_i32_0 = arith.constant 0 : i32
    %c0_i32_1 = arith.constant 0 : i32
    return %c0_i32, %c0_i32_0 : i32, i32
  }
  func.func @transform_7(%arg0: i32) -> (i32, i32, i32, i32) {
    %c0_i32 = arith.constant 0 : i32
    %c0_i32_0 = arith.constant 0 : i32
    %c0_i32_1 = arith.constant 0 : i32
    %c0_i32_2 = arith.constant 0 : i32
    return %arg0, %c0_i32, %c0_i32_0, %c0_i32_1 : i32, i32, i32, i32
  }
}

</mosaic_0001>

<bundles_post_ra>
// kernel: tpu_custom_call.1
= control target key start
LH: loop header
LB: loop body
LE: loop exit
PB: predicated region body
PF: predicated region fallthrough
CT: control target
= control target key end

     0   :  { %s7038_s0 = inlined_call_operand.hbm [shape: f32[2,16,16,128], index: 0, kind: input, shape index: {}]   ;;  %s7039_s1 = inlined_call_operand.hbm [shape: bf16[128,128], index: 1, kind: input, shape index: {}]   ;;  %s7040_s2 = inlined_call_operand.vmem [shape: f32[1,128], index: 2, kind: input, shape index: {}]   ;;  %s7041_s3 = inlined_call_operand.hbm [shape: bf16[3,384,128], index: 3, kind: input, shape index: {}]   ;;  %s7042_s4 = inlined_call_operand.vmem [shape: f32[1,128], index: 4, kind: input, shape index: {}]   ;;  %s7043_s5 = inlined_call_operand.hbm [shape: bf16[128,128], index: 5, kind: input, shape index: {}]   ;;  %s7044_s6 = inlined_call_operand.vmem [shape: f32[1,128], index: 6, kind: input, shape index: {}]   ;;  %s7045_s7 = inlined_call_operand.hbm [shape: f32[2,16,16,128], index: 7, kind: output, shape index: {}]  }
   0x1   :  { %7050 = sst [smem:[#allocation16_spill]] %s7039_s1 }
   0x2   :  { %12 = vsyncpa [#allocation4], 0 }
   0x3   :  { %14 = vsyncpa [#allocation4 + $0x1], 0 }
   0x4   :  { %15 = vsyncpa [#allocation7], 0 }
   0x5   :  { %16 = vsyncpa [#allocation10], 0 }
   0x6   :  { %17 = vsyncpa [#allocation5], 0 }
   0x7   :  { %19 = vsyncpa [#allocation5 + $0x1], 0  ;;  %s6071_s24 = smov 0   ;;  %s6073_s25 = smov 0  }
   0x8   :  { %s6075_s26 = smov 0   ;;  %s6077_s27 = smov 0  }
   0x9 LB: > { %s6092_s28 = sadd.s32 4294967295, %s6017_s27   ;;  %s4426_s29 = sadd.s32 4294967294, %s6017_s27   ;;  %s6017_s27 = sphi %s6077_s27, %s7075_s27   ;;  %s6013_s26 = sphi %s6075_s26, %s7074_s26   ;;  %s6009_s25 = sphi %s6073_s25, %s7073_s25   ;;  %s6005_s24 = sphi %s6071_s24, %s7072_s24  }
   0xa   : > { %p45_p0 = scmp.ne.s32.totalorder %s6009_s25, %s6005_s24  ;;  %p7046_p1 = scmp.eq.s32.totalorder %s6092_s28, 0 }
   0xb   : > { %p201_p3 = scmp.eq.s32.totalorder %s4426_s29, 1  ;;  %p4427_p5 = scmp.ge.s32.totalorder %s6017_s27, 1 }
   0xc   : > { %p6101_p4 = por %p7046_p1, %p45_p0  ;;  %p208_p7 = scmp.lt.s32.totalorder %s6017_s27, 3 }
   0xd   : > { %p6106_p6 = por %p201_p3, %p45_p0  ;;  %s6019_s10 = smov [#allocation6]  }
   0xe   : > { %s7051_s30 = scalar_select %p6101_p4, 1, 0 }
   0xf   : > { %s7052_s8 = scalar_select %p6106_p6, 1, 0 }
  0x10   : > { %p6111_p8 = pnand %p4427_p5, %p208_p7  ;;  %s220_s11 = sshll.u32 %s6019_s10, 4  ;;  %s221_s11 = int_to_ptr.vmem [resolvable:$true] %s220_s11 }
  0x11   : > { %s6020_s13 = smov [#allocation8]   ;;  %s6021_s15 = smov [#allocation9]  }
  0x12   : > { %s7053_s9 = scalar_select %p6111_p8, 1, 0 }
  0x13   : > { %p5539_p9 = pneg %p6111_p8  ;;  %s236_s14 = sshll.u32 %s6020_s13, 4  ;;  %s237_s14 = int_to_ptr.vmem [resolvable:$true] %s236_s14 }
  0x14   : > { %s252_s16 = sshll.u32 %s6021_s15, 4  ;;  %s5850_s17 = scalar_lea.vmem %s221_s11, 1024  ;;  %s253_s16 = int_to_ptr.vmem [resolvable:$true] %s252_s16 }
  0x15   : > { %p6120_p11 = pnand %p5539_p9, %p7046_p1  ;;  %p5851_p13 = scmp.ne.s32.totalorder %s221_s11, %s5850_s17 }
  0x16   : > { %p5858_p5 = scmp.lt.s32.totalorder %s221_s11, %s221_s11  ;;  %p5859_p7 = scmp.lt.s32.totalorder %s5850_s17, %s5850_s17 }
  0x17   : > { %p5841_p12 = pneg %p6120_p11 }
  0x18   : > { %p5860_p9 = por %p5859_p7, %p5858_p5 }
  0x19   : > { %p5853_p0 = pnand %p5851_p13, %p5841_p12 }
  0x1b   : > { %p5854_p3 = pneg %p5853_p0 }
  0x1d   : > { %p5861_p10 = pnand %p5860_p9, %p5854_p3 }
  0x1f   : > { %5864 = shalt.err (!%p5861_p10)
}
  0x20   : > { %s6022_s18 = smov 64   ;;  %s6023_s19 = smov 4  }
  0x21   : > { %s7055_s1 = sld [smem:[#allocation16_spill]]  ;;  %s5876_s22 = scalar_lea.vmem %s237_s14, 9216 }
  0x22   : > { %p5877_p1 = scmp.ne.s32.totalorder %s237_s14, %s5876_s22  ;;  %p5884_p2 = scmp.lt.s32.totalorder %s237_s14, %s237_s14 }
  0x23   : > { %p5885_p6 = scmp.lt.s32.totalorder %s5876_s22, %s5876_s22 }
  0x24   : > { %p5879_p13 = pnand %p5877_p1, %p5841_p12 }
  0x25   : > { %p5886_p5 = por %p5885_p6, %p5884_p2 }
  0x26   : > { %p5880_p0 = pneg %p5879_p13 }
  0x27   : > { %5542 = dma.hbm_to_vmem [thread:$0]  (!%p6120_p11), %s7055_s1, 1024, %s221_s11, [#allocation7], %s6022_s18, %s6022_s18, %s6023_s19  }
  0x28   : > { %p5887_p3 = pnand %p5886_p5, %p5880_p0 }
  0x2a   : > { %5890 = shalt.err (!%p5887_p3)
}
  0x2b   : > { %5545 = dma.hbm_to_vmem [thread:$0]  (!%p6120_p11), %s7041_s3, 9216, %s237_s14, [#allocation7], %s6022_s18, %s6022_s18, %s6023_s19  }
  0x2c   : > { %s5902_s10 = scalar_lea.vmem %s253_s16, 1024  ;;  %p5910_p9 = scmp.lt.s32.totalorder %s253_s16, %s253_s16 }
  0x2d   : > { %p5903_p10 = scmp.ne.s32.totalorder %s253_s16, %s5902_s10  ;;  %p5911_p13 = scmp.lt.s32.totalorder %s5902_s10, %s5902_s10 }
  0x2f   : > { %p5905_p7 = pnand %p5903_p10, %p5841_p12  ;;  %p5912_p4 = por %p5911_p13, %p5910_p9 }
  0x31   : > { %p5906_p1 = pneg %p5905_p7 }
  0x33   : > { %p5913_p2 = pnand %p5912_p4, %p5906_p1 }
  0x35   : > { %5916 = shalt.err (!%p5913_p2)
}
  0x36   : > { %5548 = dma.hbm_to_vmem [thread:$0]  (!%p6120_p11), %s7043_s5, 1024, %s253_s16, [#allocation10], %s6022_s18, %s6022_s18, %s6023_s19  }
  0x37   : > { %s6151_s14 = sadd.s32 1, %s6017_s27   ;;  %s32_s12 = sadd.s32 1, %s6013_s26 }
  0x38   : > { %s29_s15 = ssub.s32 %s6017_s27, %s6151_s14  ;;  %p39_p6 = scmp.ne.s32.totalorder %s6013_s26, %s6009_s25 }
  0x39   : > { %p30_p4 = scmp.eq.s32.totalorder %s29_s15, 0  ;;  %p40_p12 = scmp.eq.s32.totalorder %s6017_s27, 0 }
  0x3a   : > { %p5560_p0 = scmp.lt.s32.totalorder %s6017_s27, 2  ;;  %p7056_p3 = scmp.eq.s32.totalorder %s6092_s28, 1 }
  0x3b   : > { %s6161_s17 = scalar_select %p30_p4, %s6013_s26, %s32_s12  }
  0x3c   : > { %p41_p5 = por %p40_p12, %p39_p6  ;;  %p6165_p10 = por %p7056_p3, %p39_p6 }
  0x3d   : > { %s269_s21 = sand.u32 1, %s6013_s26   ;;  %s4777_s22 = sshll.u32 %s6017_s27, 12 }
  0x3e   : > { %s7057_s20 = scalar_select %p6165_p10, 1, 0 }
  0x3f   : > { %s4432_s16 = sshll.u32 %s269_s21, 8  ;;  %s6174_s23 = scalar_lea.hbm %s7038_s0, %s4777_s22 }
  0x40   : > { %s273_s29 = scalar_lea.vmem [#allocation3], %s4432_s16  ;;  %p6176_p11 = pnand %p5560_p0, %p41_p5 }
  0x41   : > { %s280_s10 = sshll.u32 %s273_s29, 4  ;;  %s6182_s13 = scalar_lea.sflag [#allocation4], %s269_s21  ;;  %s6180_s10 = int_to_ptr.vmem [resolvable:$true] %s280_s10 }
  0x42   : > { %s5917_s15 = scalar_lea.hbm %s6174_s23, 4096  ;;  %p5919_p1 = pneg %p6176_p11 }
  0x43   : > { %p5918_p7 = scmp.ne.s32.totalorder %s6174_s23, %s5917_s15  ;;  %s5922_s16 = scalar_lea.hbm %s7038_s0, 8192 }
  0x44   : > { %p5923_p2 = scmp.lt.s32.totalorder %s6174_s23, %s7038_s0  ;;  %p5924_p4 = scmp.lt.s32.totalorder %s5922_s16, %s5917_s15 }
  0x45   : > { %p5920_p9 = pnand %p5919_p1, %p5918_p7 }
  0x46   : > { %p5925_p6 = por %p5924_p4, %p5923_p2 }
  0x47   : > { %p5921_p13 = pneg %p5920_p9 }
  0x49   : > { %p5926_p12 = pnand %p5925_p6, %p5921_p13 }
  0x4b   : > { %5929 = shalt.err (!%p5926_p12)
}
  0x4c   : > { %s5930_s21 = scalar_lea.vmem %s6180_s10, 4096  ;;  %s6024_s29 = smov [#allocation3]  }
  0x4d   : > { %p5931_p0 = scmp.ne.s32.totalorder %s6180_s10, %s5930_s21  ;;  %s5935_s1 = sshll.u32 %s6024_s29, 4  ;;  %s5936_s1 = int_to_ptr.vmem [resolvable:$false] %s5935_s1 }
  0x4e   : > { %s5937_s12 = scalar_lea.vmem %s5936_s1, 8192  ;;  %p5938_p7 = scmp.lt.s32.totalorder %s6180_s10, %s5936_s1 }
  0x4f   : > { %p5933_p5 = pnand %p5931_p0, %p5919_p1  ;;  %p5939_p9 = scmp.lt.s32.totalorder %s5937_s12, %s5930_s21 }
  0x51   : > { %p5934_p3 = pneg %p5933_p5  ;;  %p5940_p10 = por %p5939_p9, %p5938_p7 }
  0x53   : > { %p5941_p8 = pnand %p5940_p10, %p5934_p3 }
  0x55   : > { %5944 = shalt.err (!%p5941_p8)
}
  0x56   : > { %s6025_s15 = smov 128   ;;  %s6026_s22 = smov 8  }
  0x57   : > { %5552 = dma.hbm_to_vmem [thread:$0]  (!%p6176_p11), %s6174_s23, 4096, %s6180_s10, %s6182_s13, %s6025_s15, %s6025_s15, %s6026_s22  }
  0x58   : > { %p7059_p1 = scmp.ne.s32.totalorder %s7053_s9, 0 }
  0x59   : > { %s6206_s16 = sand.u32 (!%p7059_p1), 1, %s6009_s25   ;;  %p7060_p8 = scmp.ne.s32.totalorder (!%p7059_p1), %s7051_s30, 0 }
  0x5a   : > { %292 = sbr.rel (%p7059_p1) target bundleno = 1104 (0x450), region = 48  ;;  %s4436_s1 = sshll.u32 (!%p7059_p1), %s6206_s16, 8 }
  0x5b   : > { %s295_s18 = scalar_lea.sflag (!%p7059_p1), [#allocation4], %s6206_s16  ;;  %s6212_s19 = scalar_lea.vmem (!%p7059_p1), [#allocation3], %s4436_s1 }
  0x5f   : > { %5988 = dma.done.wait (%p7060_p8), %s295_s18, 4096  }
  0x60   : > { %5990 = vsyncadd (%p7060_p8), %s295_s18, 4294963200  ;;  %p7061_p10 = scmp.eq.s32.totalorder %s6092_s28, 0 }
  0x62   : > { %5992 = dma.done.wait (%p7061_p10), [#allocation7], 10240   ;;  %p7062_p11 = pmov %p7061_p10 }
  0x63   : > { %p7063_p13 = pmov %p7061_p10 }
  0x64   : > { %5994 = vsyncadd (%p7062_p11), [#allocation7], 4294957056 }
  0x65   : > { %5996 = dma.done.wait (%p7063_p13), [#allocation10], 1024   ;;  %p7064_p2 = pmov %p7061_p10 }
  0x66   : > { %v5607_v0 = vld [vmem:[#allocation6 + $0x38] sm:$0xff]   ;;  %v5608_v1 = vld [vmem:[#allocation6 + $0x30] sm:$0xff]   ;;  %v5609_v2 = vld [vmem:[#allocation6 + $0x28] sm:$0xff]   ;;  %vm798_vm0 = vcmask 1040384   ;;  %vm799_vm1 = vsmask.f32 256 }
  0x67   : > { %5998 = vsyncadd (%p7064_p2), [#allocation10], 4294966272  ;;  %5267 = vmatprep.subr.bf16.mxu0 %v5607_v0  ;;  %5507 = vmatprep.subr.bf16.mxu1 %v5607_v0  ;;  %v5610_v3 = vld [vmem:[#allocation6 + $0x20] sm:$0xff]   ;;  %v343_v5 = vld [vmem:[%s6212_s19 + $0x8] sm:$0xff]  ;;  %vm865_vm2 = vcmask 1047552   ;;  %s6897_s12 = scalar_lea.vmem [#allocation11], %s4436_s1 }
  0x68   : > { %5268 = vmatpush3.bf16.msra.mxu0 %v5607_v0  ;;  %5515 = vmatpush3.bf16.msra.mxu1 %v5607_v0  ;;  %v342_v4 = vld [vmem:[%s6212_s19] sm:$0xff]  ;;  %v5611_v7 = vld [vmem:[#allocation6 + $0x18] sm:$0xff]   ;;  %v359_v9 = vld [vmem:[%s6212_s19 + $0x88] sm:$0xff]  ;;  %vm866_vm3 = vsmask.f32 7424  ;;  %s4810_s15 = sshll.u32 %s6092_s28, 12 }
  0x69   : > { %5269 = vmatprep.subr.bf16.mxu0 %v5608_v1  ;;  %5508 = vmatprep.subr.bf16.mxu1 %v5608_v1  ;;  %v374_v6 = vpack.c.bf16 %v343_v5, %v342_v4  ;;  %v358_v8 = vld [vmem:[%s6212_s19 + $0x80] sm:$0xff]  ;;  %v5612_v11 = vld [vmem:[#allocation6 + $0x10] sm:$0xff]   ;;  %v5613_v12 = vld [vmem:[#allocation6 + $0x8] sm:$0xff]   ;;  %s4324_s22 = sshll.u32 %s6897_s12, 4  ;;  %s6991_s30 = scalar_lea.hbm %s7045_s7, %s4810_s15  ;;  %s6993_s22 = int_to_ptr.vmem [resolvable:$true] %s4324_s22 }
  0x6a   : > { %v382_v10 = vpack.c.bf16 %v359_v9, %v358_v8  ;;  %v5614_v13 = vld [vmem:[#allocation6] sm:$0xff]   ;;  %v344_v14 = vld [vmem:[%s6212_s19 + $0x10] sm:$0xff]  ;;  %v345_v15 = vld [vmem:[%s6212_s19 + $0x18] sm:$0xff]  ;;  %s5945_s9 = scalar_lea.vmem %s6993_s22, 4096  ;;  %p7069_p6 = scmp.ne.s32.totalorder %s7057_s20, 0 }
  0x6b   : > { %5283 = vmatprep.mubr.bf16.mxu0 %v374_v6  ;;  %v346_v16 = vld [vmem:[%s6212_s19 + $0x20] sm:$0xff]  ;;  %v347_v17 = vld [vmem:[%s6212_s19 + $0x28] sm:$0xff]  ;;  %v360_v18 = vld [vmem:[%s6212_s19 + $0x90] sm:$0xff]  ;;  %v375_v22 = vpack.c.bf16 %v345_v15, %v344_v14  ;;  %p5946_p4 = scmp.ne.s32.totalorder %s6993_s22, %s5945_s9  ;;  %s6028_s28 = smov [#allocation11]  }
  0x6c   : > { %5270 = vmatpush3.bf16.msra.mxu0 %v5608_v1  ;;  %5516 = vmatpush3.bf16.msra.mxu1 %v5608_v1  ;;  %v361_v19 = vld [vmem:[%s6212_s19 + $0x98] sm:$0xff]  ;;  %v362_v20 = vld [vmem:[%s6212_s19 + $0xa0] sm:$0xff]  ;;  %v363_v21 = vld [vmem:[%s6212_s19 + $0xa8] sm:$0xff]  ;;  %v376_v23 = vpack.c.bf16 %v347_v17, %v346_v16  ;;  %s5949_s23 = sshll.u32 %s6028_s28, 4  ;;  %s5950_s23 = int_to_ptr.vmem [resolvable:$false] %s5949_s23 }
  0x6d   : > { %5271 = vmatprep.subr.bf16.mxu0 %v5609_v2  ;;  %5509 = vmatprep.subr.bf16.mxu1 %v5609_v2  ;;  %v383_v24 = vpack.c.bf16 %v361_v19, %v360_v18  ;;  %v384_v25 = vpack.c.bf16 %v363_v21, %v362_v20  ;;  %v348_v26 = vld [vmem:[%s6212_s19 + $0x30] sm:$0xff]  ;;  %v349_v27 = vld [vmem:[%s6212_s19 + $0x38] sm:$0xff]  ;;  %v350_v28 = vld [vmem:[%s6212_s19 + $0x40] sm:$0xff]  ;;  %v6027_v18 = vmov 0   ;;  %p5947_p12 = pnand %p5946_p4, %p7069_p6  ;;  %s5951_s10 = scalar_lea.vmem %s5950_s23, 8192 }
  0x6e   : > { %5299 = vmatprep.mubr.bf16.mxu1 %v382_v10  ;;  %v351_v29 = vld [vmem:[%s6212_s19 + $0x48] sm:$0xff]  ;;  %v364_v30 = vld [vmem:[%s6212_s19 + $0xb0] sm:$0xff]  ;;  %v365_v31 = vld [vmem:[%s6212_s19 + $0xb8] sm:$0xff]  ;;  %v377_v34 = vpack.c.bf16 %v349_v27, %v348_v26  ;;  %884 = vst [vmem:[#allocation2] sm:$0xff] %v6027_v18  ;;  %p5952_p5 = scmp.lt.s32.totalorder %s6993_s22, %s5950_s23  ;;  %p5953_p3 = scmp.lt.s32.totalorder %s5951_s10, %s5945_s9 }
  0x6f   : > { %v366_v32 = vld [vmem:[%s6212_s19 + $0xc0] sm:$0xff]  ;;  %v367_v33 = vld [vmem:[%s6212_s19 + $0xc8] sm:$0xff]  ;;  %v378_v35 = vpack.c.bf16 %v351_v29, %v350_v28  ;;  %v385_v36 = vpack.c.bf16 %v365_v31, %v364_v30  ;;  %v352_v38 = vld [vmem:[%s6212_s19 + $0x50] sm:$0xff]  ;;  %885 = vst [vmem:[#allocation2 + $0x8] sm:$0xf] %v6027_v18  ;;  %p5948_p0 = pneg %p5947_p12 }
  0x70   : > { %5272 = vmatpush3.bf16.msra.mxu0 %v5609_v2  ;;  %5517 = vmatpush3.bf16.msra.mxu1 %v5609_v2  ;;  %v386_v37 = vpack.c.bf16 %v367_v33, %v366_v32  ;;  %v353_v39 = vld [vmem:[%s6212_s19 + $0x58] sm:$0xff]  ;;  %v354_v40 = vld [vmem:[%s6212_s19 + $0x60] sm:$0xff]  ;;  %v355_v41 = vld [vmem:[%s6212_s19 + $0x68] sm:$0xff]  ;;  %887 = vst [vmem:[#allocation2 + $0x14] sm:$0xf] %v6027_v18  ;;  %p5954_p7 = por %p5953_p3, %p5952_p5 }
  0x71   : > { %5273 = vmatprep.subr.bf16.mxu0 %v5610_v3  ;;  %5510 = vmatprep.subr.bf16.mxu1 %v5610_v3  ;;  %v368_v42 = vld [vmem:[%s6212_s19 + $0xd0] sm:$0xff]  ;;  %v369_v43 = vld [vmem:[%s6212_s19 + $0xd8] sm:$0xff]  ;;  %v370_v44 = vld [vmem:[%s6212_s19 + $0xe0] sm:$0xff]  ;;  %v379_v46 = vpack.c.bf16 %v353_v39, %v352_v38  ;;  %v380_v47 = vpack.c.bf16 %v355_v41, %v354_v40  ;;  %890 = vst [vmem:[#allocation2 + $0x1a0] sm:$0xf] %v6027_v18 }
  0x72   : > { %v371_v45 = vld [vmem:[%s6212_s19 + $0xe8] sm:$0xff]  ;;  %v387_v48 = vpack.c.bf16 %v369_v43, %v368_v42  ;;  %v356_v50 = vld [vmem:[%s6212_s19 + $0x70] sm:$0xff]  ;;  %v357_v51 = vld [vmem:[%s6212_s19 + $0x78] sm:$0xff]  ;;  %892 = vst [vmem:[#allocation2 + $0x1ac] sm:$0xf] %v6027_v18  ;;  %p5955_p9 = pnand %p5954_p7, %p5948_p0 }
  0x73   : > { %v388_v49 = vpack.c.bf16 %v371_v45, %v370_v44  ;;  %v372_v52 = vld [vmem:[%s6212_s19 + $0xf0] sm:$0xff]  ;;  %v373_v53 = vld [vmem:[%s6212_s19 + $0xf8] sm:$0xff]  ;;  %v381_v54 = vpack.c.bf16 %v357_v51, %v356_v50  ;;  %v5621_v62 = vld [vmem:[#allocation8 + $0x128] sm:$0xff]  }
  0x74   : > { %5274 = vmatpush3.bf16.msra.mxu0 %v5610_v3  ;;  %5518 = vmatpush3.bf16.msra.mxu1 %v5610_v3  ;;  %v389_v55 = vpack.c.bf16 %v373_v53, %v372_v52  ;;  %v5615_v56 = vld [vmem:[#allocation8 + $0x138] sm:$0xff]   ;;  %v5618_v59 = vld [vmem:[#allocation8 + $0x130] sm:$0xff]   ;;  %v5623_v63 = vld [vmem:[#allocation8 + $0x168] sm:$0xff]  }
  0x75   : > { %5275 = vmatprep.subr.bf16.mxu0 %v5611_v7  ;;  %5511 = vmatprep.subr.bf16.mxu1 %v5611_v7  ;;  %v5617_v57 = vld [vmem:[#allocation8 + $0x178] sm:$0xff]   ;;  %v5620_v60 = vld [vmem:[#allocation8 + $0x170] sm:$0xff]   ;;  %v5622_v0 = vld [vmem:[#allocation8 + $0xe8] sm:$0xff]  }
  0x76   : > { %v5616_v58 = vld [vmem:[#allocation8 + $0xf8] sm:$0xff]   ;;  %v5619_v61 = vld [vmem:[#allocation8 + $0xf0] sm:$0xff]   ;;  %v5624_v1 = vld [vmem:[#allocation8 + $0x120] sm:$0xff]  }
  0x77   : > { %v5626_v2 = vld [vmem:[#allocation8 + $0x160] sm:$0xff]   ;;  %v5627_v4 = vld [vmem:[#allocation8 + $0x118] sm:$0xff]   ;;  %v5632_v8 = vld [vmem:[#allocation8 + $0x150] sm:$0xff]  }
  0x78   : > { %5276 = vmatpush3.bf16.msra.mxu0 %v5611_v7  ;;  %5519 = vmatpush3.bf16.msra.mxu1 %v5611_v7  ;;  %v5625_v3 = vld [vmem:[#allocation8 + $0xe0] sm:$0xff]   ;;  %v5629_v5 = vld [vmem:[#allocation8 + $0x158] sm:$0xff]   ;;  %v5630_v7 = vld [vmem:[#allocation8 + $0x110] sm:$0xff]  }
  0x79   : > { %5277 = vmatprep.subr.bf16.mxu0 %v5612_v11  ;;  %5512 = vmatprep.subr.bf16.mxu1 %v5612_v11  ;;  %v5628_v6 = vld [vmem:[#allocation8 + $0xd8] sm:$0xff]   ;;  %v5631_v9 = vld [vmem:[#allocation8 + $0xd0] sm:$0xff]   ;;  %v5633_v10 = vld [vmem:[#allocation8 + $0x108] sm:$0xff]  }
  0x7a   : > { %v5638_v14 = vld [vmem:[#allocation8 + $0x140] sm:$0xff]   ;;  %v6258_v16 = vld [vmem:[#allocation8 + $0xb8] sm:$0xff]   ;;  %v6264_v19 = vld [vmem:[%s7040_s2] ss:$0 sm:$0xff] }
  0x7b   : > { %v5637_v15 = vld [vmem:[#allocation8 + $0xc0] sm:$0xff]   ;;  %v5667_v17 = vld [vmem:[#allocation8 + $0x78] sm:$0xff]   ;;  %vm6291_vm4 = vmand %vm798_vm0, %vm799_vm1 }
  0x7c   : > { %5278 = vmatpush3.bf16.msra.mxu0 %v5612_v11  ;;  %5520 = vmatpush3.bf16.msra.mxu1 %v5612_v11  ;;  %v5635_v11 = vld [vmem:[#allocation8 + $0x148] sm:$0xff]   ;;  %vm6297_vm5 = vmand %vm865_vm2, %vm866_vm3 }
  0x7d   : > { %5279 = vmatprep.subr.bf16.mxu0 %v5613_v12  ;;  %5513 = vmatprep.subr.bf16.mxu1 %v5613_v12 }
  0x80   : > { %5280 = vmatpush3.bf16.msra.mxu0 %v5613_v12  ;;  %5521 = vmatpush3.bf16.msra.mxu1 %v5613_v12  ;;  %v5634_v12 = vld [vmem:[#allocation8 + $0xc8] sm:$0xff]  }
  0x81   : > { %5281 = vmatprep.subr.bf16.mxu0 %v5614_v13  ;;  %5514 = vmatprep.subr.bf16.mxu1 %v5614_v13 }
  0x84   : > { %5282 = vmatpush3.bf16.msra.mxu0 %v5614_v13  ;;  %5522 = vmatpush3.bf16.msra.mxu1 %v5614_v13  ;;  %v5636_v13 = vld [vmem:[#allocation8 + $0x100] sm:$0xff]  }
  0x85   : > { %4835 = vmatprep.subr.bf16.mxu1 %v5615_v56  ;;  %5315 = vmatprep.subr.bf16.mxu0 %v5617_v57 }
  0x87   : > { %5284 = vmatmul.mubr.bf16.vlgmr.msra.gmra.mxu0 %v375_v22  ;;  %5300 = vmatmul.mubr.bf16.vlgmr.msra.gmra.mxu1 %v383_v24 }
  0x88   : > { %5287 = vmatprep.mubr.bf16.mxu0 %v376_v23  ;;  %5303 = vmatprep.mubr.bf16.mxu1 %v384_v25 }
  0x89   : > { %4836 = vmatpush3.bf16.msra.mxu1 %v5616_v58  ;;  %5316 = vmatpush3.bf16.msra.mxu0 %v5617_v57 }
  0x8a   : > { %4837 = vmatprep.subr.bf16.mxu1 %v5618_v59  ;;  %5317 = vmatprep.subr.bf16.mxu0 %v5620_v60 }
  0x8d   : > { %4838 = vmatpush3.bf16.msra.mxu1 %v5619_v61  ;;  %5318 = vmatpush3.bf16.msra.mxu0 %v5620_v60 }
  0x8e   : > { %4839 = vmatprep.subr.bf16.mxu1 %v5621_v62  ;;  %5319 = vmatprep.subr.bf16.mxu0 %v5623_v63 }
  0x8f   : > { %5288 = vmatmul.mubr.bf16.gmra.mxu0 %v377_v34  ;;  %5304 = vmatmul.mubr.bf16.gmra.mxu1 %v385_v36 }
  0x90   : > { %5291 = vmatprep.mubr.bf16.mxu0 %v378_v35  ;;  %5307 = vmatprep.mubr.bf16.mxu1 %v386_v37 }
  0x91   : > { %4840 = vmatpush3.bf16.msra.mxu1 %v5622_v0  ;;  %5320 = vmatpush3.bf16.msra.mxu0 %v5623_v63 }
  0x92   : > { %4841 = vmatprep.subr.bf16.mxu1 %v5624_v1  ;;  %5321 = vmatprep.subr.bf16.mxu0 %v5626_v2 }
  0x95   : > { %4842 = vmatpush3.bf16.msra.mxu1 %v5625_v3  ;;  %5322 = vmatpush3.bf16.msra.mxu0 %v5626_v2 }
  0x96   : > { %4843 = vmatprep.subr.bf16.mxu1 %v5627_v4  ;;  %5323 = vmatprep.subr.bf16.mxu0 %v5629_v5 }
  0x97   : > { %5292 = vmatmul.mubr.bf16.gmra.mxu0 %v379_v46  ;;  %5308 = vmatmul.mubr.bf16.gmra.mxu1 %v387_v48 }
  0x98   : > { %5295 = vmatprep.mubr.bf16.mxu0 %v380_v47  ;;  %5311 = vmatprep.mubr.bf16.mxu1 %v388_v49 }
  0x99   : > { %4844 = vmatpush3.bf16.msra.mxu1 %v5628_v6  ;;  %5324 = vmatpush3.bf16.msra.mxu0 %v5629_v5 }
  0x9a   : > { %4845 = vmatprep.subr.bf16.mxu1 %v5630_v7  ;;  %5325 = vmatprep.subr.bf16.mxu0 %v5632_v8 }
  0x9d   : > { %4846 = vmatpush3.bf16.msra.mxu1 %v5631_v9  ;;  %5326 = vmatpush3.bf16.msra.mxu0 %v5632_v8 }
  0x9e   : > { %4847 = vmatprep.subr.bf16.mxu1 %v5633_v10  ;;  %5327 = vmatprep.subr.bf16.mxu0 %v5635_v11 }
  0x9f   : > { %5296 = vmatmul.mubr.bf16.gmra.mxu0 %v381_v54  ;;  %5312 = vmatmul.mubr.bf16.gmra.mxu1 %v389_v55 }
  0xa1   : > { %4848 = vmatpush3.bf16.msra.mxu1 %v5634_v12  ;;  %5328 = vmatpush3.bf16.msra.mxu0 %v5635_v11 }
  0xa2   : > { %4849 = vmatprep.subr.bf16.mxu1 %v5636_v13  ;;  %5329 = vmatprep.subr.bf16.mxu0 %v5638_v14 }
  0xa5   : > { %4850 = vmatpush3.bf16.msra.mxu1 %v5637_v15  ;;  %5330 = vmatpush3.bf16.msra.mxu0 %v5638_v14 }
  0xa6   : > { %5363 = vmatprep.subr.bf16.mxu1 %v6258_v16  ;;  %4971 = vmatprep.subr.bf16.mxu0 %v5667_v17 }
 0x147   : > { %v5285_v20 = vpop.f32.mrf.mxu0  ;;  %v5301_v22 = vpop.f32.mrf.mxu1 }
 0x148   : > { %v504_v21 = vadd.f32 %v5285_v20, %v6264_v19  ;;  %v568_v24 = vadd.f32 %v5301_v22, %v6264_v19 }
 0x149   : > { %v495_v23 = vpop.f32.mrf.mxu0  ;;  %v559_v27 = vpop.f32.mrf.mxu1 }
 0x14a   : > { %v624_v25 = vmax.f32 %v504_v21, 0.0  ;;  %v496_v26 = vadd.f32 %v6264_v19, %v495_v23  ;;  %v640_v29 = vmax.f32 %v568_v24, 0.0  ;;  %v560_v30 = vadd.f32 %v6264_v19, %v559_v27 }
 0x14b   : > { %v5286_v28 = vpop.f32.mrf.mxu0  ;;  %v5302_v34 = vpop.f32.mrf.mxu1 }
 0x14c   : > { %v4780_v31 = vpack.c.bf16 %v624_v25, %v624_v25  ;;  %v622_v32 = vmax.f32 %v496_v26, 0.0  ;;  %v507_v33 = vadd.f32 %v5286_v28, %v6264_v19  ;;  %v4796_v36 = vpack.c.bf16 %v640_v29, %v640_v29 }
 0x14d   : > { %v498_v35 = vpop.f32.mrf.mxu0  ;;  %v6271_v37 = vmax.f32 %v560_v30, 0.0  ;;  %v571_v38 = vadd.f32 %v5302_v34, %v6264_v19  ;;  %v562_v42 = vpop.f32.mrf.mxu1 }
 0x14e   : > { %1152 = vst [vmem:[#allocation2 + $0x34] sm:$0xf] %v4780_v31  ;;  %v4778_v39 = vpack.c.bf16 %v622_v32, %v622_v32  ;;  %v625_v40 = vmax.f32 %v507_v33, 0.0  ;;  %v499_v41 = vadd.f32 %v6264_v19, %v498_v35  ;;  %1168 = vst [vmem:[#allocation2 + $0xf4] sm:$0xf] %v4796_v36  ;;  %v563_v46 = vadd.f32 %v6264_v19, %v562_v42 }
 0x14f   : > { %v5289_v43 = vpop.f32.mrf.mxu0  ;;  %v4794_v44 = vpack.c.bf16 %v6271_v37, %v6271_v37  ;;  %v641_v45 = vmax.f32 %v571_v38, 0.0  ;;  %v5305_v51 = vpop.f32.mrf.mxu1 }
 0x150   : > { %1150 = vst [vmem:[#allocation2 + $0x1c] sm:$0xf] %v4778_v39  ;;  %v655_v47 = vpack.c.bf16 %v625_v40, %v624_v25  ;;  %v4781_v48 = vpack.c.bf16 %v625_v40, %v625_v40  ;;  %v623_v49 = vmax.f32 %v499_v41, 0.0  ;;  %v520_v50 = vadd.f32 %v5289_v43, %v6264_v19 }
 0x151   : > { %v511_v52 = vpop.f32.mrf.mxu0  ;;  %1166 = vst [vmem:[#allocation2 + $0xdc] sm:$0xf] %v4794_v44  ;;  %v6279_v53 = vpack.c.bf16 %v641_v45, %v640_v29  ;;  %v4797_v54 = vpack.c.bf16 %v641_v45, %v641_v45  ;;  %v6281_v55 = vmax.f32 %v563_v46, 0.0  ;;  %v6284_v56 = vadd.f32 %v5305_v51, %v6264_v19 }
 0x152   : > { %v678_v57 = vshrl.u32 %v655_v47, 16  ;;  %v681_v58 = vshll.u32 %v655_v47, 16  ;;  %1153 = vst [vmem:[#allocation2 + $0x40] sm:$0xf] %v4781_v48  ;;  %v654_v59 = vpack.c.bf16 %v623_v49, %v622_v32  ;;  %v4779_v60 = vpack.c.bf16 %v623_v49, %v623_v49 }
 0x153   : > { %v628_v61 = vmax.f32 %v520_v50, 0.0  ;;  %v512_v62 = vadd.f32 %v6264_v19, %v511_v52  ;;  %v5290_v63 = vpop.f32.mrf.mxu0  ;;  %v734_v0 = vshrl.u32 %v6279_v53, 16  ;;  %v737_v1 = vshll.u32 %v6279_v53, 16  ;;  %1169 = vst [vmem:[#allocation2 + $0x100] sm:$0xf] %v4797_v54 }
 0x154   : > { %v680_v2 = vrot.slane %v678_v57, 7  ;;  %v819_v4 = vrot.slane %v681_v58, 1  ;;  %v671_v5 = vshrl.u32 %v654_v59, 16  ;;  %v674_v6 = vshll.u32 %v654_v59, 16  ;;  %1151 = vst [vmem:[#allocation2 + $0x28] sm:$0xf] %v4779_v60 }
 0x155   : > { %v4784_v8 = vpack.c.bf16 %v628_v61, %v628_v61  ;;  %v626_v9 = vmax.f32 %v512_v62, 0.0  ;;  %v523_v10 = vadd.f32 %v5290_v63, %v6264_v19  ;;  %v514_v11 = vpop.f32.mrf.mxu0  ;;  %v736_v12 = vrot.slane %v734_v0, 7 }
 0x156   : > { %v683_v13 = vor.u32 %v681_v58, %v680_v2  ;;  %v820_v14 = vor.u32 %v819_v4, %v678_v57  ;;  %v673_v15 = vrot.slane %v671_v5, 7  ;;  %v817_v17 = vrot.slane %v674_v6, 1 }
 0x157   : > { %1156 = vst [vmem:[#allocation2 + $0x64] sm:$0xf] %v4784_v8  ;;  %v4782_v18 = vpack.c.bf16 %v626_v9, %v626_v9  ;;  %v629_v20 = vmax.f32 %v523_v10, 0.0  ;;  %v515_v21 = vadd.f32 %v6264_v19, %v514_v11  ;;  %v5293_v22 = vpop.f32.mrf.mxu0  ;;  %v739_v23 = vor.u32 %v737_v1, %v736_v12  ;;  %v6323_v8 = vpop.f32.mrf.mxu1 }
 0x158   : > { %v802_v24 = vsel %vm6291_vm4, 0, %v683_v13  ;;  %v869_v25 = vsel %vm6297_vm5, %v820_v14, 0  ;;  %v676_v26 = vor.u32 %v674_v6, %v673_v15  ;;  %v818_v27 = vor.u32 %v817_v17, %v671_v5 }
 0x159   : > { %v4452_v28 = vcombine.low %v802_v24, %v802_v24  ;;  %v4453_v29 = vcombine.high %v802_v24, %v802_v24  ;;  %v4516_v30 = vcombine.low %v869_v25, %v869_v25  ;;  %v4517_v31 = vcombine.high %v869_v25, %v869_v25  ;;  %1154 = vst [vmem:[#allocation2 + $0x4c] sm:$0xf] %v4782_v18  ;;  %v527_v32 = vpop.f32.mrf.mxu0 }
 0x15a   : > { %v801_v33 = vsel %vm6291_vm4, 0, %v676_v26  ;;  %v868_v34 = vsel %vm6297_vm5, %v818_v27, 0  ;;  %v657_v35 = vpack.c.bf16 %v629_v20, %v628_v61  ;;  %v4785_v36 = vpack.c.bf16 %v629_v20, %v629_v20 }
 0x15b   : > { %1008 = vst [vmem:[#allocation2 + $0x30] sm:$0xf] %v4452_v28  ;;  %1009 = vst [vmem:[#allocation2 + $0x3c] sm:$0xf] %v4453_v29  ;;  %v4450_v38 = vcombine.low %v801_v33, %v801_v33  ;;  %v4451_v39 = vcombine.high %v801_v33, %v801_v33  ;;  %v4514_v40 = vcombine.low %v868_v34, %v868_v34  ;;  %v5294_v42 = vpop.f32.mrf.mxu0  ;;  %v627_v45 = vmax.f32 %v515_v21, 0.0  ;;  %v6329_v29 = vpop.f32.mrf.mxu1 }
 0x15c   : > { %1296 = vst [vmem:[#allocation2 + $0x38] sm:$0xf] %v4516_v30  ;;  %1297 = vst [vmem:[#allocation2 + $0x44] sm:$0xf] %v4517_v31  ;;  %v4515_v41 = vcombine.high %v868_v34, %v868_v34  ;;  %v692_v43 = vshrl.u32 %v657_v35, 16  ;;  %v695_v44 = vshll.u32 %v657_v35, 16  ;;  %v536_v46 = vadd.f32 %v5293_v22, %v6264_v19 }
 0x15d   : > { %1157 = vst [vmem:[#allocation2 + $0x70] sm:$0xf] %v4785_v36  ;;  %1006 = vst [vmem:[#allocation2 + $0x18] sm:$0xf] %v4450_v38  ;;  %v528_v47 = vadd.f32 %v6264_v19, %v527_v32  ;;  %v539_v48 = vadd.f32 %v5294_v42, %v6264_v19  ;;  %v530_v49 = vpop.f32.mrf.mxu0  ;;  %v6318_v50 = vsel %vm6291_vm4, 0, %v739_v23  ;;  %v6320_v51 = vrot.slane %v737_v1, 1 }
 0x15e   : > { %1007 = vst [vmem:[#allocation2 + $0x24] sm:$0xf] %v4451_v39  ;;  %1294 = vst [vmem:[#allocation2 + $0x20] sm:$0xf] %v4514_v40  ;;  %v694_v52 = vrot.slane %v692_v43, 7  ;;  %v823_v54 = vrot.slane %v695_v44, 1  ;;  %v656_v57 = vpack.c.bf16 %v627_v45, %v626_v9  ;;  %v4783_v58 = vpack.c.bf16 %v627_v45, %v627_v45 }
 0x15f   : > { %1295 = vst [vmem:[#allocation2 + $0x2c] sm:$0xf] %v4515_v41  ;;  %v632_v59 = vmax.f32 %v536_v46, 0.0  ;;  %v630_v60 = vmax.f32 %v528_v47, 0.0  ;;  %v633_v61 = vmax.f32 %v539_v48, 0.0  ;;  %v531_v62 = vadd.f32 %v6264_v19, %v530_v49  ;;  %v5297_v63 = vpop.f32.mrf.mxu0  ;;  %v5653_v35 = vld [vmem:[#allocation8 + $0xb0] sm:$0xff]  }
 0x160   : > { %v697_v2 = vor.u32 %v695_v44, %v694_v52  ;;  %v824_v4 = vor.u32 %v823_v54, %v692_v43  ;;  %v685_v5 = vshrl.u32 %v656_v57, 16  ;;  %v688_v6 = vshll.u32 %v656_v57, 16  ;;  %1155 = vst [vmem:[#allocation2 + $0x58] sm:$0xf] %v4783_v58  ;;  %v5641_v34 = vld [vmem:[#allocation2 + $0x1c] ss:$12 sps:$4 sm:$0xff]  }
 0x161   : > { %v4788_v10 = vpack.c.bf16 %v632_v59, %v632_v59  ;;  %v4786_v1 = vpack.c.bf16 %v630_v60, %v630_v60  ;;  %v659_v11 = vpack.c.bf16 %v633_v61, %v632_v59  ;;  %v4789_v12 = vpack.c.bf16 %v633_v61, %v633_v61  ;;  %v543_v13 = vpop.f32.mrf.mxu0  ;;  %v5670_v42 = vld [vmem:[#allocation8 + $0x38] sm:$0xff]   ;;  %1983 = vmatprep.mubr.bf16.mxu1 %v5641_v34  ;;  %v5671_v49 = vld [vmem:[#allocation8 + $0x70] sm:$0xff]   ;;  %v6338_v61 = vpop.f32.mrf.mxu1 }
 0x162   : > { %v804_v9 = vsel %vm6291_vm4, 0, %v697_v2  ;;  %v871_v14 = vsel %vm6297_vm5, %v824_v4, 0  ;;  %v687_v15 = vrot.slane %v685_v5, 7  ;;  %v821_v17 = vrot.slane %v688_v6, 1  ;;  %v5645_v59 = vld [vmem:[#allocation2 + $0x34] ss:$12 sps:$4 sm:$0xff]  }
 0x163   : > { %v4456_v18 = vcombine.low %v804_v9, %v804_v9  ;;  %v4457_v20 = vcombine.high %v804_v9, %v804_v9  ;;  %v4520_v21 = vcombine.low %v871_v14, %v871_v14  ;;  %v4521_v22 = vcombine.high %v871_v14, %v871_v14  ;;  %1160 = vst [vmem:[#allocation2 + $0x94] sm:$0xf] %v4788_v10  ;;  %v5298_v23 = vpop.f32.mrf.mxu0  ;;  %v5644_v48 = vld [vmem:[#allocation2 + $0x38] ss:$12 sps:$4 sm:$0xff]  }
 0x164   : > { %1158 = vst [vmem:[#allocation2 + $0x7c] sm:$0xf] %v4786_v1  ;;  %1161 = vst [vmem:[#allocation2 + $0xa0] sm:$0xf] %v4789_v12  ;;  %v690_v24 = vor.u32 %v688_v6, %v687_v15  ;;  %v822_v25 = vor.u32 %v821_v17, %v685_v5  ;;  %v706_v26 = vshrl.u32 %v659_v11, 16  ;;  %v709_v27 = vshll.u32 %v659_v11, 16 }
 0x165   : > { %v5639_v28 = vld [vmem:[#allocation2 + $0x18] ss:$12 sps:$4 sm:$0xff]   ;;  %1012 = vst [vmem:[#allocation2 + $0x60] sm:$0xf] %v4456_v18  ;;  %1013 = vst [vmem:[#allocation2 + $0x6c] sm:$0xf] %v4457_v20  ;;  %v552_v31 = vadd.f32 %v5297_v63, %v6264_v19  ;;  %v544_v32 = vadd.f32 %v6264_v19, %v543_v13  ;;  %v555_v33 = vadd.f32 %v5298_v23, %v6264_v19  ;;  %v546_v41 = vpop.f32.mrf.mxu0  ;;  %v6346_v20 = vpop.f32.mrf.mxu1 }
 0x166   : > { %1300 = vst [vmem:[#allocation2 + $0x68] sm:$0xf] %v4520_v21  ;;  %1301 = vst [vmem:[#allocation2 + $0x74] sm:$0xf] %v4521_v22  ;;  %v631_v30 = vmax.f32 %v531_v62, 0.0  ;;  %v803_v36 = vsel %vm6291_vm4, 0, %v690_v24  ;;  %1984 = vmatmul.mubr.bf16.vlgmr.msra.gmra.mxu1 %v5639_v28  ;;  %v547_v4 = vadd.f32 %v6264_v19, %v546_v41  ;;  %v836_v24 = vor.u32 %v6320_v51, %v734_v0 }
 0x167   : > { %v870_v38 = vsel %vm6297_vm5, %v822_v25, 0  ;;  %v708_v39 = vrot.slane %v706_v26, 7  ;;  %v827_v40 = vrot.slane %v709_v27, 1  ;;  %v4454_v43 = vcombine.low %v803_v36, %v803_v36  ;;  %v5642_v47 = vld [vmem:[#allocation2 + $0x20] ss:$12 sps:$4 sm:$0xff]   ;;  %5364 = vmatpush3.bf16.msra.mxu1 %v6258_v16  ;;  %1991 = vmatprep.mubr.bf16.mxu1 %v5645_v59  ;;  %v5664_v1 = vld [vmem:[#allocation8 + $0xa8] sm:$0xff]  }
 0x168   : > { %v4455_v44 = vcombine.high %v803_v36, %v803_v36  ;;  %v4518_v45 = vcombine.low %v870_v38, %v870_v38  ;;  %v4519_v46 = vcombine.high %v870_v38, %v870_v38  ;;  %v658_v57 = vpack.c.bf16 %v631_v30, %v630_v60  ;;  %5331 = vmatprep.mubr.bf16.mxu0 %v5642_v47  ;;  %v5672_v14 = vld [vmem:[#allocation8 + $0x30] sm:$0xff]   ;;  %v5676_v25 = vld [vmem:[#allocation8 + $0x68] sm:$0xff]   ;;  %v5680_v41 = vld [vmem:[#allocation8 + $0x60] sm:$0xff]  }
 0x169   : > { %v711_v52 = vor.u32 %v709_v27, %v708_v39  ;;  %v828_v54 = vor.u32 %v827_v40, %v706_v26  ;;  %v4787_v58 = vpack.c.bf16 %v631_v30, %v631_v30  ;;  %1010 = vst [vmem:[#allocation2 + $0x48] sm:$0xf] %v4454_v43  ;;  %v636_v62 = vmax.f32 %v552_v31, 0.0  ;;  %5332 = vmatmul.mubr.bf16.vlgmr.msra.gmra.mxu0 %v5644_v48  ;;  %v6355_v31 = vld [vmem:[#allocation2 + $0x30] ss:$12 sps:$4 sm:$0xff]   ;;  %v6368_v40 = vpop.f32.mrf.mxu1 }
 0x16a   : > { %1011 = vst [vmem:[#allocation2 + $0x54] sm:$0xf] %v4455_v44  ;;  %1298 = vst [vmem:[#allocation2 + $0x50] sm:$0xf] %v4518_v45  ;;  %v634_v63 = vmax.f32 %v544_v32, 0.0  ;;  %v637_v2 = vmax.f32 %v555_v33, 0.0  ;;  %5365 = vmatprep.subr.bf16.mxu1 %v5653_v35  ;;  %4972 = vmatpush3.bf16.msra.mxu0 %v5670_v42  ;;  %v4468_v28 = vcombine.low %v6318_v50, %v6318_v50 }
 0x16b   : > { %1299 = vst [vmem:[#allocation2 + $0x5c] sm:$0xf] %v4519_v46  ;;  %v806_v60 = vsel %vm6291_vm4, 0, %v711_v52  ;;  %v873_v5 = vsel %vm6297_vm5, %v828_v54, 0  ;;  %v699_v6 = vshrl.u32 %v658_v57, 16  ;;  %v702_v10 = vshll.u32 %v658_v57, 16  ;;  %5366 = vmatpush3.bf16.msra.mxu1 %v5653_v35  ;;  %4973 = vmatprep.subr.bf16.mxu0 %v5671_v49 }
 0x16c   : > { %1159 = vst [vmem:[#allocation2 + $0x88] sm:$0xf] %v4787_v58  ;;  %v4460_v11 = vcombine.low %v806_v60, %v806_v60  ;;  %v4461_v12 = vcombine.high %v806_v60, %v806_v60  ;;  %v4524_v13 = vcombine.low %v873_v5, %v873_v5  ;;  %v4525_v9 = vcombine.high %v873_v5, %v873_v5  ;;  %v5683_v32 = vld [vmem:[#allocation8 + $0xa0] sm:$0xff]   ;;  %v5679_v35 = vld [vmem:[#allocation8 + $0x28] sm:$0xff]   ;;  %v6370_v42 = vld [vmem:[#allocation8 + $0x98] sm:$0xff]   ;;  %v6377_v5 = vpop.f32.mrf.mxu1 }
 0x16d   : > { %v701_v15 = vrot.slane %v699_v6, 7  ;;  %v825_v16 = vrot.slane %v702_v10, 1  ;;  %v4792_v17 = vpack.c.bf16 %v636_v62, %v636_v62  ;;  %v4790_v18 = vpack.c.bf16 %v634_v63, %v634_v63  ;;  %5367 = vmatprep.subr.bf16.mxu1 %v5664_v1  ;;  %v5649_v34 = vld [vmem:[#allocation2 + $0x68] ss:$12 sps:$4 sm:$0xff]   ;;  %1024 = vst [vmem:[#allocation2 + $0xf0] sm:$0xf] %v4468_v28 }
 0x16e   : > { %1016 = vst [vmem:[#allocation2 + $0x90] sm:$0xf] %v4460_v11  ;;  %1017 = vst [vmem:[#allocation2 + $0x9c] sm:$0xf] %v4461_v12  ;;  %v661_v21 = vpack.c.bf16 %v637_v2, %v636_v62  ;;  %v4793_v22 = vpack.c.bf16 %v637_v2, %v637_v2  ;;  %v635_v23 = vmax.f32 %v547_v4, 0.0  ;;  %v4469_v30 = vcombine.high %v6318_v50, %v6318_v50  ;;  %v5681_v12 = vld [vmem:[#allocation8 + $0x20] sm:$0xff]  }
 0x16f   : > { %1304 = vst [vmem:[#allocation2 + $0x98] sm:$0xf] %v4524_v13  ;;  %1305 = vst [vmem:[#allocation2 + $0xa4] sm:$0xf] %v4525_v9  ;;  %v704_v26 = vor.u32 %v702_v10, %v701_v15  ;;  %v826_v27 = vor.u32 %v825_v16, %v699_v6  ;;  %v877_v50 = vsel %vm6297_vm5, %v836_v24, 0  ;;  %v6365_v39 = vpack.c.bf16 %v6281_v55, %v6271_v37  ;;  %v5708_v28 = vld [vmem:[#allocation8 + $0x90] sm:$0xff]  }
 0x170   : > { %1164 = vst [vmem:[#allocation2 + $0xc4] sm:$0xf] %v4792_v17  ;;  %1162 = vst [vmem:[#allocation2 + $0xac] sm:$0xf] %v4790_v18  ;;  %v720_v53 = vshrl.u32 %v661_v21, 16  ;;  %v723_v33 = vshll.u32 %v661_v21, 16  ;;  %v660_v0 = vpack.c.bf16 %v635_v23, %v634_v63  ;;  %v4791_v51 = vpack.c.bf16 %v635_v23, %v635_v23  ;;  %1992 = vmatmul.mubr.bf16.gmra.mxu1 %v6355_v31 }
 0x171   : > { %1165 = vst [vmem:[#allocation2 + $0xd0] sm:$0xf] %v4793_v22  ;;  %v805_v36 = vsel %vm6291_vm4, 0, %v704_v26  ;;  %v872_v38 = vsel %vm6297_vm5, %v826_v27, 0  ;;  %1025 = vst [vmem:[#allocation2 + $0xfc] sm:$0xf] %v4469_v30  ;;  %4974 = vmatpush3.bf16.msra.mxu0 %v5672_v14  ;;  %5368 = vmatpush3.bf16.msra.mxu1 %v5664_v1  ;;  %v4532_v57 = vcombine.low %v877_v50, %v877_v50  ;;  %v594_v27 = vpop.f32.mrf.mxu1 }
 0x172   : > { %v4458_v43 = vcombine.low %v805_v36, %v805_v36  ;;  %v4459_v44 = vcombine.high %v805_v36, %v805_v36  ;;  %v4522_v45 = vcombine.low %v872_v38, %v872_v38  ;;  %v4523_v46 = vcombine.high %v872_v38, %v872_v38  ;;  %1163 = vst [vmem:[#allocation2 + $0xb8] sm:$0xf] %v4791_v51  ;;  %v5647_v47 = vld [vmem:[#allocation2 + $0x50] ss:$12 sps:$4 sm:$0xff]   ;;  %v6372_v54 = vld [vmem:[#allocation2 + $0x4c] ss:$12 sps:$4 sm:$0xff]  }
 0x173   : > { %v722_v48 = vrot.slane %v720_v53, 7  ;;  %v831_v49 = vrot.slane %v723_v33, 1  ;;  %v713_v52 = vshrl.u32 %v660_v0, 16  ;;  %v716_v37 = vshll.u32 %v660_v0, 16  ;;  %4975 = vmatprep.subr.bf16.mxu0 %v5676_v25  ;;  %5369 = vmatprep.subr.bf16.mxu1 %v5683_v32  ;;  %1312 = vst [vmem:[#allocation2 + $0xf8] sm:$0xf] %v4532_v57 }
 0x174   : > { %1014 = vst [vmem:[#allocation2 + $0x78] sm:$0xf] %v4458_v43  ;;  %1015 = vst [vmem:[#allocation2 + $0x84] sm:$0xf] %v4459_v44  ;;  %v4533_v58 = vcombine.high %v877_v50, %v877_v50  ;;  %v727_v59 = vshrl.u32 %v6365_v39, 16  ;;  %v730_v62 = vshll.u32 %v6365_v39, 16  ;;  %5335 = vmatprep.mubr.bf16.mxu0 %v5647_v47  ;;  %1999 = vmatprep.mubr.bf16.mxu1 %v6372_v54 }
 0x175   : > { %1302 = vst [vmem:[#allocation2 + $0x80] sm:$0xf] %v4522_v45  ;;  %1303 = vst [vmem:[#allocation2 + $0x8c] sm:$0xf] %v4523_v46  ;;  %v725_v63 = vor.u32 %v723_v33, %v722_v48  ;;  %v832_v2 = vor.u32 %v831_v49, %v720_v53  ;;  %v715_v4 = vrot.slane %v713_v52, 7  ;;  %v829_v60 = vrot.slane %v716_v37, 1  ;;  %5336 = vmatmul.mubr.bf16.gmra.mxu0 %v5649_v34  ;;  %v5313_v48 = vpop.f32.mrf.mxu1 }
 0x176   : > { %1313 = vst [vmem:[#allocation2 + $0x104] sm:$0xf] %v4533_v58  ;;  %v729_v6 = vrot.slane %v727_v59, 7  ;;  %v833_v10 = vrot.slane %v730_v62, 1  ;;  %v4795_v1 = vpack.c.bf16 %v6281_v55, %v6281_v55  ;;  %v6382_v11 = vmax.f32 %v6284_v56, 0.0  ;;  %4976 = vmatpush3.bf16.msra.mxu0 %v5679_v35  ;;  %5370 = vmatpush3.bf16.msra.mxu1 %v5683_v32  ;;  %v5686_v17 = vld [vmem:[#allocation8 + $0x58] sm:$0xff]  }
 0x177   : > { %v808_v13 = vsel %vm6291_vm4, 0, %v725_v63  ;;  %v875_v9 = vsel %vm6297_vm5, %v832_v2, 0  ;;  %v718_v14 = vor.u32 %v716_v37, %v715_v4  ;;  %v830_v15 = vor.u32 %v829_v60, %v713_v52  ;;  %v6388_v16 = vld [vmem:[#allocation2 + $0x48] ss:$12 sps:$4 sm:$0xff]   ;;  %4977 = vmatprep.subr.bf16.mxu0 %v5680_v41  ;;  %5371 = vmatprep.subr.bf16.mxu1 %v6370_v42  ;;  %v6391_v22 = vld [vmem:[#allocation2 + $0x64] ss:$12 sps:$4 sm:$0xff]  }
 0x178   : > { %v4464_v55 = vcombine.low %v808_v13, %v808_v13  ;;  %v4465_v56 = vcombine.high %v808_v13, %v808_v13  ;;  %v4528_v18 = vcombine.low %v875_v9, %v875_v9  ;;  %v4529_v21 = vcombine.high %v875_v9, %v875_v9  ;;  %1167 = vst [vmem:[#allocation2 + $0xe8] sm:$0xf] %v4795_v1  ;;  %v5655_v0 = vld [vmem:[#allocation2 + $0x98] ss:$12 sps:$4 sm:$0xff]   ;;  %v5689_v51 = vld [vmem:[#allocation8 + $0x18] sm:$0xff]   ;;  %v6426_v4 = vld [vmem:[#allocation8 + $0x80] sm:$0xff]  }
 0x179   : > { %v807_v23 = vsel %vm6291_vm4, 0, %v718_v14  ;;  %v874_v24 = vsel %vm6297_vm5, %v830_v15, 0  ;;  %v732_v25 = vor.u32 %v730_v62, %v729_v6  ;;  %v834_v26 = vor.u32 %v833_v10, %v727_v59  ;;  %2000 = vmatmul.mubr.bf16.gmra.mxu1 %v6388_v16  ;;  %v6399_v34 = vld [vmem:[#allocation8 + $0x88] sm:$0xff]   ;;  %v6416_v49 = vld [vmem:[#allocation2 + $0x60] ss:$12 sps:$4 sm:$0xff]  }
 0x17a   : > { %1020 = vst [vmem:[#allocation2 + $0xc0] sm:$0xf] %v4464_v55  ;;  %1021 = vst [vmem:[#allocation2 + $0xcc] sm:$0xf] %v4465_v56  ;;  %v4462_v30 = vcombine.low %v807_v23, %v807_v23  ;;  %v4463_v32 = vcombine.high %v807_v23, %v807_v23  ;;  %v4526_v53 = vcombine.low %v874_v24, %v874_v24  ;;  %2007 = vmatprep.mubr.bf16.mxu1 %v6391_v22  ;;  %v5690_v52 = vld [vmem:[#allocation8 + $0x50] sm:$0xff]   ;;  %v5695_v13 = vld [vmem:[#allocation8 + $0x48] sm:$0xff]  }
 0x17b   : > { %1308 = vst [vmem:[#allocation2 + $0xc8] sm:$0xf] %v4528_v18  ;;  %1309 = vst [vmem:[#allocation2 + $0xd4] sm:$0xf] %v4529_v21  ;;  %v4527_v33 = vcombine.high %v874_v24, %v874_v24  ;;  %v809_v35 = vsel %vm6291_vm4, 0, %v732_v25  ;;  %v876_v36 = vsel %vm6297_vm5, %v834_v26, 0  ;;  %v4800_v38 = vpack.c.bf16 %v6382_v11, %v6382_v11  ;;  %4978 = vmatpush3.bf16.msra.mxu0 %v5681_v12 }
 0x17c   : > { %v576_v50 = vadd.f32 %v6264_v19, %v6323_v8  ;;  %5372 = vmatpush3.bf16.msra.mxu1 %v6370_v42  ;;  %1018 = vst [vmem:[#allocation2 + $0xa8] sm:$0xf] %v4462_v30  ;;  %1019 = vst [vmem:[#allocation2 + $0xb4] sm:$0xf] %v4463_v32  ;;  %v4466_v39 = vcombine.low %v809_v35, %v809_v35  ;;  %v4467_v41 = vcombine.high %v809_v35, %v809_v35  ;;  %v5652_v45 = vld [vmem:[#allocation2 + $0x80] ss:$12 sps:$4 sm:$0xff]  }
 0x17d   : > { %1306 = vst [vmem:[#allocation2 + $0xb0] sm:$0xf] %v4526_v53  ;;  %1307 = vst [vmem:[#allocation2 + $0xbc] sm:$0xf] %v4527_v33  ;;  %v4530_v43 = vcombine.low %v876_v36, %v876_v36  ;;  %v4531_v44 = vcombine.high %v876_v36, %v876_v36  ;;  %4979 = vmatprep.subr.bf16.mxu0 %v5686_v17  ;;  %v587_v47 = vadd.f32 %v6329_v29, %v6264_v19  ;;  %v6424_v57 = vld [vmem:[#allocation2 + $0x7c] ss:$12 sps:$4 sm:$0xff]  }
 0x17e   : > { %1172 = vst [vmem:[#allocation2 + $0x124] sm:$0xf] %v4800_v38  ;;  %v642_v46 = vmax.f32 %v576_v50, 0.0  ;;  %v579_v8 = vadd.f32 %v6264_v19, %v6338_v61  ;;  %v600_v42 = vadd.f32 %v6346_v20, %v6264_v19  ;;  %5373 = vmatprep.subr.bf16.mxu1 %v5708_v28  ;;  %1022 = vst [vmem:[#allocation2 + $0xd8] sm:$0xf] %v4466_v39  ;;  %5339 = vmatprep.mubr.bf16.mxu0 %v5652_v45  ;;  %v5691_v58 = vld [vmem:[#allocation8 + $0x10] sm:$0xff]  }
 0x17f   : > { %1023 = vst [vmem:[#allocation2 + $0xe4] sm:$0xf] %v4467_v41  ;;  %1310 = vst [vmem:[#allocation2 + $0xe0] sm:$0xf] %v4530_v43  ;;  %v592_v37 = vadd.f32 %v6264_v19, %v6368_v40  ;;  %v603_v29 = vadd.f32 %v6377_v5, %v6264_v19  ;;  %v595_v61 = vadd.f32 %v6264_v19, %v594_v27  ;;  %v645_v62 = vmax.f32 %v587_v47, 0.0  ;;  %v5698_v56 = vld [vmem:[#allocation8 + $0x8] sm:$0xff]  }
 0x180   : > { %1311 = vst [vmem:[#allocation2 + $0xec] sm:$0xf] %v4531_v44  ;;  %v616_v20 = vadd.f32 %v5313_v48, %v6264_v19  ;;  %v4798_v59 = vpack.c.bf16 %v642_v46, %v642_v46  ;;  %v643_v63 = vmax.f32 %v579_v8, 0.0  ;;  %v648_v2 = vmax.f32 %v600_v42, 0.0  ;;  %5340 = vmatmul.mubr.bf16.gmra.mxu0 %v5655_v0  ;;  %5374 = vmatpush3.bf16.msra.mxu1 %v5708_v28  ;;  %v6436_v0 = vpop.f32.mrf.mxu1  ;;  %v6440_v48 = vld [vmem:[#allocation2 + $0x94] ss:$12 sps:$4 sm:$0xff]  }
 0x181   : > { %v646_v60 = vmax.f32 %v592_v37, 0.0  ;;  %v649_v40 = vmax.f32 %v603_v29, 0.0  ;;  %v647_v6 = vmax.f32 %v595_v61, 0.0  ;;  %4980 = vmatpush3.bf16.msra.mxu0 %v5689_v51  ;;  %5375 = vmatprep.subr.bf16.mxu1 %v6399_v34  ;;  %v665_v19 = vpack.c.bf16 %v645_v62, %v6382_v11  ;;  %v6438_v51 = vld [vmem:[#allocation2 + $0x78] ss:$12 sps:$4 sm:$0xff]   ;;  %v5728_v37 = vld [vmem:[#allocation8 + $0x1f8] sm:$0xff]  }
 0x182   : > { %v6428_v10 = vmax.f32 %v616_v20, 0.0  ;;  %1170 = vst [vmem:[#allocation2 + $0x10c] sm:$0xf] %v4798_v59  ;;  %v4801_v5 = vpack.c.bf16 %v645_v62, %v645_v62  ;;  %v664_v1 = vpack.c.bf16 %v643_v63, %v642_v46  ;;  %v4799_v12 = vpack.c.bf16 %v643_v63, %v643_v63  ;;  %2008 = vmatmul.mubr.bf16.gmra.mxu1 %v6416_v49  ;;  %v5660_v55 = vld [vmem:[#allocation2 + $0xc8] ss:$12 sps:$4 sm:$0xff]   ;;  %v5314_v59 = vpop.f32.mrf.mxu1 }
 0x183   : > { %v4804_v9 = vpack.c.bf16 %v648_v2, %v648_v2  ;;  %v4802_v14 = vpack.c.bf16 %v646_v60, %v646_v60  ;;  %v667_v15 = vpack.c.bf16 %v649_v40, %v648_v2  ;;  %v4805_v17 = vpack.c.bf16 %v649_v40, %v649_v40  ;;  %2015 = vmatprep.mubr.bf16.mxu1 %v6424_v57  ;;  %v6452_v62 = vld [vmem:[#allocation8 + $0x238] sm:$0xff]  }
 0x184   : > { %v748_v18 = vshrl.u32 %v665_v19, 16  ;;  %v751_v21 = vshll.u32 %v665_v19, 16  ;;  %1173 = vst [vmem:[#allocation2 + $0x130] sm:$0xf] %v4801_v5  ;;  %v741_v23 = vshrl.u32 %v664_v1, 16  ;;  %v744_v24 = vshll.u32 %v664_v1, 16  ;;  %4981 = vmatprep.subr.bf16.mxu0 %v5690_v52  ;;  %5376 = vmatpush3.bf16.msra.mxu1 %v6399_v34 }
 0x185   : > { %1171 = vst [vmem:[#allocation2 + $0x118] sm:$0xf] %v4799_v12  ;;  %1176 = vst [vmem:[#allocation2 + $0x154] sm:$0xf] %v4804_v9  ;;  %v762_v11 = vshrl.u32 %v667_v15, 16  ;;  %v765_v25 = vshll.u32 %v667_v15, 16  ;;  %v666_v26 = vpack.c.bf16 %v647_v6, %v646_v60  ;;  %v4803_v27 = vpack.c.bf16 %v647_v6, %v647_v6  ;;  %4982 = vmatpush3.bf16.msra.mxu0 %v5691_v58 }
 0x186   : > { %1174 = vst [vmem:[#allocation2 + $0x13c] sm:$0xf] %v4802_v14  ;;  %1177 = vst [vmem:[#allocation2 + $0x160] sm:$0xf] %v4805_v17  ;;  %v5658_v28 = vld [vmem:[#allocation2 + $0xb0] ss:$12 sps:$4 sm:$0xff]   ;;  %5377 = vmatprep.subr.bf16.mxu1 %v6426_v4  ;;  %4983 = vmatprep.subr.bf16.mxu0 %v5695_v13 }
 0x187   : > { %v750_v30 = vrot.slane %v748_v18, 7  ;;  %v839_v32 = vrot.slane %v751_v21, 1  ;;  %v743_v53 = vrot.slane %v741_v23, 7  ;;  %v837_v33 = vrot.slane %v744_v24, 1  ;;  %v5699_v34 = vld [vmem:[#allocation8 + $0x40] sm:$0xff]   ;;  %5343 = vmatprep.mubr.bf16.mxu0 %v5658_v28 }
 0x188   : > { %v764_v35 = vrot.slane %v762_v11, 7  ;;  %v843_v36 = vrot.slane %v765_v25, 1  ;;  %v755_v38 = vshrl.u32 %v666_v26, 16  ;;  %v758_v50 = vshll.u32 %v666_v26, 16  ;;  %1175 = vst [vmem:[#allocation2 + $0x148] sm:$0xf] %v4803_v27  ;;  %5344 = vmatmul.mubr.bf16.gmra.mxu0 %v5660_v55  ;;  %5378 = vmatpush3.bf16.msra.mxu1 %v6426_v4 }
 0x189   : > { %v753_v39 = vor.u32 %v751_v21, %v750_v30  ;;  %v840_v41 = vor.u32 %v839_v32, %v748_v18  ;;  %v746_v43 = vor.u32 %v744_v24, %v743_v53  ;;  %v838_v44 = vor.u32 %v837_v33, %v741_v23  ;;  %v5663_v45 = vld [vmem:[#allocation2 + $0xe0] ss:$12 sps:$4 sm:$0xff]   ;;  %4984 = vmatpush3.bf16.msra.mxu0 %v5698_v56  ;;  %v5700_v52 = vld [vmem:[#allocation8] sm:$0xff]   ;;  %v5666_v1 = vld [vmem:[#allocation2 + $0xf8] ss:$12 sps:$4 sm:$0xff]   ;;  %v610_v18 = vpop.f32.mrf.mxu1 }
 0x18a   : > { %v767_v46 = vor.u32 %v765_v25, %v764_v35  ;;  %v844_v47 = vor.u32 %v843_v36, %v762_v11  ;;  %v757_v8 = vrot.slane %v755_v38, 7  ;;  %v841_v42 = vrot.slane %v758_v50, 1  ;;  %5347 = vmatprep.mubr.bf16.mxu0 %v5663_v45  ;;  %2016 = vmatmul.mubr.bf16.gmra.mxu1 %v6438_v51  ;;  %v5833_v11 = vld [vmem:[%s7040_s2] ss:$0 sm:$0xff]  ;;  %v6470_v32 = vld [vmem:[#allocation2 + $0x90] ss:$12 sps:$4 sm:$0xff]  }
 0x18b   : > { %v812_v29 = vsel %vm6291_vm4, 0, %v753_v39  ;;  %v879_v61 = vsel %vm6297_vm5, %v840_v41, 0  ;;  %v811_v20 = vsel %vm6291_vm4, 0, %v746_v43  ;;  %v878_v58 = vsel %vm6297_vm5, %v838_v44, 0  ;;  %2023 = vmatprep.mubr.bf16.mxu1 %v6440_v48  ;;  %4985 = vmatprep.subr.bf16.mxu0 %v5699_v34  ;;  %v6472_v35 = vld [vmem:[#allocation2 + $0xac] ss:$12 sps:$4 sm:$0xff]  }
 0x18c   : > { %v4472_v63 = vcombine.low %v812_v29, %v812_v29  ;;  %v4473_v2 = vcombine.high %v812_v29, %v812_v29  ;;  %v4536_v4 = vcombine.low %v879_v61, %v879_v61  ;;  %v4537_v60 = vcombine.high %v879_v61, %v879_v61  ;;  %5107 = vmatprep.subr.bf16.mxu1 %v5728_v37  ;;  %v6479_v37 = vld [vmem:[#allocation2 + $0xc4] ss:$12 sps:$4 sm:$0xff]   ;;  %v6493_v3 = vld [vmem:[#allocation2 + $0xdc] ss:$12 sps:$4 sm:$0xff]  }
 0x18d   : > { %v4470_v40 = vcombine.low %v811_v20, %v811_v20  ;;  %v4471_v6 = vcombine.high %v811_v20, %v811_v20  ;;  %v4534_v19 = vcombine.low %v878_v58, %v878_v58  ;;  %v4535_v5 = vcombine.high %v878_v58, %v878_v58  ;;  %4986 = vmatpush3.bf16.msra.mxu0 %v5700_v52  ;;  %v6477_v52 = vld [vmem:[#allocation2 + $0xa8] ss:$12 sps:$4 sm:$0xff]   ;;  %v6497_v7 = vld [vmem:[#allocation2 + $0xd8] ss:$12 sps:$4 sm:$0xff]  }
 0x18e   : > { %1028 = vst [vmem:[#allocation2 + $0x120] sm:$0xf] %v4472_v63  ;;  %1029 = vst [vmem:[#allocation2 + $0x12c] sm:$0xf] %v4473_v2  ;;  %v814_v12 = vsel %vm6291_vm4, 0, %v767_v46  ;;  %v881_v13 = vsel %vm6297_vm5, %v844_v47, 0  ;;  %v760_v9 = vor.u32 %v758_v50, %v757_v8  ;;  %v842_v14 = vor.u32 %v841_v42, %v755_v38  ;;  %5411 = vmatprep.subr.bf16.mxu0 %v6452_v62 }
 0x18f   : > { %1316 = vst [vmem:[#allocation2 + $0x128] sm:$0xf] %v4536_v4  ;;  %1317 = vst [vmem:[#allocation2 + $0x134] sm:$0xf] %v4537_v60  ;;  %v4476_v15 = vcombine.low %v814_v12, %v814_v12  ;;  %v4477_v17 = vcombine.high %v814_v12, %v814_v12  ;;  %v4540_v55 = vcombine.low %v881_v13, %v881_v13 }
 0x190   : > { %1026 = vst [vmem:[#allocation2 + $0x108] sm:$0xf] %v4470_v40  ;;  %1027 = vst [vmem:[#allocation2 + $0x114] sm:$0xf] %v4471_v6  ;;  %v4541_v56 = vcombine.high %v881_v13, %v881_v13  ;;  %v813_v21 = vsel %vm6291_vm4, 0, %v760_v9  ;;  %v880_v23 = vsel %vm6297_vm5, %v842_v14, 0  ;;  %v4808_v24 = vpack.c.bf16 %v6428_v10, %v6428_v10  ;;  %5348 = vmatmul.mubr.bf16.gmra.mxu0 %v5666_v1 }
 0x191   : > { %1314 = vst [vmem:[#allocation2 + $0x110] sm:$0xf] %v4534_v19  ;;  %1315 = vst [vmem:[#allocation2 + $0x11c] sm:$0xf] %v4535_v5  ;;  %v608_v25 = vadd.f32 %v5833_v11, %v6436_v0  ;;  %v4474_v26 = vcombine.low %v813_v21, %v813_v21  ;;  %v4475_v27 = vcombine.high %v813_v21, %v813_v21 }
 0x192   : > { %1032 = vst [vmem:[#allocation2 + $0x150] sm:$0xf] %v4476_v15  ;;  %1033 = vst [vmem:[#allocation2 + $0x15c] sm:$0xf] %v4477_v17  ;;  %v4538_v28 = vcombine.low %v880_v23, %v880_v23  ;;  %v4539_v30 = vcombine.high %v880_v23, %v880_v23  ;;  %v619_v33 = vadd.f32 %v5833_v11, %v5314_v59  ;;  %2024 = vmatmul.mubr.bf16.gmra.mxu1 %v6470_v32  ;;  %v5834_v23 = vld [vmem:[#allocation2] sm:$0xff] }
 0x193   : > { %1320 = vst [vmem:[#allocation2 + $0x158] sm:$0xf] %v4540_v55  ;;  %1321 = vst [vmem:[#allocation2 + $0x164] sm:$0xf] %v4541_v56  ;;  %v650_v53 = vmax.f32 %v608_v25, 0.0  ;;  %v611_v34 = vadd.f32 %v5833_v11, %v610_v18  ;;  %2031 = vmatprep.mubr.bf16.mxu1 %v6472_v35  ;;  %v4618_v25 = vcombine.low %v5834_v23, %v5834_v23 }
 0x194   : > { %1180 = vst [vmem:[#allocation2 + $0x184] sm:$0xf] %v4808_v24  ;;  %1030 = vst [vmem:[#allocation2 + $0x138] sm:$0xf] %v4474_v26  ;;  %v653_v36 = vmax.f32 %v619_v33, 0.0  ;;  %v6499_v24 = vcombine.high %v5834_v23, %v5834_v23 }
 0x195   : > { %1031 = vst [vmem:[#allocation2 + $0x144] sm:$0xf] %v4475_v27  ;;  %1318 = vst [vmem:[#allocation2 + $0x140] sm:$0xf] %v4538_v28  ;;  %v4806_v0 = vpack.c.bf16 %v650_v53, %v650_v53  ;;  %v651_v38 = vmax.f32 %v611_v34, 0.0  ;;  %v5740_v27 = vld [vmem:[#allocation8 + $0x230] sm:$0xff]  }
 0x196   : > { %1319 = vst [vmem:[#allocation2 + $0x14c] sm:$0xf] %v4539_v30  ;;  %v5675_v50 = vld [vmem:[#allocation2 + $0x128] ss:$12 sps:$4 sm:$0xff]   ;;  %v669_v39 = vpack.c.bf16 %v653_v36, %v6428_v10  ;;  %v4809_v41 = vpack.c.bf16 %v653_v36, %v653_v36  ;;  %v6491_v56 = vld [vmem:[#allocation2 + $0xc0] ss:$12 sps:$4 sm:$0xff]  }
 0x197   : > { %1178 = vst [vmem:[#allocation2 + $0x16c] sm:$0xf] %v4806_v0  ;;  %v668_v43 = vpack.c.bf16 %v651_v38, %v650_v53  ;;  %v4807_v44 = vpack.c.bf16 %v651_v38, %v651_v38  ;;  %v6501_v11 = vld [vmem:[#allocation2 + $0xf4] ss:$12 sps:$4 sm:$0xff]   ;;  %v6506_v26 = vld [vmem:[#allocation2 + $0xf0] ss:$12 sps:$4 sm:$0xff]  }
 0x198   : > { %v5673_v45 = vld [vmem:[#allocation2 + $0x110] ss:$12 sps:$4 sm:$0xff]   ;;  %v776_v46 = vshrl.u32 %v669_v39, 16  ;;  %v779_v47 = vshll.u32 %v669_v39, 16  ;;  %1181 = vst [vmem:[#allocation2 + $0x190] sm:$0xf] %v4809_v41 }
 0x199   : > { %v769_v8 = vshrl.u32 %v668_v43, 16  ;;  %v772_v42 = vshll.u32 %v668_v43, 16  ;;  %1179 = vst [vmem:[#allocation2 + $0x178] sm:$0xf] %v4807_v44  ;;  %5351 = vmatprep.mubr.bf16.mxu0 %v5673_v45  ;;  %v6508_v28 = vld [vmem:[#allocation2 + $0x10c] ss:$12 sps:$4 sm:$0xff]  }
 0x19a   : > { %5352 = vmatmul.mubr.bf16.gmra.mxu0 %v5675_v50  ;;  %v778_v29 = vrot.slane %v776_v46, 7  ;;  %v847_v61 = vrot.slane %v779_v47, 1  ;;  %2032 = vmatmul.mubr.bf16.gmra.mxu1 %v6477_v52  ;;  %v5685_v60 = vld [vmem:[#allocation2 + $0x158] ss:$12 sps:$4 sm:$0xff]   ;;  %v5835_v30 = vld [vmem:[#allocation2 + $0x1c] ss:$12 sps:$4 sm:$0xff]  }
 0x19b   : > { %v771_v20 = vrot.slane %v769_v8, 7  ;;  %v845_v10 = vrot.slane %v772_v42, 1  ;;  %2039 = vmatprep.mubr.bf16.mxu1 %v6479_v37  ;;  %v5749_v53 = vld [vmem:[#allocation8 + $0x228] sm:$0xff]   ;;  %v6513_v33 = vld [vmem:[#allocation2 + $0x108] ss:$12 sps:$4 sm:$0xff]   ;;  %v5761_v41 = vld [vmem:[#allocation8 + $0x210] sm:$0xff]  }
 0x19c   : > { %v781_v59 = vor.u32 %v779_v47, %v778_v29  ;;  %v848_v63 = vor.u32 %v847_v61, %v776_v46  ;;  %v6515_v34 = vld [vmem:[#allocation2 + $0x124] ss:$12 sps:$4 sm:$0xff]   ;;  %v5837_v38 = vld [vmem:[#allocation2 + $0x34] ss:$12 sps:$4 sm:$0xff]   ;;  %v6521_v39 = vld [vmem:[#allocation2 + $0x13c] ss:$12 sps:$4 sm:$0xff]  }
 0x19d   : > { %v5682_v58 = vld [vmem:[#allocation2 + $0x140] ss:$12 sps:$4 sm:$0xff]   ;;  %v774_v2 = vor.u32 %v772_v42, %v771_v20  ;;  %v846_v4 = vor.u32 %v845_v10, %v769_v8  ;;  %v5755_v0 = vld [vmem:[#allocation8 + $0x220] sm:$0xff]   ;;  %v5836_v36 = vld [vmem:[#allocation2 + $0x18] ss:$12 sps:$4 sm:$0xff]  }
 0x19e   : > { %5355 = vmatprep.mubr.bf16.mxu0 %v5682_v58  ;;  %v816_v40 = vsel %vm6291_vm4, 0, %v781_v59  ;;  %v883_v6 = vsel %vm6297_vm5, %v848_v63, 0  ;;  %v6519_v50 = vld [vmem:[#allocation2 + $0x120] ss:$12 sps:$4 sm:$0xff]   ;;  %v5765_v43 = vld [vmem:[#allocation8 + $0x208] sm:$0xff]   ;;  %v5770_v46 = vld [vmem:[#allocation8 + $0x200] sm:$0xff]  }
 0x19f   : > { %v815_v19 = vsel %vm6291_vm4, 0, %v774_v2  ;;  %v882_v5 = vsel %vm6297_vm5, %v846_v4, 0  ;;  %v4480_v1 = vcombine.low %v816_v40, %v816_v40  ;;  %v4481_v12 = vcombine.high %v816_v40, %v816_v40  ;;  %v6527_v44 = vld [vmem:[#allocation2 + $0x138] ss:$12 sps:$4 sm:$0xff]   ;;  %v6529_v45 = vld [vmem:[#allocation2 + $0x154] ss:$12 sps:$4 sm:$0xff]  }
 0x1a0   : > { %v4544_v13 = vcombine.low %v883_v6, %v883_v6  ;;  %v4545_v9 = vcombine.high %v883_v6, %v883_v6  ;;  %v4478_v14 = vcombine.low %v815_v19, %v815_v19  ;;  %v4479_v15 = vcombine.high %v815_v19, %v815_v19  ;;  %v5724_v47 = vld [vmem:[#allocation2 + $0x184] ss:$12 sps:$4 sm:$0xff]   ;;  %v5736_v20 = vld [vmem:[#allocation2 + $0x68] ss:$12 sps:$4 sm:$0xff]   ;;  %v5756_v4 = vld [vmem:[#allocation8 + $0x1c8] sm:$0xff]  }
 0x1a1   : > { %v4542_v17 = vcombine.low %v882_v5, %v882_v5  ;;  %v4543_v55 = vcombine.high %v882_v5, %v882_v5  ;;  %1036 = vst [vmem:[#allocation2 + $0x180] sm:$0xf] %v4480_v1  ;;  %1037 = vst [vmem:[#allocation2 + $0x18c] sm:$0xf] %v4481_v12  ;;  %v5733_v42 = vld [vmem:[#allocation8 + $0x1f0] sm:$0xff]   ;;  %v5746_v10 = vld [vmem:[#allocation8 + $0x1d8] sm:$0xff]  }
 0x1a2   : > { %1324 = vst [vmem:[#allocation2 + $0x188] sm:$0xf] %v4544_v13  ;;  %1325 = vst [vmem:[#allocation2 + $0x194] sm:$0xf] %v4545_v9  ;;  %5356 = vmatmul.mubr.bf16.gmra.mxu0 %v5685_v60  ;;  %2040 = vmatmul.mubr.bf16.gmra.mxu1 %v6491_v56  ;;  %v5732_v29 = vld [vmem:[#allocation2 + $0x38] ss:$12 sps:$4 sm:$0xff]  }
 0x1a3   : > { %1034 = vst [vmem:[#allocation2 + $0x168] sm:$0xf] %v4478_v14  ;;  %1035 = vst [vmem:[#allocation2 + $0x174] sm:$0xf] %v4479_v15  ;;  %2047 = vmatprep.mubr.bf16.mxu1 %v6493_v3  ;;  %v5734_v61 = vld [vmem:[#allocation2 + $0x50] ss:$12 sps:$4 sm:$0xff]  }
 0x1a4   : > { %1322 = vst [vmem:[#allocation2 + $0x170] sm:$0xf] %v4542_v17  ;;  %1323 = vst [vmem:[#allocation2 + $0x17c] sm:$0xf] %v4543_v55  ;;  %v5748_v58 = vld [vmem:[#allocation8 + $0x198] sm:$0xff]   ;;  %v5751_v63 = vld [vmem:[#allocation8 + $0x1d0] sm:$0xff]  }
 0x1a5   : > { %v5741_v59 = vld [vmem:[#allocation2 + $0x98] ss:$12 sps:$4 sm:$0xff]   ;;  %v5743_v60 = vld [vmem:[#allocation2 + $0xb0] ss:$12 sps:$4 sm:$0xff]   ;;  %v5745_v6 = vld [vmem:[#allocation2 + $0xc8] ss:$12 sps:$4 sm:$0xff]  }
 0x1a6   : > { %v5753_v2 = vld [vmem:[#allocation8 + $0x190] sm:$0xff]   ;;  %v5758_v40 = vld [vmem:[#allocation8 + $0x188] sm:$0xff]   ;;  %v5762_v19 = vld [vmem:[#allocation8 + $0x1c0] sm:$0xff]  }
 0x1a7   : > { %v5764_v5 = vld [vmem:[#allocation8 + $0x180] sm:$0xff]   ;;  %v5747_v1 = vld [vmem:[#allocation2 + $0xe0] ss:$12 sps:$4 sm:$0xff]   ;;  %v5750_v12 = vld [vmem:[#allocation2 + $0xf8] ss:$12 sps:$4 sm:$0xff]  }
 0x1a8   : > { %v5726_v8 = vld [vmem:[#allocation2 + $0x180] ss:$12 sps:$4 sm:$0xff]   ;;  %v5752_v13 = vld [vmem:[#allocation2 + $0x110] ss:$12 sps:$4 sm:$0xff]   ;;  %v5754_v9 = vld [vmem:[#allocation2 + $0x128] ss:$12 sps:$4 sm:$0xff]  }
 0x1a9   : > { %v5694_v18 = vld [vmem:[#allocation2 + $0x188] ss:$12 sps:$4 sm:$0xff]   ;;  %v5757_v14 = vld [vmem:[#allocation2 + $0x140] ss:$12 sps:$4 sm:$0xff]   ;;  %v5760_v15 = vld [vmem:[#allocation2 + $0x158] ss:$12 sps:$4 sm:$0xff]  }
 0x1aa   : > { %2048 = vmatmul.mubr.bf16.gmra.mxu1 %v6497_v7  ;;  %v5768_v55 = vld [vmem:[#allocation2 + $0x34] ss:$12 sps:$4 sm:$0xff]  }
 0x1ab   : > { %v5692_v21 = vld [vmem:[#allocation2 + $0x170] ss:$12 sps:$4 sm:$0xff]   ;;  %2055 = vmatprep.mubr.bf16.mxu1 %v6501_v11 }
 0x1ac   : > { %5359 = vmatprep.mubr.bf16.mxu0 %v5692_v21  ;;  %v5763_v17 = vld [vmem:[#allocation2 + $0x170] ss:$12 sps:$4 sm:$0xff]  }
 0x1ad   : > { %5360 = vmatmul.mubr.bf16.gmra.mxu0 %v5694_v18 }
 0x1ae   : > { %2705 = vmatprep.mubr.bf16.mxu0 %v6499_v24 }
 0x1b2   : > { %2056 = vmatmul.mubr.bf16.gmra.mxu1 %v6506_v26 }
 0x1b3   : > { %2063 = vmatprep.mubr.bf16.mxu1 %v6508_v28 }
 0x1b5   : > { %2706 = vmatmul.mubr.bf16.vlgmr.msra.gmra.mxu0 %v4618_v25 }
 0x1b6   : > { %2713 = vmatprep.mubr.bf16.mxu0 %v5835_v30  ;;  %5412 = vmatpush3.bf16.msra.mxu0 %v6452_v62  ;;  %v5759_v62 = vld [vmem:[#allocation8 + $0x218] sm:$0xff]  }
 0x1b7   : > { %5413 = vmatprep.subr.bf16.mxu0 %v5740_v27 }
 0x1ba   : > { %5414 = vmatpush3.bf16.msra.mxu0 %v5740_v27  ;;  %2064 = vmatmul.mubr.bf16.gmra.mxu1 %v6513_v33 }
 0x1bb   : > { %5415 = vmatprep.subr.bf16.mxu0 %v5749_v53  ;;  %2071 = vmatprep.mubr.bf16.mxu1 %v6515_v34 }
 0x1bd   : > { %2714 = vmatmul.mubr.bf16.gmra.mxu0 %v5836_v36 }
 0x1be   : > { %2721 = vmatprep.mubr.bf16.mxu0 %v5837_v38  ;;  %5416 = vmatpush3.bf16.msra.mxu0 %v5749_v53  ;;  %v5772_v53 = vld [vmem:[#allocation2 + $0x48] ss:$12 sps:$4 sm:$0xff]   ;;  %v5779_v38 = vld [vmem:[#allocation2 + $0x64] ss:$12 sps:$4 sm:$0xff]  }
 0x1bf   : > { %5417 = vmatprep.subr.bf16.mxu0 %v5755_v0 }
 0x1c2   : > { %5418 = vmatpush3.bf16.msra.mxu0 %v5755_v0  ;;  %2072 = vmatmul.mubr.bf16.gmra.mxu1 %v6519_v50  ;;  %v5771_v0 = vld [vmem:[#allocation2 + $0x50] ss:$12 sps:$4 sm:$0xff]  }
 0x1c3   : > { %5419 = vmatprep.subr.bf16.mxu0 %v5759_v62  ;;  %2079 = vmatprep.mubr.bf16.mxu1 %v6521_v39 }
 0x1c5   : > { %2722 = vmatmul.mubr.bf16.gmra.mxu0 %v6355_v31  ;;  %v6535_v31 = vld [vmem:[#allocation2 + $0x150] ss:$12 sps:$4 sm:$0xff]  }
 0x1c6   : > { %2729 = vmatprep.mubr.bf16.mxu0 %v6372_v54  ;;  %5420 = vmatpush3.bf16.msra.mxu0 %v5759_v62  ;;  %v6537_v54 = vld [vmem:[#allocation2 + $0x16c] ss:$12 sps:$4 sm:$0xff]   ;;  %v5775_v62 = vld [vmem:[#allocation2 + $0x68] ss:$12 sps:$4 sm:$0xff]  }
 0x1c7   : > { %5421 = vmatprep.subr.bf16.mxu0 %v5761_v41 }
 0x1ca   : > { %5422 = vmatpush3.bf16.msra.mxu0 %v5761_v41  ;;  %2080 = vmatmul.mubr.bf16.gmra.mxu1 %v6527_v44 }
 0x1cb   : > { %5423 = vmatprep.subr.bf16.mxu0 %v5765_v43  ;;  %2087 = vmatprep.mubr.bf16.mxu1 %v6529_v45 }
 0x1cd   : > { %2730 = vmatmul.mubr.bf16.gmra.mxu0 %v6388_v16  ;;  %v6543_v16 = vld [vmem:[#allocation2 + $0x168] ss:$12 sps:$4 sm:$0xff]  }
 0x1ce   : > { %2737 = vmatprep.mubr.bf16.mxu0 %v6391_v22  ;;  %5424 = vmatpush3.bf16.msra.mxu0 %v5765_v43  ;;  %v5727_v22 = vld [vmem:[#allocation2 + $0x8] ss:$12 sps:$4 sm:$0xff]  }
 0x1cf   : > { %5425 = vmatprep.subr.bf16.mxu0 %v5770_v46 }
 0x1d2   : > { %5426 = vmatpush3.bf16.msra.mxu0 %v5770_v46  ;;  %2088 = vmatmul.mubr.bf16.gmra.mxu1 %v6535_v31 }
 0x1d3   : > { %2095 = vmatprep.mubr.bf16.mxu1 %v6537_v54 }
 0x1d5   : > { %2738 = vmatmul.mubr.bf16.gmra.mxu0 %v6416_v49  ;;  %v5730_v49 = vld [vmem:[#allocation8 + $0x1b8] sm:$0xff]  }
 0x1d6   : > { %2745 = vmatprep.mubr.bf16.mxu0 %v6424_v57  ;;  %v5729_v57 = vld [vmem:[#allocation2 + $0x20] ss:$12 sps:$4 sm:$0xff]  }
 0x1da   : > { %2096 = vmatmul.mubr.bf16.gmra.mxu1 %v6543_v16 }
 0x1db   : > { %2103 = vmatprep.mubr.bf16.mxu1 %v5724_v47 }
 0x1dd   : > { %2746 = vmatmul.mubr.bf16.gmra.mxu0 %v6438_v51  ;;  %v5735_v51 = vld [vmem:[#allocation8 + $0x1b0] sm:$0xff]  }
 0x1de   : > { %2753 = vmatprep.mubr.bf16.mxu0 %v6440_v48  ;;  %v5737_v48 = vld [vmem:[#allocation8 + $0x1e8] sm:$0xff]  }
 0x1e2   : > { %2104 = vmatmul.mubr.bf16.gmra.mxu1 %v5726_v8 }
 0x1e3   : > { %5379 = vmatprep.mubr.bf16.mxu1 %v5727_v22  ;;  %v5776_v22 = vld [vmem:[#allocation2 + $0x80] ss:$12 sps:$4 sm:$0xff]  }
 0x1e5   : > { %2754 = vmatmul.mubr.bf16.gmra.mxu0 %v6470_v32  ;;  %v5739_v32 = vld [vmem:[#allocation8 + $0x1a8] sm:$0xff]  }
 0x1e6   : > { %2761 = vmatprep.mubr.bf16.mxu0 %v6472_v35  ;;  %v5742_v35 = vld [vmem:[#allocation8 + $0x1e0] sm:$0xff]  }
 0x1ea   : > { %5380 = vmatmul.mubr.bf16.vlgmr.msra.gmra.mxu1 %v5729_v57  ;;  %v5780_v57 = vld [vmem:[#allocation2 + $0x98] ss:$12 sps:$4 sm:$0xff]  }
 0x1eb   : > { %5108 = vmatpush3.bf16.msra.mxu1 %v5730_v49  ;;  %5383 = vmatprep.mubr.bf16.mxu1 %v5732_v29  ;;  %v5784_v49 = vld [vmem:[#allocation2 + $0x7c] ss:$12 sps:$4 sm:$0xff]  }
 0x1ec   : > { %5109 = vmatprep.subr.bf16.mxu1 %v5733_v42 }
 0x1ed   : > { %2762 = vmatmul.mubr.bf16.gmra.mxu0 %v6477_v52  ;;  %v5744_v52 = vld [vmem:[#allocation8 + $0x1a0] sm:$0xff]  }
 0x1ee   : > { %2769 = vmatprep.mubr.bf16.mxu0 %v6479_v37  ;;  %v5738_v37 = vld [vmem:[#allocation2 + $0x80] ss:$12 sps:$4 sm:$0xff]  }
 0x1ef   : > { %5110 = vmatpush3.bf16.msra.mxu1 %v5735_v51 }
 0x1f0   : > { %5111 = vmatprep.subr.bf16.mxu1 %v5737_v48 }
 0x1f2   : > { %5384 = vmatmul.mubr.bf16.gmra.mxu1 %v5734_v61 }
 0x1f3   : > { %5387 = vmatprep.mubr.bf16.mxu1 %v5736_v20  ;;  %5112 = vmatpush3.bf16.msra.mxu1 %v5739_v32 }
 0x1f4   : > { %5113 = vmatprep.subr.bf16.mxu1 %v5742_v35 }
 0x1f5   : > { %2770 = vmatmul.mubr.bf16.gmra.mxu0 %v6491_v56  ;;  %v5766_v56 = vld [vmem:[#allocation2 + $0x30] ss:$12 sps:$4 sm:$0xff]  }
 0x1f6   : > { %2777 = vmatprep.mubr.bf16.mxu0 %v6493_v3  ;;  %v5774_v3 = vld [vmem:[#allocation2 + $0x4c] ss:$12 sps:$4 sm:$0xff]  }
 0x1f7   : > { %5114 = vmatpush3.bf16.msra.mxu1 %v5744_v52 }
 0x1f8   : > { %5115 = vmatprep.subr.bf16.mxu1 %v5746_v10  ;;  %v5782_v10 = vld [vmem:[#allocation2 + $0x78] ss:$12 sps:$4 sm:$0xff]  }
 0x1fa   : > { %5388 = vmatmul.mubr.bf16.gmra.mxu1 %v5738_v37 }
 0x1fb   : > { %5391 = vmatprep.mubr.bf16.mxu1 %v5741_v59  ;;  %5116 = vmatpush3.bf16.msra.mxu1 %v5748_v58  ;;  %v5781_v58 = vld [vmem:[#allocation2 + $0xb0] ss:$12 sps:$4 sm:$0xff]  }
 0x1fc   : > { %5117 = vmatprep.subr.bf16.mxu1 %v5751_v63  ;;  %v5789_v63 = vld [vmem:[#allocation2 + $0x94] ss:$12 sps:$4 sm:$0xff]  }
 0x1fd   : > { %2778 = vmatmul.mubr.bf16.gmra.mxu0 %v6497_v7  ;;  %v5769_v7 = vld [vmem:[#allocation2 + $0x38] ss:$12 sps:$4 sm:$0xff]  }
 0x1fe   : > { %2785 = vmatprep.mubr.bf16.mxu0 %v6501_v11 }
 0x1ff   : > { %5118 = vmatpush3.bf16.msra.mxu1 %v5753_v2  ;;  %v5785_v2 = vld [vmem:[#allocation2 + $0xc8] ss:$12 sps:$4 sm:$0xff]  }
 0x200   : > { %5119 = vmatprep.subr.bf16.mxu1 %v5756_v4 }
 0x202   : > { %5392 = vmatmul.mubr.bf16.gmra.mxu1 %v5743_v60 }
 0x203   : > { %5395 = vmatprep.mubr.bf16.mxu1 %v5745_v6  ;;  %5120 = vmatpush3.bf16.msra.mxu1 %v5758_v40 }
 0x204   : > { %5121 = vmatprep.subr.bf16.mxu1 %v5762_v19 }
 0x205   : > { %2786 = vmatmul.mubr.bf16.gmra.mxu0 %v6506_v26 }
 0x206   : > { %2793 = vmatprep.mubr.bf16.mxu0 %v6508_v28 }
 0x207   : > { %5122 = vmatpush3.bf16.msra.mxu1 %v5764_v5 }
 0x20a   : > { %5396 = vmatmul.mubr.bf16.gmra.mxu1 %v5747_v1 }
 0x20b   : > { %5399 = vmatprep.mubr.bf16.mxu1 %v5750_v12 }
 0x20d   : > { %2794 = vmatmul.mubr.bf16.gmra.mxu0 %v6513_v33 }
 0x20e   : > { %2801 = vmatprep.mubr.bf16.mxu0 %v6515_v34 }
 0x212   : > { %5400 = vmatmul.mubr.bf16.gmra.mxu1 %v5752_v13 }
 0x213   : > { %5403 = vmatprep.mubr.bf16.mxu1 %v5754_v9 }
 0x215   : > { %2802 = vmatmul.mubr.bf16.gmra.mxu0 %v6519_v50 }
 0x216   : > { %2809 = vmatprep.mubr.bf16.mxu0 %v6521_v39 }
 0x21a   : > { %5404 = vmatmul.mubr.bf16.gmra.mxu1 %v5757_v14  ;;  %v5787_v14 = vld [vmem:[#allocation2 + $0x90] ss:$12 sps:$4 sm:$0xff]  }
 0x21b   : > { %5407 = vmatprep.mubr.bf16.mxu1 %v5760_v15 }
 0x21d   : > { %2810 = vmatmul.mubr.bf16.gmra.mxu0 %v6527_v44 }
 0x21e   : > { %2817 = vmatprep.mubr.bf16.mxu0 %v6529_v45 }
 0x222   : > { %5408 = vmatmul.mubr.bf16.gmra.mxu1 %v5763_v17  ;;  %v5786_v17 = vld [vmem:[#allocation2 + $0xe0] ss:$12 sps:$4 sm:$0xff]  }
 0x223   : > { %3541 = vmatprep.mubr.bf16.mxu1 %v5768_v55 }
 0x225   : > { %2818 = vmatmul.mubr.bf16.gmra.mxu0 %v6535_v31 }
 0x226   : > { %2825 = vmatprep.mubr.bf16.mxu0 %v6537_v54  ;;  %v4851_v18 = vpop.f32.mrf.mxu1  ;;  %v5777_v54 = vld [vmem:[#allocation2 + $0x60] ss:$12 sps:$4 sm:$0xff]  }
 0x228   : > { %v4852_v23 = vpop.f32.mrf.mxu1 }
 0x229   : > { %v5333_v21 = vpop.f32.mrf.mxu0  ;;  %v4853_v25 = vadd.f32 %v4852_v23, %v4851_v18 }
 0x22a   : > { %3542 = vmatmul.mubr.bf16.vlgmr.msra.gmra.mxu1 %v5766_v56  ;;  %v4854_v28 = vpop.f32.mrf.mxu1  ;;  %v5794_v56 = vld [vmem:[#allocation2 + $0xac] ss:$12 sps:$4 sm:$0xff]  }
 0x22b   : > { %3549 = vmatprep.mubr.bf16.mxu1 %v5774_v3  ;;  %v2146_v27 = vpop.f32.mrf.mxu0  ;;  %v5790_v3 = vld [vmem:[#allocation2 + $0xf8] ss:$12 sps:$4 sm:$0xff]  }
 0x22c   : > { %v6567_v30 = vadd.f32 %v4853_v25, %v2146_v27  ;;  %v4855_v34 = vpop.f32.mrf.mxu1 }
 0x22d   : > { %2826 = vmatmul.mubr.bf16.gmra.mxu0 %v6543_v16  ;;  %v5334_v33 = vpop.f32.mrf.mxu0  ;;  %v4856_v36 = vadd.f32 %v4855_v34, %v4854_v28 }
 0x22e   : > { %5427 = vmatprep.mubr.bf16.mxu0 %v5769_v7 }
 0x22f   : > { %v2149_v50 = vpop.f32.mrf.mxu0 }
 0x230   : > { %v4857_v39 = vpop.f32.mrf.mxu1  ;;  %v6569_v41 = vadd.f32 %v4856_v36, %v2149_v50  ;;  %v5799_v50 = vld [vmem:[#allocation2 + $0xc4] ss:$12 sps:$4 sm:$0xff]  }
 0x232   : > { %3550 = vmatmul.mubr.bf16.gmra.mxu1 %v5772_v53  ;;  %v4858_v43 = vpop.f32.mrf.mxu1 }
 0x233   : > { %3557 = vmatprep.mubr.bf16.mxu1 %v5779_v38  ;;  %v4859_v44 = vadd.f32 %v4858_v43, %v4857_v39  ;;  %v5791_v38 = vld [vmem:[#allocation2 + $0x110] ss:$12 sps:$4 sm:$0xff]   ;;  %v5795_v39 = vld [vmem:[#allocation2 + $0x128] ss:$12 sps:$4 sm:$0xff]  }
 0x234   : > { %v4860_v46 = vpop.f32.mrf.mxu1 }
 0x235   : > { %5428 = vmatmul.mubr.bf16.vlgmr.msra.gmra.mxu0 %v5771_v0  ;;  %v5337_v45 = vpop.f32.mrf.mxu0  ;;  %v6571_v31 = vadd.f32 %v5333_v21, %v4859_v44  ;;  %v5792_v0 = vld [vmem:[#allocation2 + $0xa8] ss:$12 sps:$4 sm:$0xff]  }
 0x236   : > { %5431 = vmatprep.mubr.bf16.mxu0 %v5775_v62  ;;  %v4861_v47 = vpop.f32.mrf.mxu1 }
 0x237   : > { %v2162_v16 = vpop.f32.mrf.mxu0  ;;  %v4862_v8 = vadd.f32 %v4861_v47, %v4860_v46 }
 0x239   : > { %v5338_v42 = vpop.f32.mrf.mxu0  ;;  %v4863_v29 = vpop.f32.mrf.mxu1  ;;  %v6573_v51 = vadd.f32 %v5334_v33, %v4862_v8 }
 0x23a   : > { %3558 = vmatmul.mubr.bf16.gmra.mxu1 %v5777_v54 }
 0x23b   : > { %3565 = vmatprep.mubr.bf16.mxu1 %v5784_v49  ;;  %v2165_v48 = vpop.f32.mrf.mxu0  ;;  %v4864_v61 = vpop.f32.mrf.mxu1 }
 0x23c   : > { %v4865_v32 = vadd.f32 %v4864_v61, %v4863_v29  ;;  %v5796_v29 = vld [vmem:[#allocation2 + $0x140] ss:$12 sps:$4 sm:$0xff]   ;;  %v5804_v61 = vld [vmem:[#allocation2 + $0xdc] ss:$12 sps:$4 sm:$0xff]  }
 0x23d   : > { %5432 = vmatmul.mubr.bf16.gmra.mxu0 %v5776_v22  ;;  %v4866_v20 = vpop.f32.mrf.mxu1 }
 0x23e   : > { %5435 = vmatprep.mubr.bf16.mxu0 %v5780_v57  ;;  %v6575_v35 = vadd.f32 %v4865_v32, %v2162_v16  ;;  %v5797_v57 = vld [vmem:[#allocation2 + $0xc0] ss:$12 sps:$4 sm:$0xff]   ;;  %v5800_v32 = vld [vmem:[#allocation2 + $0x158] ss:$12 sps:$4 sm:$0xff]  }
 0x23f   : > { %v4867_v37 = vpop.f32.mrf.mxu1 }
 0x240   : > { %v5341_v52 = vpop.f32.mrf.mxu0  ;;  %v4868_v59 = vadd.f32 %v4867_v37, %v4866_v20 }
 0x242   : > { %v2178_v4 = vpop.f32.mrf.mxu0  ;;  %v4869_v60 = vpop.f32.mrf.mxu1  ;;  %3566 = vmatmul.mubr.bf16.gmra.mxu1 %v5782_v10  ;;  %v6577_v40 = vadd.f32 %v4868_v59, %v2165_v48 }
 0x243   : > { %3573 = vmatprep.mubr.bf16.mxu1 %v5789_v63 }
 0x244   : > { %v5342_v6 = vpop.f32.mrf.mxu0  ;;  %v4870_v19 = vpop.f32.mrf.mxu1 }
 0x245   : > { %5436 = vmatmul.mubr.bf16.gmra.mxu0 %v5781_v58  ;;  %v4871_v5 = vadd.f32 %v4870_v19, %v4869_v60  ;;  %v5802_v19 = vld [vmem:[#allocation2 + $0xd8] ss:$12 sps:$4 sm:$0xff]  }
 0x246   : > { %5439 = vmatprep.mubr.bf16.mxu0 %v5785_v2  ;;  %v2181_v1 = vpop.f32.mrf.mxu0  ;;  %v4872_v12 = vpop.f32.mrf.mxu1 }
 0x247   : > { %v6579_v13 = vadd.f32 %v5337_v45, %v4871_v5 }
 0x248   : > { %v6581_v9 = vpop.f32.mrf.mxu0  ;;  %v4873_v15 = vpop.f32.mrf.mxu1 }
 0x249   : > { %v4874_v55 = vadd.f32 %v4873_v15, %v4872_v12 }
 0x24a   : > { %v2194_v7 = vpop.f32.mrf.mxu0  ;;  %v4875_v18 = vpop.f32.mrf.mxu1  ;;  %3574 = vmatmul.mubr.bf16.gmra.mxu1 %v5787_v14  ;;  %v5805_v14 = vld [vmem:[#allocation2 + $0x188] ss:$12 sps:$4 sm:$0xff]  }
 0x24b   : > { %v6583_v21 = vadd.f32 %v5338_v42, %v4874_v55  ;;  %3581 = vmatprep.mubr.bf16.mxu1 %v5794_v56 }
 0x24c   : > { %v6585_v23 = vpop.f32.mrf.mxu0  ;;  %v4876_v25 = vpop.f32.mrf.mxu1 }
 0x24d   : > { %5440 = vmatmul.mubr.bf16.gmra.mxu0 %v5786_v17  ;;  %v4877_v27 = vadd.f32 %v4876_v25, %v4875_v18 }
 0x24e   : > { %5443 = vmatprep.mubr.bf16.mxu0 %v5790_v3  ;;  %v2197_v28 = vpop.f32.mrf.mxu0  ;;  %v4878_v53 = vpop.f32.mrf.mxu1 }
 0x24f   : > { %v6587_v33 = vadd.f32 %v4877_v27, %v2178_v4  ;;  %v5824_v27 = vld [vmem:[#allocation2 + $0x1a0] ss:$12 sps:$4 sm:$0xff]  }
 0x250   : > { %v6589_v34 = vpop.f32.mrf.mxu0  ;;  %v4879_v36 = vpop.f32.mrf.mxu1 }
 0x251   : > { %v4880_v62 = vadd.f32 %v4879_v36, %v4878_v53  ;;  %v5808_v36 = vld [vmem:[#allocation2 + $0x10c] ss:$12 sps:$4 sm:$0xff]  }
 0x252   : > { %v6591_v43 = vpop.f32.mrf.mxu0  ;;  %v4881_v44 = vpop.f32.mrf.mxu1  ;;  %3582 = vmatmul.mubr.bf16.gmra.mxu1 %v5792_v0 }
 0x253   : > { %v6593_v45 = vadd.f32 %v4880_v62, %v2181_v1  ;;  %3589 = vmatprep.mubr.bf16.mxu1 %v5799_v50  ;;  %v5801_v1 = vld [vmem:[#allocation2 + $0x170] ss:$12 sps:$4 sm:$0xff]  }
 0x254   : > { %v6595_v46 = vpop.f32.mrf.mxu0  ;;  %v4882_v54 = vpop.f32.mrf.mxu1 }
 0x255   : > { %5444 = vmatmul.mubr.bf16.gmra.mxu0 %v5791_v38  ;;  %v4883_v16 = vadd.f32 %v4882_v54, %v4881_v44 }
 0x256   : > { %5447 = vmatprep.mubr.bf16.mxu0 %v5795_v39  ;;  %v6597_v47 = vpop.f32.mrf.mxu0  ;;  %v4884_v22 = vpop.f32.mrf.mxu1 }
 0x257   : > { %v6599_v8 = vadd.f32 %v5341_v52, %v4883_v16  ;;  %v5806_v16 = vld [vmem:[#allocation2 + $0x108] ss:$12 sps:$4 sm:$0xff]  }
 0x258   : > { %v4885_v42 = vpop.f32.mrf.mxu1 }
 0x259   : > { %v4886_v48 = vadd.f32 %v4885_v42, %v4884_v22 }
 0x25a   : > { %v6601_v49 = vpop.f32.mrf.mxu0  ;;  %v4887_v10 = vpop.f32.mrf.mxu1  ;;  %3590 = vmatmul.mubr.bf16.gmra.mxu1 %v5797_v57 }
 0x25b   : > { %v6605_v37 = vadd.f32 %v5342_v6, %v4886_v48  ;;  %3597 = vmatprep.mubr.bf16.mxu1 %v5804_v61 }
 0x25c   : > { %v6603_v20 = vpop.f32.mrf.mxu0  ;;  %v4888_v52 = vpop.f32.mrf.mxu1 }
 0x25d   : > { %5448 = vmatmul.mubr.bf16.gmra.mxu0 %v5796_v29  ;;  %v4889_v59 = vadd.f32 %v4888_v52, %v4887_v10  ;;  %v5825_v29 = vld [vmem:[#allocation9 + $0x38] sm:$0xff]  }
 0x25e   : > { %5451 = vmatprep.mubr.bf16.mxu0 %v5800_v32  ;;  %v6607_v58 = vpop.f32.mrf.mxu0  ;;  %v4890_v2 = vpop.f32.mrf.mxu1  ;;  %5459 = vmatprep.subr.bf16.mxu0 %v5825_v29 }
 0x25f   : > { %v6611_v4 = vadd.f32 %v4889_v59, %v2194_v7  ;;  %5460 = vmatpush3.bf16.msra.mxu0 %v5825_v29  ;;  %v5826_v59 = vld [vmem:[#allocation9 + $0x30] sm:$0xff]   ;;  %v5829_v29 = vld [vmem:[#allocation9 + $0x18] sm:$0xff]  }
 0x260   : > { %v6609_v63 = vpop.f32.mrf.mxu0  ;;  %v4891_v5 = vpop.f32.mrf.mxu1  ;;  %5461 = vmatprep.subr.bf16.mxu0 %v5826_v59 }
 0x261   : > { %v4892_v12 = vadd.f32 %v4891_v5, %v4890_v2  ;;  %v5809_v5 = vld [vmem:[#allocation2 + $0x120] ss:$12 sps:$4 sm:$0xff]  }
 0x262   : > { %v6613_v60 = vpop.f32.mrf.mxu0  ;;  %v4893_v15 = vpop.f32.mrf.mxu1  ;;  %3598 = vmatmul.mubr.bf16.gmra.mxu1 %v5802_v19 }
 0x263   : > { %v6617_v17 = vadd.f32 %v4892_v12, %v2197_v28  ;;  %3605 = vmatprep.mubr.bf16.mxu1 %v6501_v11  ;;  %5462 = vmatpush3.bf16.msra.mxu0 %v5826_v59 }
 0x264   : > { %v6615_v6 = vpop.f32.mrf.mxu0  ;;  %v4894_v56 = vpop.f32.mrf.mxu1 }
 0x265   : > { %5452 = vmatmul.mubr.bf16.gmra.mxu0 %v5801_v1  ;;  %v4895_v3 = vadd.f32 %v4894_v56, %v4893_v15  ;;  %v5814_v56 = vld [vmem:[#allocation2 + $0x13c] ss:$12 sps:$4 sm:$0xff]  }
 0x266   : > { %5455 = vmatprep.mubr.bf16.mxu0 %v5805_v14  ;;  %v6620_v55 = vpop.f32.mrf.mxu0  ;;  %v4896_v7 = vpop.f32.mrf.mxu1 }
 0x267   : > { %v6625_v25 = vadd.f32 %v6581_v9, %v4895_v3 }
 0x268   : > { %v6622_v18 = vpop.f32.mrf.mxu0  ;;  %v4897_v53 = vpop.f32.mrf.mxu1 }
 0x269   : > { %v4898_v0 = vadd.f32 %v4897_v53, %v4896_v7 }
 0x26a   : > { %v4899_v38 = vpop.f32.mrf.mxu1  ;;  %3606 = vmatmul.mubr.bf16.gmra.mxu1 %v6506_v26 }
 0x26b   : > { %v6631_v11 = vadd.f32 %v6585_v23, %v4898_v0  ;;  %3613 = vmatprep.mubr.bf16.mxu1 %v5808_v36  ;;  %v5811_v23 = vld [vmem:[#allocation2 + $0x124] ss:$12 sps:$4 sm:$0xff]   ;;  %v5827_v36 = vld [vmem:[#allocation9 + $0x28] sm:$0xff]  }
 0x26c   : > { %v4900_v62 = vpop.f32.mrf.mxu1  ;;  %5463 = vmatprep.subr.bf16.mxu0 %v5827_v36 }
 0x26d   : > { %v6628_v28 = vpop.f32.mrf.mxu0  ;;  %5456 = vmatmul.mubr.bf16.gmra.mxu0 %v5824_v27  ;;  %v4901_v39 = vadd.f32 %v4900_v62, %v4899_v38 }
 0x26e   : > { %v4902_v9 = vpop.f32.mrf.mxu1  ;;  %5464 = vmatpush3.bf16.msra.mxu0 %v5827_v36  ;;  %v5820_v36 = vld [vmem:[#allocation2 + $0x16c] ss:$12 sps:$4 sm:$0xff]  }
 0x26f   : > { %v6633_v50 = vpop.f32.mrf.mxu0  ;;  %v6638_v54 = vadd.f32 %v4901_v39, %v6591_v43 }
 0x270   : > { %v4903_v22 = vpop.f32.mrf.mxu1 }
 0x271   : > { %v6635_v44 = vpop.f32.mrf.mxu0  ;;  %v6642_v57 = vadd.f32 %v4903_v22, %v4902_v9  ;;  %v5812_v22 = vld [vmem:[#allocation2 + $0x138] ss:$12 sps:$4 sm:$0xff]  }
 0x272   : > { %v4905_v42 = vpop.f32.mrf.mxu1  ;;  %3614 = vmatmul.mubr.bf16.gmra.mxu1 %v5806_v16 }
 0x273   : > { %v6640_v26 = vpop.f32.mrf.mxu0  ;;  %3621 = vmatprep.mubr.bf16.mxu1 %v5811_v23 }
 0x274   : > { %v4906_v61 = vpop.f32.mrf.mxu1 }
 0x275   : > { %v4987_v48 = vpop.f32.mrf.mxu0  ;;  %v4907_v10 = vadd.f32 %v4906_v61, %v4905_v42  ;;  %v5828_v42 = vld [vmem:[#allocation9 + $0x20] sm:$0xff]  }
 0x276   : > { %v4908_v43 = vpop.f32.mrf.mxu1  ;;  %v5817_v61 = vld [vmem:[#allocation2 + $0x154] ss:$12 sps:$4 sm:$0xff]   ;;  %5465 = vmatprep.subr.bf16.mxu0 %v5828_v42 }
 0x277   : > { %v4988_v32 = vpop.f32.mrf.mxu0  ;;  %v6645_v19 = vadd.f32 %v6589_v34, %v4907_v10  ;;  %5466 = vmatpush3.bf16.msra.mxu0 %v5828_v42 }
 0x278   : > { %v4989_v52 = vadd.f32 %v4988_v32, %v4987_v48  ;;  %v4909_v1 = vpop.f32.mrf.mxu1  ;;  %5467 = vmatprep.subr.bf16.mxu0 %v5829_v29 }
 0x279   : > { %v4990_v2 = vpop.f32.mrf.mxu0  ;;  %v4910_v15 = vadd.f32 %v4909_v1, %v4908_v43 }
 0x27a   : > { %v6648_v12 = vadd.f32 %v4989_v52, %v6567_v30  ;;  %v4911_v7 = vpop.f32.mrf.mxu1  ;;  %3622 = vmatmul.mubr.bf16.gmra.mxu1 %v5809_v5 }
 0x27b   : > { %v4991_v14 = vpop.f32.mrf.mxu0  ;;  %v6651_v53 = vadd.f32 %v6595_v46, %v4910_v15  ;;  %3629 = vmatprep.mubr.bf16.mxu1 %v5814_v56  ;;  %5468 = vmatpush3.bf16.msra.mxu0 %v5829_v29  ;;  %v5815_v56 = vld [vmem:[#allocation2 + $0x150] ss:$12 sps:$4 sm:$0xff]  }
 0x27c   : > { %v4992_v3 = vadd.f32 %v4991_v14, %v4990_v2  ;;  %v4912_v34 = vpop.f32.mrf.mxu1 }
 0x27d   : > { %v4993_v27 = vpop.f32.mrf.mxu0  ;;  %v4913_v38 = vadd.f32 %v4912_v34, %v4911_v7 }
 0x27e   : > { %v6654_v0 = vadd.f32 %v4992_v3, %v6569_v41  ;;  %v4914_v39 = vpop.f32.mrf.mxu1 }
 0x27f   : > { %v4994_v30 = vpop.f32.mrf.mxu0  ;;  %v6657_v16 = vadd.f32 %v4913_v38, %v6603_v20 }
 0x280   : > { %v4995_v62 = vadd.f32 %v4994_v30, %v4993_v27  ;;  %v4915_v23 = vpop.f32.mrf.mxu1  ;;  %v5831_v27 = vld [vmem:[#allocation9 + $0x8] sm:$0xff]  }
 0x281   : > { %v4996_v9 = vpop.f32.mrf.mxu0  ;;  %v6662_v48 = vadd.f32 %v4915_v23, %v4914_v39 }
 0x282   : > { %v6660_v46 = vadd.f32 %v4995_v62, %v6571_v31  ;;  %v4917_v10 = vpop.f32.mrf.mxu1  ;;  %3630 = vmatmul.mubr.bf16.gmra.mxu1 %v5812_v22  ;;  %v5830_v31 = vld [vmem:[#allocation9 + $0x10] sm:$0xff]  }
 0x283   : > { %v4997_v41 = vpop.f32.mrf.mxu0  ;;  %3637 = vmatprep.mubr.bf16.mxu1 %v5817_v61  ;;  %5469 = vmatprep.subr.bf16.mxu0 %v5830_v31 }
 0x284   : > { %v4998_v32 = vadd.f32 %v4997_v41, %v4996_v9  ;;  %v4918_v20 = vpop.f32.mrf.mxu1  ;;  %5470 = vmatpush3.bf16.msra.mxu0 %v5830_v31 }
 0x285   : > { %v4999_v52 = vpop.f32.mrf.mxu0  ;;  %v4919_v2 = vadd.f32 %v4918_v20, %v4917_v10  ;;  %5471 = vmatprep.subr.bf16.mxu0 %v5831_v27  ;;  %v5823_v20 = vld [vmem:[#allocation2 + $0x184] ss:$12 sps:$4 sm:$0xff]  }
 0x286   : > { %v6665_v43 = vadd.f32 %v4998_v32, %v6573_v51  ;;  %v4920_v1 = vpop.f32.mrf.mxu1  ;;  %v5818_v32 = vld [vmem:[#allocation2 + $0x168] ss:$12 sps:$4 sm:$0xff]  }
 0x287   : > { %v5000_v59 = vpop.f32.mrf.mxu0  ;;  %v6668_v15 = vadd.f32 %v6601_v49, %v4919_v2 }
 0x288   : > { %v5001_v5 = vadd.f32 %v5000_v59, %v4999_v52  ;;  %v4921_v3 = vpop.f32.mrf.mxu1  ;;  %5472 = vmatpush3.bf16.msra.mxu0 %v5831_v27 }
 0x289   : > { %v5002_v14 = vpop.f32.mrf.mxu0  ;;  %v4922_v34 = vadd.f32 %v4921_v3, %v4920_v1 }
 0x28a   : > { %v6671_v7 = vadd.f32 %v5001_v5, %v6575_v35  ;;  %v4923_v38 = vpop.f32.mrf.mxu1  ;;  %3638 = vmatmul.mubr.bf16.gmra.mxu1 %v5815_v56  ;;  %v5832_v35 = vld [vmem:[#allocation9] sm:$0xff]  }
 0x28b   : > { %v5003_v51 = vpop.f32.mrf.mxu0  ;;  %v6674_v39 = vadd.f32 %v6607_v58, %v4922_v34  ;;  %3645 = vmatprep.mubr.bf16.mxu1 %v5820_v36  ;;  %5473 = vmatprep.subr.bf16.mxu0 %v5832_v35 }
 0x28c   : > { %v5004_v30 = vadd.f32 %v5003_v51, %v5002_v14  ;;  %v4924_v49 = vpop.f32.mrf.mxu1  ;;  %5474 = vmatpush3.bf16.msra.mxu0 %v5832_v35  ;;  %v5821_v51 = vld [vmem:[#allocation2 + $0x180] ss:$12 sps:$4 sm:$0xff]  }
 0x28d   : > { %v5005_v62 = vpop.f32.mrf.mxu0  ;;  %v4925_v23 = vadd.f32 %v4924_v49, %v4923_v38 }
 0x28e   : > { %v6677_v9 = vadd.f32 %v5004_v30, %v6577_v40  ;;  %v4926_v29 = vpop.f32.mrf.mxu1 }
 0x28f   : > { %v5006_v22 = vpop.f32.mrf.mxu0  ;;  %v6680_v61 = vadd.f32 %v4925_v23, %v6615_v6 }
 0x290   : > { %v5007_v42 = vadd.f32 %v5006_v22, %v5005_v62  ;;  %v4927_v58 = vpop.f32.mrf.mxu1 }
 0x291   : > { %v5008_v41 = vpop.f32.mrf.mxu0  ;;  %v6685_v40 = vadd.f32 %v4927_v58, %v4926_v29 }
 0x292   : > { %v6683_v10 = vadd.f32 %v5007_v42, %v6579_v13  ;;  %v4929_v59 = vpop.f32.mrf.mxu1  ;;  %3646 = vmatmul.mubr.bf16.gmra.mxu1 %v5818_v32 }
 0x293   : > { %v5009_v52 = vpop.f32.mrf.mxu0  ;;  %3653 = vmatprep.mubr.bf16.mxu1 %v5823_v20 }
 0x294   : > { %v5010_v31 = vadd.f32 %v5009_v52, %v5008_v41  ;;  %v4930_v5 = vpop.f32.mrf.mxu1  ;;  %v5838_v41 = vld [vmem:[#allocation2] sm:$0xff] }
 0x295   : > { %v5011_v2 = vpop.f32.mrf.mxu0  ;;  %v4931_v14 = vadd.f32 %v4930_v5, %v4929_v59  ;;  %v4735_v32 = vcombine.low %v5838_v41, %v5838_v41 }
 0x296   : > { %v6688_v6 = vadd.f32 %v5010_v31, %v6583_v21  ;;  %v4932_v13 = vpop.f32.mrf.mxu1 }
 0x297   : > { %v5012_v1 = vpop.f32.mrf.mxu0  ;;  %v6691_v27 = vadd.f32 %v6613_v60, %v4931_v14 }
 0x298   : > { %v5013_v56 = vadd.f32 %v5012_v1, %v5011_v2  ;;  %v4933_v34 = vpop.f32.mrf.mxu1 }
 0x299   : > { %v5014_v3 = vpop.f32.mrf.mxu0  ;;  %v4934_v38 = vadd.f32 %v4933_v34, %v4932_v13 }
 0x29a   : > { %v6694_v36 = vadd.f32 %v5013_v56, %v6587_v33  ;;  %v4935_v49 = vpop.f32.mrf.mxu1  ;;  %3654 = vmatmul.mubr.bf16.gmra.mxu1 %v5821_v51 }
 0x29b   : > { %v5015_v30 = vpop.f32.mrf.mxu0  ;;  %v6697_v35 = vadd.f32 %v6620_v55, %v4934_v38  ;;  %3661 = vmatprep.mubr.bf16.mxu1 %v6499_v24 }
 0x29c   : > { %v5016_v62 = vadd.f32 %v5015_v30, %v5014_v3  ;;  %v4936_v22 = vpop.f32.mrf.mxu1 }
 0x29d   : > { %v5017_v21 = vpop.f32.mrf.mxu0  ;;  %v4937_v42 = vadd.f32 %v4936_v22, %v4935_v49 }
 0x29e   : > { %v6701_v60 = vadd.f32 %v5016_v62, %v6593_v45  ;;  %v4938_v33 = vpop.f32.mrf.mxu1 }
 0x29f   : > { %v5018_v23 = vpop.f32.mrf.mxu0  ;;  %v6704_v52 = vadd.f32 %v4937_v42, %v6633_v50 }
 0x2a0   : > { %v5019_v29 = vadd.f32 %v5018_v23, %v5017_v21  ;;  %v4939_v20 = vpop.f32.mrf.mxu1 }
 0x2a1   : > { %v5020_v58 = vpop.f32.mrf.mxu0  ;;  %v6707_v59 = vadd.f32 %v4939_v20, %v4938_v33 }
 0x2a2   : > { %v2748_v55 = vadd.f32 %v5019_v29, %v6599_v8  ;;  %v4941_v2 = vpop.f32.mrf.mxu1  ;;  %3662 = vmatmul.mubr.bf16.gmra.mxu1 %v4735_v32 }
 0x2a3   : > { %v5021_v31 = vpop.f32.mrf.mxu0 }
 0x2a4   : > { %v5022_v24 = vadd.f32 %v5021_v31, %v5020_v58  ;;  %v4942_v5 = vpop.f32.mrf.mxu1 }
 0x2a5   : > { %v5023_v45 = vpop.f32.mrf.mxu0  ;;  %v4943_v56 = vadd.f32 %v4942_v5, %v4941_v2 }
 0x2a6   : > { %v2751_v1 = vadd.f32 %v5022_v24, %v6605_v37  ;;  %v4944_v3 = vpop.f32.mrf.mxu1 }
 0x2a7   : > { %v5024_v14 = vpop.f32.mrf.mxu0  ;;  %v6711_v50 = vadd.f32 %v6628_v28, %v4943_v56 }
 0x2a8   : > { %v5025_v13 = vadd.f32 %v5024_v14, %v5023_v45  ;;  %v4945_v34 = vpop.f32.mrf.mxu1 }
 0x2a9   : > { %v5026_v51 = vpop.f32.mrf.mxu0  ;;  %v4946_v38 = vadd.f32 %v4945_v34, %v4944_v3 }
 0x2aa   : > { %v2756_v8 = vadd.f32 %v5025_v13, %v6611_v4  ;;  %v5381_v49 = vpop.f32.mrf.mxu1 }
 0x2ab   : > { %v5027_v30 = vpop.f32.mrf.mxu0  ;;  %v6715_v22 = vadd.f32 %v6635_v44, %v4946_v38  ;;  %v6718_v37 = vadd.f32 %v5381_v49, %v6660_v46 }
 0x2ac   : > { %v5028_v62 = vadd.f32 %v5027_v30, %v5026_v51  ;;  %v2868_v23 = vpop.f32.mrf.mxu1 }
 0x2ad   : > { %v5029_v21 = vpop.f32.mrf.mxu0  ;;  %v6722_v28 = vadd.f32 %v2868_v23, %v6648_v12 }
 0x2ae   : > { %v2759_v42 = vadd.f32 %v5028_v62, %v6617_v17  ;;  %v5382_v4 = vpop.f32.mrf.mxu1 }
 0x2af   : > { %v5030_v29 = vpop.f32.mrf.mxu0  ;;  %v6725_v32 = vadd.f32 %v5382_v4, %v6665_v43 }
 0x2b0   : > { %v5031_v33 = vadd.f32 %v5030_v29, %v5029_v21  ;;  %v2871_v58 = vpop.f32.mrf.mxu1 }
 0x2b1   : > { %v5032_v41 = vpop.f32.mrf.mxu0  ;;  %v6729_v46 = vadd.f32 %v2871_v58, %v6654_v0 }
 0x2b2   : > { %v2764_v44 = vadd.f32 %v5031_v33, %v6625_v25  ;;  %v5385_v24 = vpop.f32.mrf.mxu1 }
 0x2b3   : > { %v5033_v20 = vpop.f32.mrf.mxu0  ;;  %v6732_v2 = vadd.f32 %v5385_v24, %v6683_v10 }
 0x2b4   : > { %v5034_v31 = vadd.f32 %v5033_v20, %v5032_v41  ;;  %v2884_v12 = vpop.f32.mrf.mxu1 }
 0x2b5   : > { %v5035_v17 = vpop.f32.mrf.mxu0  ;;  %v6736_v43 = vadd.f32 %v2884_v12, %v6671_v7 }
 0x2b6   : > { %v2767_v45 = vadd.f32 %v5034_v31, %v6631_v11  ;;  %v5386_v56 = vpop.f32.mrf.mxu1  ;;  %v2214_v11 = vadd.f32 %v6642_v57, %v6597_v47 }
 0x2b7   : > { %v5036_v5 = vpop.f32.mrf.mxu0  ;;  %v6739_v13 = vadd.f32 %v5386_v56, %v6688_v6 }
 0x2b8   : > { %v5037_v14 = vadd.f32 %v5036_v5, %v5035_v17  ;;  %v2887_v0 = vpop.f32.mrf.mxu1 }
 0x2b9   : > { %v5038_v25 = vpop.f32.mrf.mxu0  ;;  %v6743_v10 = vadd.f32 %v2887_v0, %v6677_v9 }
 0x2ba   : > { %v2772_v3 = vadd.f32 %v5037_v14, %v6638_v54  ;;  %v5389_v30 = vpop.f32.mrf.mxu1 }
 0x2bb   : > { %v5039_v51 = vpop.f32.mrf.mxu0  ;;  %v6747_v38 = vadd.f32 %v5389_v30, %v2748_v55 }
 0x2bc   : > { %v5040_v34 = vadd.f32 %v5039_v51, %v5038_v25  ;;  %v2900_v62 = vpop.f32.mrf.mxu1 }
 0x2bd   : > { %v5041_v7 = vpop.f32.mrf.mxu0  ;;  %v6750_v6 = vadd.f32 %v2900_v62, %v6694_v36 }
 0x2be   : > { %v2775_v49 = vadd.f32 %v5040_v34, %v2214_v11  ;;  %v5390_v54 = vpop.f32.mrf.mxu1 }
 0x2bf   : > { %v5042_v21 = vpop.f32.mrf.mxu0  ;;  %v6752_v33 = vadd.f32 %v5390_v54, %v2751_v1 }
 0x2c0   : > { %v5043_v23 = vadd.f32 %v5042_v21, %v5041_v7  ;;  %v2903_v9 = vpop.f32.mrf.mxu1 }
 0x2c1   : > { %v5044_v29 = vpop.f32.mrf.mxu0  ;;  %v6756_v57 = vadd.f32 %v2903_v9, %v6701_v60 }
 0x2c2   : > { %v2780_v4 = vadd.f32 %v5043_v23, %v6645_v19  ;;  %v5393_v41 = vpop.f32.mrf.mxu1 }
 0x2c3   : > { %v5045_v47 = vpop.f32.mrf.mxu0  ;;  %v6758_v20 = vadd.f32 %v5393_v41, %v2764_v44  ;;  %v2230_v44 = vadd.f32 %v6662_v48, %v6609_v63 }
 0x2c4   : > { %v5046_v55 = vadd.f32 %v5045_v47, %v5044_v29  ;;  %v2916_v31 = vpop.f32.mrf.mxu1 }
 0x2c5   : > { %v5047_v58 = vpop.f32.mrf.mxu0  ;;  %v6761_v17 = vadd.f32 %v2916_v31, %v2756_v8 }
 0x2c6   : > { %v2783_v36 = vadd.f32 %v5046_v55, %v6651_v53  ;;  %v5394_v12 = vpop.f32.mrf.mxu1 }
 0x2c7   : > { %v5048_v24 = vpop.f32.mrf.mxu0  ;;  %v6763_v14 = vadd.f32 %v5394_v12, %v2767_v45 }
 0x2c8   : > { %v5049_v1 = vadd.f32 %v5048_v24, %v5047_v58  ;;  %v2919_v19 = vpop.f32.mrf.mxu1 }
 0x2c9   : > { %v5050_v5 = vpop.f32.mrf.mxu0  ;;  %v6766_v25 = vadd.f32 %v2919_v19, %v2759_v42 }
 0x2ca   : > { %v2788_v60 = vadd.f32 %v5049_v1, %v6657_v16  ;;  %v5397_v51 = vpop.f32.mrf.mxu1 }
 0x2cb   : > { %v5051_v56 = vpop.f32.mrf.mxu0  ;;  %v6770_v11 = vadd.f32 %v5397_v51, %v2780_v4 }
 0x2cc   : > { %v5052_v0 = vadd.f32 %v5051_v56, %v5050_v5  ;;  %v2932_v8 = vpop.f32.mrf.mxu1  ;;  %v2246_v5 = vadd.f32 %v6685_v40, %v6622_v18 }
 0x2cd   : > { %v5053_v53 = vpop.f32.mrf.mxu0  ;;  %v6772_v7 = vadd.f32 %v2932_v8, %v2772_v3 }
 0x2ce   : > { %v2791_v34 = vadd.f32 %v5052_v0, %v2230_v44  ;;  %v5398_v62 = vpop.f32.mrf.mxu1 }
 0x2cf   : > { %v5054_v30 = vpop.f32.mrf.mxu0  ;;  %v6774_v16 = vadd.f32 %v5398_v62, %v2783_v36 }
 0x2d0   : > { %v5055_v45 = vadd.f32 %v5054_v30, %v5053_v53  ;;  %v2935_v42 = vpop.f32.mrf.mxu1 }
 0x2d1   : > { %v5056_v21 = vpop.f32.mrf.mxu0  ;;  %v6777_v63 = vadd.f32 %v2935_v42, %v2775_v49 }
 0x2d2   : > { %v2796_v23 = vadd.f32 %v5055_v45, %v6668_v15  ;;  %v5401_v29 = vpop.f32.mrf.mxu1 }
 0x2d3   : > { %v5057_v54 = vpop.f32.mrf.mxu0 }
 0x2d4   : > { %v5058_v48 = vadd.f32 %v5057_v54, %v5056_v21  ;;  %v6779_v4 = vadd.f32 %v5401_v29, %v2796_v23  ;;  %v2948_v47 = vpop.f32.mrf.mxu1 }
 0x2d5   : > { %v5059_v9 = vpop.f32.mrf.mxu0  ;;  %v6782_v41 = vadd.f32 %v2948_v47, %v2788_v60 }
 0x2d6   : > { %v2799_v3 = vadd.f32 %v5058_v48, %v6674_v39  ;;  %v5402_v31 = vpop.f32.mrf.mxu1 }
 0x2d7   : > { %v5060_v55 = vpop.f32.mrf.mxu0 }
 0x2d8   : > { %v5061_v58 = vadd.f32 %v5060_v55, %v5059_v9  ;;  %v6784_v24 = vadd.f32 %v5402_v31, %v2799_v3  ;;  %v2951_v15 = vpop.f32.mrf.mxu1  ;;  %v2262_v31 = vadd.f32 %v6707_v59, %v6640_v26 }
 0x2d9   : > { %v5062_v36 = vpop.f32.mrf.mxu0  ;;  %v6787_v12 = vadd.f32 %v2951_v15, %v2791_v34 }
 0x2da   : > { %v2804_v49 = vadd.f32 %v5061_v58, %v6680_v61  ;;  %v5405_v56 = vpop.f32.mrf.mxu1 }
 0x2db   : > { %v5063_v1 = vpop.f32.mrf.mxu0 }
 0x2dc   : > { %v5064_v19 = vadd.f32 %v5063_v1, %v5062_v36  ;;  %v2964_v44 = vpop.f32.mrf.mxu1 }
 0x2dd   : > { %v5065_v39 = vpop.f32.mrf.mxu0  ;;  %v6791_v51 = vadd.f32 %v2964_v44, %v2804_v49 }
 0x2de   : > { %v2807_v60 = vadd.f32 %v5064_v19, %v2246_v5  ;;  %v5406_v8 = vpop.f32.mrf.mxu1 }
 0x2df   : > { %v5066_v0 = vpop.f32.mrf.mxu0 }
 0x2e0   : > { %v5067_v53 = vadd.f32 %v5066_v0, %v5065_v39  ;;  %v2967_v61 = vpop.f32.mrf.mxu1 }
 0x2e1   : > { %v5068_v30 = vpop.f32.mrf.mxu0  ;;  %v6794_v34 = vadd.f32 %v2967_v61, %v2807_v60 }
 0x2e2   : > { %v2812_v45 = vadd.f32 %v5067_v53, %v6691_v27  ;;  %v5409_v18 = vpop.f32.mrf.mxu1 }
 0x2e3   : > { %v5069_v62 = vpop.f32.mrf.mxu0 }
 0x2e4   : > { %v5070_v21 = vadd.f32 %v5069_v62, %v5068_v30  ;;  %v6796_v42 = vadd.f32 %v5405_v56, %v2812_v45  ;;  %v2980_v54 = vpop.f32.mrf.mxu1 }
 0x2e5   : > { %v5071_v40 = vpop.f32.mrf.mxu0 }
 0x2e6   : > { %v2815_v23 = vadd.f32 %v5070_v21, %v6697_v35  ;;  %v5410_v47 = vpop.f32.mrf.mxu1 }
 0x2e7   : > { %v5072_v48 = vpop.f32.mrf.mxu0 }
 0x2e8   : > { %v5073_v29 = vadd.f32 %v5072_v48, %v5071_v40  ;;  %v6799_v9 = vadd.f32 %v5406_v8, %v2815_v23  ;;  %v2983_v55 = vpop.f32.mrf.mxu1 }
 0x2e9   : > { %v5074_v3 = vpop.f32.mrf.mxu0 }
 0x2ea   : > { %v2820_v27 = vadd.f32 %v5073_v29, %v6704_v52  ;;  %v5123_v49 = vpop.f32.mrf.mxu1 }
 0x2eb   : > { %v5075_v58 = vpop.f32.mrf.mxu0 }
 0x2ec   : > { %v5076_v36 = vadd.f32 %v5075_v58, %v5074_v3  ;;  %v6804_v15 = vadd.f32 %v2980_v54, %v2820_v27  ;;  %v5124_v5 = vpop.f32.mrf.mxu1 }
 0x2ed   : > { %v5077_v1 = vpop.f32.mrf.mxu0  ;;  %v5125_v59 = vadd.f32 %v5124_v5, %v5123_v49 }
 0x2ee   : > { %v2823_v35 = vadd.f32 %v5076_v36, %v2262_v31  ;;  %v5126_v44 = vpop.f32.mrf.mxu1 }
 0x2ef   : > { %v5078_v19 = vpop.f32.mrf.mxu0 }
 0x2f0   : > { %v5079_v56 = vadd.f32 %v5078_v19, %v5077_v1  ;;  %v6806_v39 = vadd.f32 %v2983_v55, %v2823_v35  ;;  %v5127_v0 = vpop.f32.mrf.mxu1  ;;  %v6818_v55 = vld [vmem:[%s7042_s4] ss:$0 sm:$0xff] }
 0x2f1   : > { %v5080_v60 = vpop.f32.mrf.mxu0  ;;  %v5128_v48 = vadd.f32 %v5127_v0, %v5126_v44 }
 0x2f2   : > { %v2828_v52 = vadd.f32 %v5079_v56, %v6711_v50  ;;  %v5129_v30 = vpop.f32.mrf.mxu1 }
 0x2f3   : > { %v5081_v53 = vpop.f32.mrf.mxu0 }
 0x2f4   : > { %v6809_v8 = vadd.f32 %v5409_v18, %v2828_v52  ;;  %v5082_v26 = vadd.f32 %v5081_v53, %v5080_v60  ;;  %v5130_v62 = vpop.f32.mrf.mxu1 }
 0x2f5   : > { %v5429_v45 = vpop.f32.mrf.mxu0  ;;  %v5131_v40 = vadd.f32 %v5130_v62, %v5129_v30 }
 0x2f6   : > { %v2831_v61 = vadd.f32 %v5082_v26, %v6715_v22  ;;  %v5132_v29 = vpop.f32.mrf.mxu1 }
 0x2f7   : > { %v3704_v21 = vpop.f32.mrf.mxu0  ;;  %v3713_v50 = vadd.f32 %v5429_v45, %v5131_v40 }
 0x2f8   : > { %v6812_v23 = vadd.f32 %v5410_v47, %v2831_v61  ;;  %v3705_v54 = vadd.f32 %v5125_v59, %v3704_v21  ;;  %v5133_v18 = vpop.f32.mrf.mxu1 }
 0x2f9   : > { %v5430_v3 = vpop.f32.mrf.mxu0  ;;  %v3833_v22 = vadd.f32 %v3713_v50, %v6718_v37  ;;  %v5134_v31 = vadd.f32 %v5133_v18, %v5132_v29 }
 0x2fa   : > { %v3831_v27 = vadd.f32 %v3705_v54, %v6722_v28  ;;  %v5135_v47 = vpop.f32.mrf.mxu1 }
 0x2fb   : > { %v3707_v58 = vpop.f32.mrf.mxu0  ;;  %v3716_v1 = vadd.f32 %v5430_v3, %v5134_v31  ;;  %v3872_v28 = vadd.f32 %v6818_v55, %v3833_v22 }
 0x2fc   : > { %v3708_v36 = vadd.f32 %v5128_v48, %v3707_v58  ;;  %v3870_v35 = vadd.f32 %v6818_v55, %v3831_v27  ;;  %v5136_v19 = vpop.f32.mrf.mxu1 }
 0x2fd   : > { %v5433_v49 = vpop.f32.mrf.mxu0  ;;  %v3834_v44 = vadd.f32 %v3716_v1, %v6725_v32  ;;  %v5137_v60 = vadd.f32 %v5136_v19, %v5135_v47  ;;  %v3904_v61 = vmax.f32 %v3872_v28, 0.0 }
 0x2fe   : > { %v3832_v5 = vadd.f32 %v3708_v36, %v6729_v46  ;;  %v5138_v0 = vpop.f32.mrf.mxu1  ;;  %v3902_v59 = vmax.f32 %v3870_v35, 0.0 }
 0x2ff   : > { %v3720_v56 = vpop.f32.mrf.mxu0  ;;  %v3873_v53 = vadd.f32 %v6818_v55, %v3834_v44 }
 0x300   : > { %v3871_v52 = vadd.f32 %v6818_v55, %v3832_v5  ;;  %v3721_v26 = vadd.f32 %v5137_v60, %v3720_v56  ;;  %v5139_v45 = vpop.f32.mrf.mxu1 }
 0x301   : > { %v5434_v37 = vpop.f32.mrf.mxu0  ;;  %v3905_v62 = vmax.f32 %v3873_v53, 0.0  ;;  %v5140_v21 = vadd.f32 %v5139_v45, %v5138_v0 }
 0x302   : > { %v3903_v30 = vmax.f32 %v3871_v52, 0.0  ;;  %v3835_v46 = vadd.f32 %v3721_v26, %v6736_v43  ;;  %v5141_v48 = vpop.f32.mrf.mxu1 }
 0x303   : > { %v3723_v40 = vpop.f32.mrf.mxu0  ;;  %v3935_v32 = vpack.c.bf16 %v3905_v62, %v3904_v61 }
 0x304   : > { %v3934_v54 = vpack.c.bf16 %v3903_v30, %v3902_v59  ;;  %v3724_v29 = vadd.f32 %v5140_v21, %v3723_v40  ;;  %v5142_v3 = vpop.f32.mrf.mxu1  ;;  %v3874_v18 = vadd.f32 %v6818_v55, %v3835_v46 }
 0x305   : > { %v5143_v27 = vadd.f32 %v5142_v3, %v5141_v48  ;;  %v5437_v58 = vpop.f32.mrf.mxu0 }
 0x306   : > { %5475 = vmatprep.mubr.bf16.mxu0 %v3934_v54  ;;  %v3836_v50 = vadd.f32 %v3724_v29, %v6743_v10  ;;  %v5144_v22 = vpop.f32.mrf.mxu1  ;;  %v3906_v35 = vmax.f32 %v3874_v18, 0.0 }
 0x307   : > { %5476 = vmatmul.mubr.bf16.vlgmr.msra.gmra.mxu0 %v3935_v32  ;;  %v3729_v31 = vadd.f32 %v5433_v49, %v5143_v27  ;;  %v3736_v19 = vpop.f32.mrf.mxu0 }
 0x308   : > { %v3875_v36 = vadd.f32 %v6818_v55, %v3836_v50  ;;  %v5145_v43 = vpop.f32.mrf.mxu1 }
 0x309   : > { %v3837_v47 = vadd.f32 %v3729_v31, %v6732_v2  ;;  %v5146_v1 = vadd.f32 %v5145_v43, %v5144_v22  ;;  %v5438_v49 = vpop.f32.mrf.mxu0 }
 0x30a   : > { %v3907_v5 = vmax.f32 %v3875_v36, 0.0  ;;  %v5147_v28 = vpop.f32.mrf.mxu1 }
 0x30b   : > { %v3732_v56 = vadd.f32 %v5434_v37, %v5146_v1  ;;  %v3876_v60 = vadd.f32 %v6818_v55, %v3837_v47  ;;  %v3739_v37 = vpop.f32.mrf.mxu0 }
 0x30c   : > { %v3936_v44 = vpack.c.bf16 %v3907_v5, %v3906_v35  ;;  %v5148_v10 = vpop.f32.mrf.mxu1 }
 0x30d   : > { %v3838_v52 = vadd.f32 %v3732_v56, %v6739_v13  ;;  %v5149_v0 = vadd.f32 %v5148_v10, %v5147_v28  ;;  %v3908_v30 = vmax.f32 %v3876_v60, 0.0  ;;  %v5441_v29 = vpop.f32.mrf.mxu0 }
 0x30e   : > { %5479 = vmatprep.mubr.bf16.mxu0 %v3936_v44  ;;  %v5150_v53 = vpop.f32.mrf.mxu1 }
 0x30f   : > { %v3877_v26 = vadd.f32 %v6818_v55, %v3838_v52  ;;  %v3737_v59 = vadd.f32 %v5149_v0, %v3736_v19  ;;  %v3752_v43 = vpop.f32.mrf.mxu0 }
 0x310   : > { %v5151_v2 = vpop.f32.mrf.mxu1 }
 0x311   : > { %v3909_v45 = vmax.f32 %v3877_v26, 0.0  ;;  %v3839_v61 = vadd.f32 %v3737_v59, %v6750_v6  ;;  %v5152_v62 = vadd.f32 %v5151_v2, %v5150_v53 }
 0x312   : > { %v5153_v46 = vpop.f32.mrf.mxu1 }
 0x313   : > { %v3740_v21 = vadd.f32 %v5152_v62, %v3739_v37  ;;  %v3937_v40 = vpack.c.bf16 %v3909_v45, %v3908_v30  ;;  %v3878_v32 = vadd.f32 %v6818_v55, %v3839_v61 }
 0x314   : > { %v5154_v54 = vpop.f32.mrf.mxu1 }
 0x315   : > { %v3840_v13 = vadd.f32 %v3740_v21, %v6756_v57  ;;  %v5155_v48 = vadd.f32 %v5154_v54, %v5153_v46  ;;  %5480 = vmatmul.mubr.bf16.gmra.mxu0 %v3937_v40  ;;  %v3910_v31 = vmax.f32 %v3878_v32, 0.0 }
 0x316   : > { %v5156_v3 = vpop.f32.mrf.mxu1 }
 0x317   : > { %v3745_v50 = vadd.f32 %v5437_v58, %v5155_v48  ;;  %v3879_v27 = vadd.f32 %v6818_v55, %v3840_v13  ;;  %v5442_v58 = vpop.f32.mrf.mxu0 }
 0x318   : > { %v5157_v18 = vpop.f32.mrf.mxu1 }
 0x319   : > { %v3841_v6 = vadd.f32 %v3745_v50, %v6747_v38  ;;  %v5158_v22 = vadd.f32 %v5157_v18, %v5156_v3  ;;  %v3911_v36 = vmax.f32 %v3879_v27, 0.0 }
 0x31a   : > { %v5159_v47 = vpop.f32.mrf.mxu1 }
 0x31b   : > { %v3748_v1 = vadd.f32 %v5438_v49, %v5158_v22  ;;  %v3938_v35 = vpack.c.bf16 %v3911_v36, %v3910_v31  ;;  %v3880_v5 = vadd.f32 %v6818_v55, %v3841_v6  ;;  %v3755_v49 = vpop.f32.mrf.mxu0 }
 0x31c   : > { %v5160_v57 = vpop.f32.mrf.mxu1 }
 0x31d   : > { %v3842_v19 = vadd.f32 %v3748_v1, %v6752_v33  ;;  %v5161_v28 = vadd.f32 %v5160_v57, %v5159_v47  ;;  %5483 = vmatprep.mubr.bf16.mxu0 %v3938_v35  ;;  %v3912_v60 = vmax.f32 %v3880_v5, 0.0  ;;  %v5445_v62 = vpop.f32.mrf.mxu0 }
 0x31e   : > { %v5162_v56 = vpop.f32.mrf.mxu1 }
 0x31f   : > { %v3881_v44 = vadd.f32 %v6818_v55, %v3842_v19  ;;  %v3753_v10 = vadd.f32 %v5161_v28, %v3752_v43  ;;  %v3768_v32 = vpop.f32.mrf.mxu0 }
 0x320   : > { %v5163_v38 = vpop.f32.mrf.mxu1 }
 0x321   : > { %v3913_v52 = vmax.f32 %v3881_v44, 0.0  ;;  %v3843_v0 = vadd.f32 %v3753_v10, %v6761_v17  ;;  %v5164_v53 = vadd.f32 %v5163_v38, %v5162_v56 }
 0x322   : > { %v5165_v26 = vpop.f32.mrf.mxu1 }
 0x323   : > { %v3756_v59 = vadd.f32 %v5164_v53, %v3755_v49  ;;  %v3939_v2 = vpack.c.bf16 %v3913_v52, %v3912_v60  ;;  %v3882_v61 = vadd.f32 %v6818_v55, %v3843_v0 }
 0x324   : > { %v5166_v30 = vpop.f32.mrf.mxu1 }
 0x325   : > { %v3844_v33 = vadd.f32 %v3756_v59, %v6766_v25  ;;  %v5167_v45 = vadd.f32 %v5166_v30, %v5165_v26  ;;  %5484 = vmatmul.mubr.bf16.gmra.mxu0 %v3939_v2  ;;  %v3914_v13 = vmax.f32 %v3882_v61, 0.0 }
 0x326   : > { %v5168_v37 = vpop.f32.mrf.mxu1 }
 0x327   : > { %v3761_v46 = vadd.f32 %v5441_v29, %v5167_v45  ;;  %v3883_v21 = vadd.f32 %v6818_v55, %v3844_v33  ;;  %v5446_v29 = vpop.f32.mrf.mxu0 }
 0x328   : > { %v5169_v40 = vpop.f32.mrf.mxu1 }
 0x329   : > { %v3845_v17 = vadd.f32 %v3761_v46, %v6758_v20  ;;  %v5170_v54 = vadd.f32 %v5169_v40, %v5168_v37  ;;  %v3915_v48 = vmax.f32 %v3883_v21, 0.0  ;;  %v3771_v5 = vpop.f32.mrf.mxu0 }
 0x32a   : > { %v5171_v3 = vpop.f32.mrf.mxu1 }
 0x32b   : > { %v3764_v50 = vadd.f32 %v5442_v58, %v5170_v54  ;;  %v3940_v27 = vpack.c.bf16 %v3915_v48, %v3914_v13  ;;  %v3884_v18 = vadd.f32 %v6818_v55, %v3845_v17  ;;  %v5449_v38 = vpop.f32.mrf.mxu0 }
 0x32c   : > { %v5172_v25 = vpop.f32.mrf.mxu1 }
 0x32d   : > { %v3846_v6 = vadd.f32 %v3764_v50, %v6763_v14  ;;  %v5173_v22 = vadd.f32 %v5172_v25, %v5171_v3  ;;  %5487 = vmatprep.mubr.bf16.mxu0 %v3940_v27  ;;  %v3916_v47 = vmax.f32 %v3884_v18, 0.0  ;;  %v3784_v2 = vpop.f32.mrf.mxu0 }
 0x32e   : > { %v5174_v31 = vpop.f32.mrf.mxu1 }
 0x32f   : > { %v3885_v36 = vadd.f32 %v6818_v55, %v3846_v6  ;;  %v3769_v43 = vadd.f32 %v5173_v22, %v3768_v32 }
 0x330   : > { %v5175_v20 = vpop.f32.mrf.mxu1 }
 0x331   : > { %v3917_v1 = vmax.f32 %v3885_v36, 0.0  ;;  %v3847_v35 = vadd.f32 %v3769_v43, %v6772_v7  ;;  %v5176_v57 = vadd.f32 %v5175_v20, %v5174_v31 }
 0x332   : > { %v5177_v19 = vpop.f32.mrf.mxu1 }
 0x333   : > { %v3772_v28 = vadd.f32 %v5176_v57, %v3771_v5  ;;  %v3941_v58 = vpack.c.bf16 %v3917_v1, %v3916_v47  ;;  %v3886_v10 = vadd.f32 %v6818_v55, %v3847_v35 }
 0x334   : > { %v5178_v56 = vpop.f32.mrf.mxu1 }
 0x335   : > { %v3848_v14 = vadd.f32 %v3772_v28, %v6777_v63  ;;  %v5179_v44 = vadd.f32 %v5178_v56, %v5177_v19  ;;  %5488 = vmatmul.mubr.bf16.gmra.mxu0 %v3941_v58  ;;  %v3918_v26 = vmax.f32 %v3886_v10, 0.0 }
 0x336   : > { %v5180_v60 = vpop.f32.mrf.mxu1 }
 0x337   : > { %v3777_v52 = vadd.f32 %v5445_v62, %v5179_v44  ;;  %v3887_v0 = vadd.f32 %v6818_v55, %v3848_v14  ;;  %v5450_v62 = vpop.f32.mrf.mxu0 }
 0x338   : > { %v5181_v53 = vpop.f32.mrf.mxu1 }
 0x339   : > { %v3849_v7 = vadd.f32 %v3777_v52, %v6770_v11  ;;  %v5182_v49 = vadd.f32 %v5181_v53, %v5180_v60  ;;  %v3919_v59 = vmax.f32 %v3887_v0, 0.0  ;;  %v3787_v3 = vpop.f32.mrf.mxu0 }
 0x33a   : > { %v5183_v30 = vpop.f32.mrf.mxu1 }
 0x33b   : > { %v3780_v33 = vadd.f32 %v5446_v29, %v5182_v49  ;;  %v3942_v45 = vpack.c.bf16 %v3919_v59, %v3918_v26  ;;  %v3888_v61 = vadd.f32 %v6818_v55, %v3849_v7  ;;  %v5453_v29 = vpop.f32.mrf.mxu0 }
 0x33c   : > { %v5184_v63 = vpop.f32.mrf.mxu1 }
 0x33d   : > { %v3850_v37 = vadd.f32 %v3780_v33, %v6774_v16  ;;  %v5185_v46 = vadd.f32 %v5184_v63, %v5183_v30  ;;  %5491 = vmatprep.mubr.bf16.mxu0 %v3942_v45  ;;  %v3920_v54 = vmax.f32 %v3888_v61, 0.0  ;;  %v3800_v57 = vpop.f32.mrf.mxu0 }
 0x33e   : > { %v5186_v21 = vpop.f32.mrf.mxu1 }
 0x33f   : > { %v3889_v40 = vadd.f32 %v6818_v55, %v3850_v37  ;;  %v3785_v17 = vadd.f32 %v5185_v46, %v3784_v2  ;;  %v5454_v44 = vpop.f32.mrf.mxu0 }
 0x340   : > { %v5187_v11 = vpop.f32.mrf.mxu1 }
 0x341   : > { %v3921_v13 = vmax.f32 %v3889_v40, 0.0  ;;  %v3851_v48 = vadd.f32 %v3785_v17, %v6782_v41  ;;  %v5188_v32 = vadd.f32 %v5187_v11, %v5186_v21  ;;  %v3803_v49 = vpop.f32.mrf.mxu0 }
 0x342   : > { %v5189_v50 = vpop.f32.mrf.mxu1 }
 0x343   : > { %v3788_v27 = vadd.f32 %v5188_v32, %v3787_v3  ;;  %v3943_v25 = vpack.c.bf16 %v3921_v13, %v3920_v54  ;;  %v3890_v22 = vadd.f32 %v6818_v55, %v3851_v48  ;;  %v5457_v33 = vpop.f32.mrf.mxu0 }
 0x344   : > { %v5190_v18 = vpop.f32.mrf.mxu1 }
 0x345   : > { %v3852_v16 = vadd.f32 %v3788_v27, %v6787_v12  ;;  %v5191_v6 = vadd.f32 %v5190_v18, %v5189_v50  ;;  %5492 = vmatmul.mubr.bf16.gmra.mxu0 %v3943_v25  ;;  %v3922_v1 = vmax.f32 %v3890_v22, 0.0  ;;  %v3816_v21 = vpop.f32.mrf.mxu0 }
 0x346   : > { %v5192_v31 = vpop.f32.mrf.mxu1 }
 0x347   : > { %v3793_v36 = vadd.f32 %v5449_v38, %v5191_v6  ;;  %v3891_v43 = vadd.f32 %v6818_v55, %v3852_v16 }
 0x348   : > { %v5193_v20 = vpop.f32.mrf.mxu1 }
 0x349   : > { %v3853_v41 = vadd.f32 %v3793_v36, %v6779_v4  ;;  %v5194_v47 = vadd.f32 %v5193_v20, %v5192_v31  ;;  %v3923_v35 = vmax.f32 %v3891_v43, 0.0 }
 0x34a   : > { %v5195_v5 = vpop.f32.mrf.mxu1 }
 0x34b   : > { %v3796_v19 = vadd.f32 %v5450_v62, %v5194_v47  ;;  %v3944_v28 = vpack.c.bf16 %v3923_v35, %v3922_v1  ;;  %v3892_v58 = vadd.f32 %v6818_v55, %v3853_v41 }
 0x34c   : > { %v5196_v12 = vpop.f32.mrf.mxu1 }
 0x34d   : > { %v3854_v56 = vadd.f32 %v3796_v19, %v6784_v24  ;;  %v5197_v14 = vadd.f32 %v5196_v12, %v5195_v5  ;;  %5495 = vmatprep.mubr.bf16.mxu0 %v3944_v28  ;;  %v3924_v52 = vmax.f32 %v3892_v58, 0.0 }
 0x34e   : > { %v5198_v10 = vpop.f32.mrf.mxu1 }
 0x34f   : > { %v3893_v38 = vadd.f32 %v6818_v55, %v3854_v56  ;;  %v3801_v60 = vadd.f32 %v5197_v14, %v3800_v57 }
 0x350   : > { %v5199_v4 = vpop.f32.mrf.mxu1 }
 0x351   : > { %v3925_v0 = vmax.f32 %v3893_v38, 0.0  ;;  %v3855_v53 = vadd.f32 %v3801_v60, %v6791_v51  ;;  %v5200_v7 = vadd.f32 %v5199_v4, %v5198_v10 }
 0x352   : > { %v5201_v26 = vpop.f32.mrf.mxu1 }
 0x353   : > { %v3804_v59 = vadd.f32 %v5200_v7, %v3803_v49  ;;  %v3945_v2 = vpack.c.bf16 %v3925_v0, %v3924_v52  ;;  %v3894_v63 = vadd.f32 %v6818_v55, %v3855_v53  ;;  %v4184_v53 = vld [vmem:[%s6212_s19 + $0x10] sm:$0xff]  ;;  %v4182_v49 = vld [vmem:[%s6212_s19] sm:$0xff] }
 0x354   : > { %v5202_v30 = vpop.f32.mrf.mxu1 }
 0x355   : > { %v3856_v24 = vadd.f32 %v3804_v59, %v6794_v34  ;;  %v5203_v45 = vadd.f32 %v5202_v30, %v5201_v26  ;;  %5496 = vmatmul.mubr.bf16.gmra.mxu0 %v3945_v2  ;;  %v3926_v17 = vmax.f32 %v3894_v63, 0.0  ;;  %v5458_v34 = vpop.f32.mrf.mxu0  ;;  %v4185_v2 = vld [vmem:[%s6212_s19 + $0x18] sm:$0xff]  ;;  %v4183_v63 = vld [vmem:[%s6212_s19 + $0x8] sm:$0xff] }
 0x356   : > { %v5204_v61 = vpop.f32.mrf.mxu1 }
 0x357   : > { %v3809_v37 = vadd.f32 %v5453_v29, %v5203_v45  ;;  %v3895_v46 = vadd.f32 %v6818_v55, %v3856_v24 }
 0x358   : > { %v5205_v62 = vpop.f32.mrf.mxu1 }
 0x359   : > { %v3857_v51 = vadd.f32 %v3809_v37, %v6796_v42  ;;  %v5206_v40 = vadd.f32 %v5205_v62, %v5204_v61  ;;  %v3927_v11 = vmax.f32 %v3895_v46, 0.0  ;;  %v3819_v42 = vpop.f32.mrf.mxu0 }
 0x35a   : > { %v5207_v54 = vpop.f32.mrf.mxu1 }
 0x35b   : > { %v3812_v13 = vadd.f32 %v5454_v44, %v5206_v40  ;;  %v3946_v48 = vpack.c.bf16 %v3927_v11, %v3926_v17  ;;  %v3896_v3 = vadd.f32 %v6818_v55, %v3857_v51  ;;  %v4188_v17 = vld [vmem:[%s6212_s19 + $0x30] sm:$0xff] }
 0x35c   : > { %v5208_v32 = vpop.f32.mrf.mxu1 }
 0x35d   : > { %v3858_v50 = vadd.f32 %v3812_v13, %v6799_v9  ;;  %v5209_v27 = vadd.f32 %v5208_v32, %v5207_v54  ;;  %5499 = vmatprep.mubr.bf16.mxu0 %v3946_v48  ;;  %v3928_v22 = vmax.f32 %v3896_v3, 0.0  ;;  %v4186_v13 = vld [vmem:[%s6212_s19 + $0x20] sm:$0xff]  ;;  %v4189_v3 = vld [vmem:[%s6212_s19 + $0x38] sm:$0xff] }
 0x35e   : > { %v5210_v25 = vpop.f32.mrf.mxu1 }
 0x35f   : > { %v3897_v18 = vadd.f32 %v6818_v55, %v3858_v50  ;;  %v3817_v16 = vadd.f32 %v5209_v27, %v3816_v21 }
 0x360   : > { %v5211_v6 = vpop.f32.mrf.mxu1 }
 0x361   : > { %v3929_v29 = vmax.f32 %v3897_v18, 0.0  ;;  %v3859_v31 = vadd.f32 %v3817_v16, %v6804_v15  ;;  %v5212_v36 = vadd.f32 %v5211_v6, %v5210_v25  ;;  %v4187_v16 = vld [vmem:[%s6212_s19 + $0x28] sm:$0xff] }
 0x362   : > { %v5213_v43 = vpop.f32.mrf.mxu1 }
 0x363   : > { %v3820_v20 = vadd.f32 %v5212_v36, %v3819_v42  ;;  %v3947_v41 = vpack.c.bf16 %v3929_v29, %v3928_v22  ;;  %v3898_v1 = vadd.f32 %v6818_v55, %v3859_v31 }
 0x364   : > { %v5214_v47 = vpop.f32.mrf.mxu1 }
 0x365   : > { %v3860_v9 = vadd.f32 %v3820_v20, %v6806_v39  ;;  %v5215_v35 = vadd.f32 %v5214_v47, %v5213_v43  ;;  %5500 = vmatmul.mubr.bf16.gmra.mxu0 %v3947_v41  ;;  %v3930_v12 = vmax.f32 %v3898_v1, 0.0  ;;  %v4192_v20 = vld [vmem:[%s6212_s19 + $0x50] sm:$0xff]  ;;  %v4190_v1 = vld [vmem:[%s6212_s19 + $0x40] sm:$0xff] }
 0x366   : > { %v5216_v57 = vpop.f32.mrf.mxu1 }
 0x367   : > { %v3899_v5 = vadd.f32 %v6818_v55, %v3860_v9  ;;  %v3825_v19 = vadd.f32 %v5457_v33, %v5215_v35 }
 0x368   : > { %v5217_v28 = vpop.f32.mrf.mxu1 }
 0x369   : > { %v3931_v58 = vmax.f32 %v3899_v5, 0.0  ;;  %v3861_v15 = vadd.f32 %v3825_v19, %v6809_v8  ;;  %v5218_v56 = vadd.f32 %v5217_v28, %v5216_v57  ;;  %v6886_v8 = vld [vmem:[%s7044_s6] ss:$0 sm:$0xff]  ;;  %v4193_v5 = vld [vmem:[%s6212_s19 + $0x58] sm:$0xff] }
 0x36b   : > { %v3828_v14 = vadd.f32 %v5458_v34, %v5218_v56  ;;  %v3948_v44 = vpack.c.bf16 %v3931_v58, %v3930_v12  ;;  %v3900_v10 = vadd.f32 %v6818_v55, %v3861_v15  ;;  %v4191_v15 = vld [vmem:[%s6212_s19 + $0x48] sm:$0xff] }
 0x36d   : > { %v3862_v39 = vadd.f32 %v3828_v14, %v6812_v23  ;;  %5503 = vmatprep.mubr.bf16.mxu0 %v3948_v44  ;;  %v3932_v60 = vmax.f32 %v3900_v10, 0.0 }
 0x36f   : > { %v3901_v38 = vadd.f32 %v6818_v55, %v3862_v39 }
 0x371   : > { %v3933_v4 = vmax.f32 %v3901_v38, 0.0 }
 0x373   : > { %v3949_v52 = vpack.c.bf16 %v3933_v4, %v3932_v60  ;;  %v4196_v4 = vld [vmem:[%s6212_s19 + $0x70] sm:$0xff] }
 0x375   : > { %5504 = vmatmul.mubr.bf16.gmra.mxu0 %v3949_v52 }
 0x3c7   : > { %v5477_v0 = vpop.f32.mrf.mxu0 }
 0x3c8   : > { %v4064_v7 = vadd.f32 %v5477_v0, %v6886_v8 }
 0x3c9   : > { %v4055_v23 = vpop.f32.mrf.mxu0 }
 0x3ca   : > { %v4216_v26 = vadd.f32 %v4184_v53, %v4064_v7  ;;  %v4056_v55 = vadd.f32 %v6886_v8, %v4055_v23  ;;  %v4194_v53 = vld [vmem:[%s6212_s19 + $0x60] sm:$0xff] }
 0x3cb   : > { %v5478_v59 = vpop.f32.mrf.mxu0 }
 0x3cc   : > { %v4248_v30 = vmax.f32 %v4216_v26, 0.0  ;;  %v4214_v33 = vadd.f32 %v4182_v49, %v4056_v55  ;;  %v4067_v24 = vadd.f32 %v5478_v59, %v6886_v8  ;;  %v4197_v26 = vld [vmem:[%s6212_s19 + $0x78] sm:$0xff] }
 0x3cd   : > { %v4058_v45 = vpop.f32.mrf.mxu0 }
 0x3ce   : > { %4280 = vst [vmem:[%s6897_s12 + $0x10] sm:$0xff] %v4248_v30  ;;  %v4246_v61 = vmax.f32 %v4214_v33, 0.0  ;;  %v4217_v37 = vadd.f32 %v4185_v2, %v4067_v24  ;;  %v4059_v46 = vadd.f32 %v6886_v8, %v4058_v45  ;;  %v4195_v33 = vld [vmem:[%s6212_s19 + $0x68] sm:$0xff] }
 0x3d0   : > { %4278 = vst [vmem:[%s6897_s12] sm:$0xff] %v4246_v61  ;;  %v4249_v62 = vmax.f32 %v4217_v37, 0.0  ;;  %v4215_v21 = vadd.f32 %v4183_v63, %v4059_v46 }
 0x3d2   : > { %4281 = vst [vmem:[%s6897_s12 + $0x18] sm:$0xff] %v4249_v62  ;;  %v4247_v51 = vmax.f32 %v4215_v21, 0.0  ;;  %v4200_v21 = vld [vmem:[%s6212_s19 + $0x90] sm:$0xff] }
 0x3d4   : > { %4279 = vst [vmem:[%s6897_s12 + $0x8] sm:$0xff] %v4247_v51 }
 0x3d5   : > { %v5481_v40 = vpop.f32.mrf.mxu0 }
 0x3d6   : > { %v4080_v11 = vadd.f32 %v5481_v40, %v6886_v8 }
 0x3d7   : > { %v4071_v54 = vpop.f32.mrf.mxu0 }
 0x3d8   : > { %v4220_v48 = vadd.f32 %v4188_v17, %v4080_v11  ;;  %v4072_v32 = vadd.f32 %v6886_v8, %v4071_v54  ;;  %v4198_v17 = vld [vmem:[%s6212_s19 + $0x80] sm:$0xff] }
 0x3d9   : > { %v5482_v34 = vpop.f32.mrf.mxu0 }
 0x3da   : > { %v4252_v50 = vmax.f32 %v4220_v48, 0.0  ;;  %v4218_v27 = vadd.f32 %v4186_v13, %v4072_v32  ;;  %v4083_v25 = vadd.f32 %v5482_v34, %v6886_v8  ;;  %v4201_v48 = vld [vmem:[%s6212_s19 + $0x98] sm:$0xff] }
 0x3db   : > { %v4074_v18 = vpop.f32.mrf.mxu0 }
 0x3dc   : > { %4284 = vst [vmem:[%s6897_s12 + $0x30] sm:$0xff] %v4252_v50  ;;  %v4250_v6 = vmax.f32 %v4218_v27, 0.0  ;;  %v4221_v42 = vadd.f32 %v4189_v3, %v4083_v25  ;;  %v4075_v22 = vadd.f32 %v6886_v8, %v4074_v18  ;;  %v4199_v27 = vld [vmem:[%s6212_s19 + $0x88] sm:$0xff] }
 0x3de   : > { %4282 = vst [vmem:[%s6897_s12 + $0x20] sm:$0xff] %v4250_v6  ;;  %v4253_v29 = vmax.f32 %v4221_v42, 0.0  ;;  %v4219_v31 = vadd.f32 %v4187_v16, %v4075_v22 }
 0x3e0   : > { %4285 = vst [vmem:[%s6897_s12 + $0x38] sm:$0xff] %v4253_v29  ;;  %v4251_v36 = vmax.f32 %v4219_v31, 0.0  ;;  %v4204_v31 = vld [vmem:[%s6212_s19 + $0xb0] sm:$0xff] }
 0x3e2   : > { %4283 = vst [vmem:[%s6897_s12 + $0x28] sm:$0xff] %v4251_v36 }
 0x3e5   : > { %v5485_v43 = vpop.f32.mrf.mxu0 }
 0x3e6   : > { %v4096_v41 = vadd.f32 %v5485_v43, %v6886_v8 }
 0x3e7   : > { %v4087_v47 = vpop.f32.mrf.mxu0 }
 0x3e8   : > { %v4224_v9 = vadd.f32 %v4192_v20, %v4096_v41  ;;  %v4088_v35 = vadd.f32 %v6886_v8, %v4087_v47  ;;  %v4202_v20 = vld [vmem:[%s6212_s19 + $0xa0] sm:$0xff] }
 0x3e9   : > { %v5486_v57 = vpop.f32.mrf.mxu0 }
 0x3ea   : > { %v4256_v19 = vmax.f32 %v4224_v9, 0.0  ;;  %v4222_v28 = vadd.f32 %v4190_v1, %v4088_v35  ;;  %v4099_v12 = vadd.f32 %v5486_v57, %v6886_v8  ;;  %v4205_v9 = vld [vmem:[%s6212_s19 + $0xb8] sm:$0xff] }
 0x3eb   : > { %v4090_v58 = vpop.f32.mrf.mxu0 }
 0x3ec   : > { %4288 = vst [vmem:[%s6897_s12 + $0x50] sm:$0xff] %v4256_v19  ;;  %v4254_v56 = vmax.f32 %v4222_v28, 0.0  ;;  %v4225_v14 = vadd.f32 %v4193_v5, %v4099_v12  ;;  %v4091_v44 = vadd.f32 %v6886_v8, %v4090_v58  ;;  %v4203_v28 = vld [vmem:[%s6212_s19 + $0xa8] sm:$0xff] }
 0x3ee   : > { %4286 = vst [vmem:[%s6897_s12 + $0x40] sm:$0xff] %v4254_v56  ;;  %v4257_v10 = vmax.f32 %v4225_v14, 0.0  ;;  %v4223_v39 = vadd.f32 %v4191_v15, %v4091_v44 }
 0x3f0   : > { %4289 = vst [vmem:[%s6897_s12 + $0x58] sm:$0xff] %v4257_v10  ;;  %v4255_v38 = vmax.f32 %v4223_v39, 0.0  ;;  %v4208_v39 = vld [vmem:[%s6212_s19 + $0xd0] sm:$0xff] }
 0x3f2   : > { %4287 = vst [vmem:[%s6897_s12 + $0x48] sm:$0xff] %v4255_v38 }
 0x3f5   : > { %v5489_v60 = vpop.f32.mrf.mxu0 }
 0x3f6   : > { %v4112_v52 = vadd.f32 %v5489_v60, %v6886_v8 }
 0x3f7   : > { %v4103_v0 = vpop.f32.mrf.mxu0 }
 0x3f8   : > { %v4228_v7 = vadd.f32 %v4196_v4, %v4112_v52  ;;  %v4104_v23 = vadd.f32 %v6886_v8, %v4103_v0  ;;  %v4206_v4 = vld [vmem:[%s6212_s19 + $0xc0] sm:$0xff] }
 0x3f9   : > { %v5490_v49 = vpop.f32.mrf.mxu0 }
 0x3fa   : > { %v4260_v55 = vmax.f32 %v4228_v7, 0.0  ;;  %v4226_v59 = vadd.f32 %v4194_v53, %v4104_v23  ;;  %v4115_v2 = vadd.f32 %v5490_v49, %v6886_v8  ;;  %v4209_v7 = vld [vmem:[%s6212_s19 + $0xd8] sm:$0xff] }
 0x3fb   : > { %v4106_v30 = vpop.f32.mrf.mxu0 }
 0x3fc   : > { %4292 = vst [vmem:[%s6897_s12 + $0x70] sm:$0xff] %v4260_v55  ;;  %v4258_v24 = vmax.f32 %v4226_v59, 0.0  ;;  %v4229_v45 = vadd.f32 %v4197_v26, %v4115_v2  ;;  %v4107_v63 = vadd.f32 %v6886_v8, %v4106_v30  ;;  %v4207_v59 = vld [vmem:[%s6212_s19 + $0xc8] sm:$0xff] }
 0x3fe   : > { %4290 = vst [vmem:[%s6897_s12 + $0x60] sm:$0xff] %v4258_v24  ;;  %v4261_v61 = vmax.f32 %v4229_v45, 0.0  ;;  %v4227_v37 = vadd.f32 %v4195_v33, %v4107_v63 }
 0x400   : > { %4293 = vst [vmem:[%s6897_s12 + $0x78] sm:$0xff] %v4261_v61  ;;  %v4259_v46 = vmax.f32 %v4227_v37, 0.0  ;;  %v4212_v37 = vld [vmem:[%s6212_s19 + $0xf0] sm:$0xff] }
 0x402   : > { %4291 = vst [vmem:[%s6897_s12 + $0x68] sm:$0xff] %v4259_v46 }
 0x405   : > { %v5493_v62 = vpop.f32.mrf.mxu0 }
 0x406   : > { %v4128_v51 = vadd.f32 %v5493_v62, %v6886_v8 }
 0x407   : > { %v4119_v40 = vpop.f32.mrf.mxu0 }
 0x408   : > { %v4232_v11 = vadd.f32 %v4200_v21, %v4128_v51  ;;  %v4120_v54 = vadd.f32 %v6886_v8, %v4119_v40  ;;  %v4210_v21 = vld [vmem:[%s6212_s19 + $0xe0] sm:$0xff] }
 0x409   : > { %v5494_v13 = vpop.f32.mrf.mxu0 }
 0x40a   : > { %v4264_v32 = vmax.f32 %v4232_v11, 0.0  ;;  %v4230_v34 = vadd.f32 %v4198_v17, %v4120_v54  ;;  %v4131_v3 = vadd.f32 %v5494_v13, %v6886_v8  ;;  %v4213_v11 = vld [vmem:[%s6212_s19 + $0xf8] sm:$0xff] }
 0x40b   : > { %v4122_v50 = vpop.f32.mrf.mxu0 }
 0x40c   : > { %4296 = vst [vmem:[%s6897_s12 + $0x90] sm:$0xff] %v4264_v32  ;;  %v4262_v25 = vmax.f32 %v4230_v34, 0.0  ;;  %v4233_v18 = vadd.f32 %v4201_v48, %v4131_v3  ;;  %v4123_v16 = vadd.f32 %v6886_v8, %v4122_v50  ;;  %v4211_v34 = vld [vmem:[%s6212_s19 + $0xe8] sm:$0xff]  ;;  %s4311_s19 = scalar_lea.sflag [#allocation5], %s6206_s16 }
 0x40e   : > { %4294 = vst [vmem:[%s6897_s12 + $0x80] sm:$0xff] %v4262_v25  ;;  %v4265_v6 = vmax.f32 %v4233_v18, 0.0  ;;  %v4231_v42 = vadd.f32 %v4199_v27, %v4123_v16 }
 0x410   : > { %4297 = vst [vmem:[%s6897_s12 + $0x98] sm:$0xff] %v4265_v6  ;;  %v4263_v22 = vmax.f32 %v4231_v42, 0.0 }
 0x412   : > { %4295 = vst [vmem:[%s6897_s12 + $0x88] sm:$0xff] %v4263_v22 }
 0x415   : > { %v5497_v29 = vpop.f32.mrf.mxu0 }
 0x416   : > { %v4144_v36 = vadd.f32 %v5497_v29, %v6886_v8 }
 0x417   : > { %v4135_v43 = vpop.f32.mrf.mxu0 }
 0x418   : > { %v4236_v41 = vadd.f32 %v4204_v31, %v4144_v36  ;;  %v4136_v47 = vadd.f32 %v6886_v8, %v4135_v43 }
 0x419   : > { %v5498_v1 = vpop.f32.mrf.mxu0 }
 0x41a   : > { %v4268_v35 = vmax.f32 %v4236_v41, 0.0  ;;  %v4234_v57 = vadd.f32 %v4202_v20, %v4136_v47  ;;  %v4147_v5 = vadd.f32 %v5498_v1, %v6886_v8 }
 0x41b   : > { %v4138_v19 = vpop.f32.mrf.mxu0 }
 0x41c   : > { %4300 = vst [vmem:[%s6897_s12 + $0xb0] sm:$0xff] %v4268_v35  ;;  %v4266_v12 = vmax.f32 %v4234_v57, 0.0  ;;  %v4237_v58 = vadd.f32 %v4205_v9, %v4147_v5  ;;  %v4139_v15 = vadd.f32 %v6886_v8, %v4138_v19 }
 0x41e   : > { %4298 = vst [vmem:[%s6897_s12 + $0xa0] sm:$0xff] %v4266_v12  ;;  %v4269_v56 = vmax.f32 %v4237_v58, 0.0  ;;  %v4235_v14 = vadd.f32 %v4203_v28, %v4139_v15 }
 0x420   : > { %4301 = vst [vmem:[%s6897_s12 + $0xb8] sm:$0xff] %v4269_v56  ;;  %v4267_v44 = vmax.f32 %v4235_v14, 0.0 }
 0x422   : > { %4299 = vst [vmem:[%s6897_s12 + $0xa8] sm:$0xff] %v4267_v44 }
 0x425   : > { %v5501_v10 = vpop.f32.mrf.mxu0 }
 0x426   : > { %v4160_v38 = vadd.f32 %v5501_v10, %v6886_v8 }
 0x427   : > { %v4151_v60 = vpop.f32.mrf.mxu0 }
 0x428   : > { %v4240_v52 = vadd.f32 %v4208_v39, %v4160_v38  ;;  %v4152_v0 = vadd.f32 %v6886_v8, %v4151_v60 }
 0x429   : > { %v5502_v53 = vpop.f32.mrf.mxu0 }
 0x42a   : > { %v4272_v23 = vmax.f32 %v4240_v52, 0.0  ;;  %v4238_v49 = vadd.f32 %v4206_v4, %v4152_v0  ;;  %v4163_v26 = vadd.f32 %v5502_v53, %v6886_v8 }
 0x42b   : > { %v4154_v55 = vpop.f32.mrf.mxu0 }
 0x42c   : > { %4304 = vst [vmem:[%s6897_s12 + $0xd0] sm:$0xff] %v4272_v23  ;;  %v4270_v2 = vmax.f32 %v4238_v49, 0.0  ;;  %v4241_v30 = vadd.f32 %v4209_v7, %v4163_v26  ;;  %v4155_v33 = vadd.f32 %v6886_v8, %v4154_v55 }
 0x42e   : > { %4302 = vst [vmem:[%s6897_s12 + $0xc0] sm:$0xff] %v4270_v2  ;;  %v4273_v24 = vmax.f32 %v4241_v30, 0.0  ;;  %v4239_v45 = vadd.f32 %v4207_v59, %v4155_v33 }
 0x430   : > { %4305 = vst [vmem:[%s6897_s12 + $0xd8] sm:$0xff] %v4273_v24  ;;  %v4271_v63 = vmax.f32 %v4239_v45, 0.0 }
 0x432   : > { %4303 = vst [vmem:[%s6897_s12 + $0xc8] sm:$0xff] %v4271_v63 }
 0x435   : > { %v5505_v61 = vpop.f32.mrf.mxu0 }
 0x436   : > { %v4176_v46 = vadd.f32 %v5505_v61, %v6886_v8 }
 0x437   : > { %v4167_v62 = vpop.f32.mrf.mxu0 }
 0x438   : > { %v4244_v51 = vadd.f32 %v4212_v37, %v4176_v46  ;;  %v4168_v40 = vadd.f32 %v6886_v8, %v4167_v62 }
 0x439   : > { %v5506_v17 = vpop.f32.mrf.mxu0 }
 0x43a   : > { %v4276_v54 = vmax.f32 %v4244_v51, 0.0  ;;  %v4242_v13 = vadd.f32 %v4210_v21, %v4168_v40  ;;  %v4179_v48 = vadd.f32 %v5506_v17, %v6886_v8 }
 0x43b   : > { %v4170_v32 = vpop.f32.mrf.mxu0 }
 0x43c   : > { %4308 = vst [vmem:[%s6897_s12 + $0xf0] sm:$0xff] %v4276_v54  ;;  %v4274_v3 = vmax.f32 %v4242_v13, 0.0  ;;  %v4245_v50 = vadd.f32 %v4213_v11, %v4179_v48  ;;  %v4171_v27 = vadd.f32 %v6886_v8, %v4170_v32 }
 0x43e   : > { %4306 = vst [vmem:[%s6897_s12 + $0xe0] sm:$0xff] %v4274_v3  ;;  %v4277_v25 = vmax.f32 %v4245_v50, 0.0  ;;  %v4243_v18 = vadd.f32 %v4211_v34, %v4171_v27 }
 0x440   : > { %4309 = vst [vmem:[%s6897_s12 + $0xf8] sm:$0xff] %v4277_v25  ;;  %v4275_v16 = vmax.f32 %v4243_v18, 0.0 }
 0x442   : > { %4307 = vst [vmem:[%s6897_s12 + $0xe8] sm:$0xff] %v4275_v16 }
 0x443   : > { %5958 = shalt.err (!%p5955_p9)
}
 0x444   : > { %s5959_s11 = scalar_lea.hbm %s6991_s30, 4096  ;;  %s5963_s29 = scalar_lea.hbm %s7045_s7, 8192 }
 0x445   : > { %p5960_p1 = scmp.ne.s32.totalorder %s6991_s30, %s5959_s11  ;;  %p5964_p11 = scmp.lt.s32.totalorder %s6991_s30, %s7045_s7 }
 0x446   : > { %p5965_p13 = scmp.lt.s32.totalorder %s5963_s29, %s5959_s11 }
 0x447   : > { %p5961_p8 = pnand %p5960_p1, %p7069_p6 }
 0x448   : > { %p5966_p2 = por %p5965_p13, %p5964_p11 }
 0x449   : > { %p5962_p10 = pneg %p5961_p8 }
 0x44b   : > { %p5967_p4 = pnand %p5966_p2, %p5962_p10 }
 0x44d   : > { %5970 = shalt.err (!%p5967_p4)
}
 0x44e   : > { %s6029_s1 = smov 128   ;;  %s6030_s18 = smov 8  }
 0x44f   : > { %5537 = dma.vmem_to_hbm [thread:$0]  (%p7069_p6), %s6993_s22, 4096, %s6991_s30, %s4311_s19, %s6029_s1, %s6029_s1, %s6030_s18  }
 0x450 PF: > { %s4339_s9 = sand.u32 1, %s6005_s24   ;;  %p7070_p12 = scmp.ne.s32.totalorder %s7052_s8, 0 }
 0x451   : > { %p7071_p0 = scmp.ge.s32.totalorder %s6017_s27, 2  ;;  %s4340_s28 = scalar_lea.sflag [#allocation5], %s4339_s9 }
 0x453   : > { %p5554_p5 = pnand %p7071_p0, %p7070_p12 }
 0x455   : > { %p5555_p3 = pneg %p5554_p5 }
 0x457   : > { %6000 = dma.done.wait (%p5555_p3), %s4340_s28, 4096  }
 0x458   : > { %6002 = vsyncadd (%p5555_p3), %s4340_s28, 4294963200  ;;  %p22_p7 = scmp.ge.s32.totalorder %s6151_s14, 4   ;;  %s7072_s24 = smov %s6009_s25 }
 0x459   : > { %s7073_s25 = smov %s6013_s26  ;;  %s7074_s26 = smov %s6161_s17 }
 0x45a   : > { %s7075_s27 = smov %s6151_s14  ;;  %24 = sbr.rel (!%p22_p7) target bundleno = 9 (0x9), region = 110 }
 0x45f   :  { %4345 = vsyncpa [#allocation4], 1 }
 0x460   :  { %4347 = vsyncpa [#allocation4 + $0x1], 1 }
 0x461   :  { %4348 = vsyncpa [#allocation7], 1 }
 0x462   :  { %4349 = vsyncpa [#allocation10], 1 }
 0x463   :  { %4350 = vsyncpa [#allocation5], 1 }
 0x464   :  { %4352 = vsyncpa [#allocation5 + $0x1], 1 }

</bundles_post_ra>
